<compile_context>
chip_gen: v6e
topology: v6e:2x2x1
jax: 0.10.0
libtpu: 0.0.40
codegen_flags: <defaults>
</compile_context>

<pallas_src>
import numpy as np
import jax
import jax.numpy as jnp
from jax.experimental import pallas as pl
from jax.experimental.pallas import tpu as pltpu

N_FEATURES = 13          # len([COMPOUND, NEG, POS, NEU, COM_LEN] + 8 emotions)
C_IN = 300               # embedding dim expected by conv1
K1, C1 = 8, 128          # conv1: kernel 8, out channels 128
K2, C2 = 4, 64           # conv2: kernel 4, out channels 64
POOL = 4                 # both MaxPool1d layers


def _deepcnn_kernel(xcol_ref, num_ref, sel_ref,
                    w1_ref, b1_ref, w2_ref, b2_ref,
                    wn_ref, bn_ref,
                    wf1a_ref, wf1b_ref, bf1_ref,
                    wf2_ref, bf2_ref, wf3_ref, bf3_ref,
                    wf4_ref, bf4_ref, wo_ref, bo_ref,
                    out_ref):
    TB = out_ref.shape[0]                # batch rows handled by this grid step
    n1 = sel_ref.shape[0] // TB          # pool1 output length
    L2 = n1 - K2 + 1                     # conv2 output length
    M = sel_ref.shape[1]                 # rows of the sliding window-4 max
    cdt = w1_ref.dtype                   # matmul operand dtype (f32 or bf16)

    def mm(a, b):                        # MXU dot, f32 accumulation
        return jnp.dot(a.astype(cdt), b.astype(cdt),
                       preferred_element_type=jnp.float32)

    # ---- conv1 (im2col) + bias + ReLU: one (TB*L1, K1*C_IN)@(K1*C_IN, C1) dot
    y1 = jnp.maximum(mm(xcol_ref[...], w1_ref[...]) + b1_ref[...], 0.0)

    # ---- maxpool1: sliding window-4 max over rows, then a 0/1 selector matmul
    #      gathering pooled rows in (position-major, batch-minor) order.
    m = y1[0:M, :]
    for j in range(1, POOL):
        m = jnp.maximum(m, y1[j:j + M, :])
    p1 = mm(sel_ref[...], m)                          # (n1*TB, C1)

    # ---- conv2: K2 tap dots with M = L2*TB rows (contiguous, aligned slices)
    y2 = mm(p1[0:L2 * TB, :], w2_ref[0]) + b2_ref[...]
    for k in range(1, K2):
        y2 = y2 + mm(p1[k * TB:(k + L2) * TB, :], w2_ref[k])
    y2 = jnp.maximum(y2, 0.0)                         # (L2*TB, C2)

    # ---- maxpool2 (single window of POOL positions) + flatten -> (TB, C2)
    x1 = y2[0:TB, :]
    for t in range(1, POOL):
        x1 = jnp.maximum(x1, y2[t * TB:(t + 1) * TB, :])

    # ---- numerical branch: fc_num + ReLU -> (TB, 128)
    x2 = jnp.maximum(mm(num_ref[...], wn_ref[...]) + bn_ref[...], 0.0)

    # dropout: identity (inference mode)
    # TODO(synk): training-mode stochastic dropout not implemented.

    # ---- fc1 on concat([x1, x2]) == x1 @ Wf1[:C2] + x2 @ Wf1[C2:]
    h = jnp.maximum(mm(x1, wf1a_ref[...]) + mm(x2, wf1b_ref[...])
                    + bf1_ref[...], 0.0)
    h = jnp.maximum(mm(h, wf2_ref[...]) + bf2_ref[...], 0.0)
    h = jnp.maximum(mm(h, wf3_ref[...]) + bf3_ref[...], 0.0)
    h = jnp.maximum(mm(h, wf4_ref[...]) + bf4_ref[...], 0.0)

    # single lane-masked block store for the whole batch tile
    out_ref[...] = (mm(h, wo_ref[...]) + bo_ref[...]).astype(out_ref.dtype)


def deepcnn_forward(x, num, p, *, compute_dtype=jnp.float32, batch_tile=8):
    """x: (B, L, 300) float32, num: (B, 13) float32 -> (B, 2) float32."""
    B, L, c = x.shape
    assert c == C_IN
    L1 = L - K1 + 1                      # conv1 output length
    n1 = L1 // POOL                      # pool1 output length
    L2 = n1 - K2 + 1                     # conv2 output length
    assert n1 >= K2 and L2 >= POOL and L2 // POOL == 1, (
        "sequence length must make flatten() produce exactly 64 features")
    assert batch_tile % 8 == 0, "batch tile must be sublane aligned"

    TB = batch_tile
    B_pad = ((B + TB - 1) // TB) * TB
    cdt = compute_dtype

    # ---- wrapper-side layout plumbing (XLA): batch pad + im2col + row flatten
    xp = jnp.pad(x, ((0, B_pad - B), (0, 0), (0, 0))).astype(cdt)
    xcol = jnp.concatenate([xp[:, k:k + L1, :] for k in range(K1)], axis=-1)
    xcol = xcol.reshape(B_pad * L1, K1 * C_IN)        # (B_pad*L1, 2400)
    nump = jnp.pad(num, ((0, B_pad - B), (0, 0))).astype(cdt)

    # 0/1 selector: row (i*TB + b) picks sliding-max row (b*L1 + POOL*i),
    # i.e. pool1 window i of batch row b, in position-major order.
    sel_np = np.zeros((n1 * TB, TB * L1 - (POOL - 1)), np.float32)
    for i in range(n1):
        for b in range(TB):
            sel_np[i * TB + b, b * L1 + POOL * i] = 1.0
    sel = jnp.asarray(sel_np, cdt)

    w1c = p["w1"].reshape(K1 * C_IN, C1).astype(cdt)  # matches im2col ordering
    weights = (
        sel, w1c, p["b1"].reshape(1, -1),
        p["w2"].astype(cdt), p["b2"].reshape(1, -1),
        p["wn"].astype(cdt), p["bn"].reshape(1, -1),
        p["wf1"][:C2, :].astype(cdt), p["wf1"][C2:, :].astype(cdt),
        p["bf1"].reshape(1, -1),
        p["wf2"].astype(cdt), p["bf2"].reshape(1, -1),
        p["wf3"].astype(cdt), p["bf3"].reshape(1, -1),
        p["wf4"].astype(cdt), p["bf4"].reshape(1, -1),
        p["wo"].astype(cdt), p["bo"].reshape(1, -1),
    )

    def _resident(a):                    # full block, VMEM-resident across grid
        nd = a.ndim
        return pl.BlockSpec(a.shape, lambda i, _nd=nd: (0,) * _nd)

    out_pad = pl.pallas_call(
        _deepcnn_kernel,
        out_shape=jax.ShapeDtypeStruct((B_pad, 2), jnp.float32),
        grid=(B_pad // TB,),
        in_specs=[pl.BlockSpec((TB * L1, K1 * C_IN), lambda i: (i, 0)),
                  pl.BlockSpec((TB, N_FEATURES), lambda i: (i, 0))]
                 + [_resident(a) for a in weights],
        out_specs=pl.BlockSpec((TB, 2), lambda i: (i, 0)),
        compiler_params=pltpu.CompilerParams(
            dimension_semantics=("parallel",)),
    )(xcol, nump, *weights)
    return out_pad[:B]


def reference_forward(x, num, p):
    """Pure-JAX reference matching the PyTorch forward (inference mode)."""
    hp = jax.lax.Precision.HIGHEST
    xc = jnp.transpose(x, (0, 2, 1))                              # (B, 300, L)
    w1 = jnp.transpose(p["w1"], (2, 1, 0))                        # (128, 300, 8)
    y = jax.lax.conv_general_dilated(xc, w1, (1,), "VALID",
                                     dimension_numbers=("NCH", "OIH", "NCH"),
                                     precision=hp)
    y = jax.nn.relu(y + p["b1"][None, :, None])
    y = jax.lax.reduce_window(y, -jnp.inf, jax.lax.max, (1, 1, 4), (1, 1, 4), "VALID")
    w2 = jnp.transpose(p["w2"], (2, 1, 0))                        # (64, 128, 4)
    y = jax.lax.conv_general_dilated(y, w2, (1,), "VALID",
                                     dimension_numbers=("NCH", "OIH", "NCH"),
                                     precision=hp)
    y = jax.nn.relu(y + p["b2"][None, :, None])
    y = jax.lax.reduce_window(y, -jnp.inf, jax.lax.max, (1, 1, 4), (1, 1, 4), "VALID")
    x1 = y.reshape(y.shape[0], -1)                                # (B, 64)
    x2 = jax.nn.relu(jnp.dot(num, p["wn"], precision=hp) + p["bn"])
    h = jnp.concatenate([x1, x2], axis=1)                         # (B, 192)
    h = jax.nn.relu(jnp.dot(h, p["wf1"], precision=hp) + p["bf1"])
    h = jax.nn.relu(jnp.dot(h, p["wf2"], precision=hp) + p["bf2"])
    h = jax.nn.relu(jnp.dot(h, p["wf3"], precision=hp) + p["bf3"])
    h = jax.nn.relu(jnp.dot(h, p["wf4"], precision=hp) + p["bf4"])
    return jnp.dot(h, p["wo"], precision=hp) + p["bo"]


def init_params(key):
    ks = jax.random.split(key, 18)

    def u(k, shape, fan_in):
        bound = 1.0 / np.sqrt(fan_in)
        return jax.random.uniform(k, shape, jnp.float32, -bound, bound)

    return {
        "w1": u(ks[0], (K1, C_IN, C1), C_IN * K1), "b1": u(ks[1], (C1,), C_IN * K1),
        "w2": u(ks[2], (K2, C1, C2), C1 * K2),     "b2": u(ks[3], (C2,), C1 * K2),
        "wn": u(ks[4], (N_FEATURES, 128), N_FEATURES), "bn": u(ks[5], (128,), N_FEATURES),
        "wf1": u(ks[6], (C2 + 128, 128), C2 + 128),    "bf1": u(ks[7], (128,), C2 + 128),
        "wf2": u(ks[8], (128, 64), 128),  "bf2": u(ks[9], (64,), 128),
        "wf3": u(ks[10], (64, 32), 64),   "bf3": u(ks[11], (32,), 64),
        "wf4": u(ks[12], (32, 16), 32),   "bf4": u(ks[13], (16,), 32),
        "wo": u(ks[14], (16, 2), 16),     "bo": u(ks[15], (2,), 16),
    }


if __name__ == "__main__":
    key = jax.random.PRNGKey(0)
    kp, kx, kn = jax.random.split(key, 3)

    B, L = 2, 35   # L=35 -> conv1:28 -> pool1:7 -> conv2:4 -> pool2:1 -> flatten:64
    params = init_params(kp)
    x = jax.random.normal(kx, (B, L, C_IN), jnp.float32)       # input_comment (B, L, 300)
    num = jax.random.normal(kn, (B, N_FEATURES), jnp.float32)  # input_numerical (B, 13)

    ref = jax.block_until_ready(reference_forward(x, num, params))

    # f32 path (default): tolerance covers MXU f32 accumulation differences only.
    out = jax.block_until_ready(deepcnn_forward(x, num, params))
    assert out.shape == (B, 2)
    np.testing.assert_allclose(np.asarray(out), np.asarray(ref), rtol=5e-3, atol=5e-3)

    # bf16 matmul operands (v6e/v7x fast path): looser, dtype-specific tolerance.
    out_bf16 = jax.block_until_ready(
        deepcnn_forward(x, num, params, compute_dtype=jnp.bfloat16))
    np.testing.assert_allclose(np.asarray(out_bf16), np.asarray(ref), rtol=5e-2, atol=5e-2)

    print("KERNEL_OK")
</pallas_src>

<mosaic_0001>
module attributes {stable_mosaic.version = 11 : i64} {
  func.func @_deepcnn_kernel(%arg0: i32, %arg1: memref<224x2400xf32, #tpu.memory_space<vmem>>, %arg2: memref<8x13xf32, #tpu.memory_space<vmem>>, %arg3: memref<56x221xf32, #tpu.memory_space<vmem>>, %arg4: memref<2400x128xf32, #tpu.memory_space<vmem>>, %arg5: memref<1x128xf32, #tpu.memory_space<vmem>>, %arg6: memref<4x128x64xf32, #tpu.memory_space<vmem>>, %arg7: memref<1x64xf32, #tpu.memory_space<vmem>>, %arg8: memref<13x128xf32, #tpu.memory_space<vmem>>, %arg9: memref<1x128xf32, #tpu.memory_space<vmem>>, %arg10: memref<64x128xf32, #tpu.memory_space<vmem>>, %arg11: memref<128x128xf32, #tpu.memory_space<vmem>>, %arg12: memref<1x128xf32, #tpu.memory_space<vmem>>, %arg13: memref<128x64xf32, #tpu.memory_space<vmem>>, %arg14: memref<1x64xf32, #tpu.memory_space<vmem>>, %arg15: memref<64x32xf32, #tpu.memory_space<vmem>>, %arg16: memref<1x32xf32, #tpu.memory_space<vmem>>, %arg17: memref<32x16xf32, #tpu.memory_space<vmem>>, %arg18: memref<1x16xf32, #tpu.memory_space<vmem>>, %arg19: memref<16x2xf32, #tpu.memory_space<vmem>>, %arg20: memref<1x2xf32, #tpu.memory_space<vmem>>, %arg21: memref<8x2xf32, #tpu.memory_space<vmem>>) attributes {dimension_semantics = [#tpu.dimension_semantics<parallel>], iteration_bounds = array<i64: 1>, scalar_prefetch = 0 : i64, scratch_operands = 0 : i64, tpu.core_type = #tpu.core_type<tc>, window_params = [{transform_indices = @transform_0, window_bounds = array<i64: 224, 2400>}, {transform_indices = @transform_1, window_bounds = array<i64: 8, 13>}, {pipeline_mode = #tpu.pipeline_mode<synchronous>, transform_indices = @transform_2, window_bounds = array<i64: 56, 221>}, {pipeline_mode = #tpu.pipeline_mode<synchronous>, transform_indices = @transform_3, window_bounds = array<i64: 2400, 128>}, {pipeline_mode = #tpu.pipeline_mode<synchronous>, transform_indices = @transform_4, window_bounds = array<i64: 1, 128>}, {pipeline_mode = #tpu.pipeline_mode<synchronous>, transform_indices = @transform_5, window_bounds = array<i64: 4, 128, 64>}, {pipeline_mode = #tpu.pipeline_mode<synchronous>, transform_indices = @transform_6, window_bounds = array<i64: 1, 64>}, {pipeline_mode = #tpu.pipeline_mode<synchronous>, transform_indices = @transform_7, window_bounds = array<i64: 13, 128>}, {pipeline_mode = #tpu.pipeline_mode<synchronous>, transform_indices = @transform_8, window_bounds = array<i64: 1, 128>}, {pipeline_mode = #tpu.pipeline_mode<synchronous>, transform_indices = @transform_9, window_bounds = array<i64: 64, 128>}, {pipeline_mode = #tpu.pipeline_mode<synchronous>, transform_indices = @transform_10, window_bounds = array<i64: 128, 128>}, {pipeline_mode = #tpu.pipeline_mode<synchronous>, transform_indices = @transform_11, window_bounds = array<i64: 1, 128>}, {pipeline_mode = #tpu.pipeline_mode<synchronous>, transform_indices = @transform_12, window_bounds = array<i64: 128, 64>}, {pipeline_mode = #tpu.pipeline_mode<synchronous>, transform_indices = @transform_13, window_bounds = array<i64: 1, 64>}, {pipeline_mode = #tpu.pipeline_mode<synchronous>, transform_indices = @transform_14, window_bounds = array<i64: 64, 32>}, {pipeline_mode = #tpu.pipeline_mode<synchronous>, transform_indices = @transform_15, window_bounds = array<i64: 1, 32>}, {pipeline_mode = #tpu.pipeline_mode<synchronous>, transform_indices = @transform_16, window_bounds = array<i64: 32, 16>}, {pipeline_mode = #tpu.pipeline_mode<synchronous>, transform_indices = @transform_17, window_bounds = array<i64: 1, 16>}, {pipeline_mode = #tpu.pipeline_mode<synchronous>, transform_indices = @transform_18, window_bounds = array<i64: 16, 2>}, {pipeline_mode = #tpu.pipeline_mode<synchronous>, transform_indices = @transform_19, window_bounds = array<i64: 1, 2>}, {transform_indices = @transform_20, window_bounds = array<i64: 8, 2>}]} {
    %c0 = arith.constant 0 : index
    %c0_0 = arith.constant 0 : index
    %0 = vector.load %arg1[%c0, %c0_0] : memref<224x2400xf32, #tpu.memory_space<vmem>>, vector<224x2400xf32>
    %c0_1 = arith.constant 0 : index
    %c0_2 = arith.constant 0 : index
    %1 = vector.load %arg4[%c0_1, %c0_2] : memref<2400x128xf32, #tpu.memory_space<vmem>>, vector<2400x128xf32>
    %cst = arith.constant dense<0.000000e+00> : vector<224x128xf32>
    %2 = tpu.matmul %0, %1, %cst {dimension_numbers = #tpu.dot_dimension_numbers<[1], [0], [0], [1], [0, 0, 1, 1], [], []>} : vector<224x2400xf32>, vector<2400x128xf32>, vector<224x128xf32> -> vector<224x128xf32>
    %c0_3 = arith.constant 0 : index
    %c0_4 = arith.constant 0 : index
    %3 = vector.load %arg5[%c0_3, %c0_4] : memref<1x128xf32, #tpu.memory_space<vmem>>, vector<1x128xf32>
    %4 = vector.broadcast %3 : vector<1x128xf32> to vector<224x128xf32>
    %5 = arith.addf %2, %4 : vector<224x128xf32>
    %cst_5 = arith.constant 0.000000e+00 : f32
    %6 = vector.broadcast %cst_5 : f32 to vector<224x128xf32>
    %7 = arith.maximumf %5, %6 : vector<224x128xf32>
    %8 = vector.extract_strided_slice %7 {offsets = [0, 0], sizes = [221, 128], strides = [1, 1]} : vector<224x128xf32> to vector<221x128xf32>
    %9 = vector.extract_strided_slice %7 {offsets = [1, 0], sizes = [221, 128], strides = [1, 1]} : vector<224x128xf32> to vector<221x128xf32>
    %10 = arith.maximumf %8, %9 : vector<221x128xf32>
    %11 = vector.extract_strided_slice %7 {offsets = [2, 0], sizes = [221, 128], strides = [1, 1]} : vector<224x128xf32> to vector<221x128xf32>
    %12 = arith.maximumf %10, %11 : vector<221x128xf32>
    %13 = vector.extract_strided_slice %7 {offsets = [3, 0], sizes = [221, 128], strides = [1, 1]} : vector<224x128xf32> to vector<221x128xf32>
    %14 = arith.maximumf %12, %13 : vector<221x128xf32>
    %c0_6 = arith.constant 0 : index
    %c0_7 = arith.constant 0 : index
    %15 = vector.load %arg3[%c0_6, %c0_7] : memref<56x221xf32, #tpu.memory_space<vmem>>, vector<56x221xf32>
    %cst_8 = arith.constant dense<0.000000e+00> : vector<56x128xf32>
    %16 = tpu.matmul %15, %14, %cst_8 {dimension_numbers = #tpu.dot_dimension_numbers<[1], [0], [0], [1], [0, 0, 1, 1], [], []>} : vector<56x221xf32>, vector<221x128xf32>, vector<56x128xf32> -> vector<56x128xf32>
    %17 = vector.extract_strided_slice %16 {offsets = [0, 0], sizes = [32, 128], strides = [1, 1]} : vector<56x128xf32> to vector<32x128xf32>
    %c0_9 = arith.constant 0 : index
    %c0_10 = arith.constant 0 : index
    %c0_11 = arith.constant 0 : index
    %18 = vector.load %arg6[%c0_9, %c0_10, %c0_11] : memref<4x128x64xf32, #tpu.memory_space<vmem>>, vector<1x128x64xf32>
    %19 = vector.shape_cast %18 : vector<1x128x64xf32> to vector<128x64xf32>
    %cst_12 = arith.constant dense<0.000000e+00> : vector<32x64xf32>
    %20 = tpu.matmul %17, %19, %cst_12 {dimension_numbers = #tpu.dot_dimension_numbers<[1], [0], [0], [1], [0, 0, 1, 1], [], []>} : vector<32x128xf32>, vector<128x64xf32>, vector<32x64xf32> -> vector<32x64xf32>
    %c0_13 = arith.constant 0 : index
    %c0_14 = arith.constant 0 : index
    %21 = vector.load %arg7[%c0_13, %c0_14] : memref<1x64xf32, #tpu.memory_space<vmem>>, vector<1x64xf32>
    %22 = vector.broadcast %21 : vector<1x64xf32> to vector<32x64xf32>
    %23 = arith.addf %20, %22 : vector<32x64xf32>
    %24 = vector.extract_strided_slice %16 {offsets = [8, 0], sizes = [32, 128], strides = [1, 1]} : vector<56x128xf32> to vector<32x128xf32>
    %c1 = arith.constant 1 : index
    %c0_15 = arith.constant 0 : index
    %c0_16 = arith.constant 0 : index
    %25 = vector.load %arg6[%c1, %c0_15, %c0_16] : memref<4x128x64xf32, #tpu.memory_space<vmem>>, vector<1x128x64xf32>
    %26 = vector.shape_cast %25 : vector<1x128x64xf32> to vector<128x64xf32>
    %cst_17 = arith.constant dense<0.000000e+00> : vector<32x64xf32>
    %27 = tpu.matmul %24, %26, %cst_17 {dimension_numbers = #tpu.dot_dimension_numbers<[1], [0], [0], [1], [0, 0, 1, 1], [], []>} : vector<32x128xf32>, vector<128x64xf32>, vector<32x64xf32> -> vector<32x64xf32>
    %28 = arith.addf %23, %27 : vector<32x64xf32>
    %29 = vector.extract_strided_slice %16 {offsets = [16, 0], sizes = [32, 128], strides = [1, 1]} : vector<56x128xf32> to vector<32x128xf32>
    %c2 = arith.constant 2 : index
    %c0_18 = arith.constant 0 : index
    %c0_19 = arith.constant 0 : index
    %30 = vector.load %arg6[%c2, %c0_18, %c0_19] : memref<4x128x64xf32, #tpu.memory_space<vmem>>, vector<1x128x64xf32>
    %31 = vector.shape_cast %30 : vector<1x128x64xf32> to vector<128x64xf32>
    %cst_20 = arith.constant dense<0.000000e+00> : vector<32x64xf32>
    %32 = tpu.matmul %29, %31, %cst_20 {dimension_numbers = #tpu.dot_dimension_numbers<[1], [0], [0], [1], [0, 0, 1, 1], [], []>} : vector<32x128xf32>, vector<128x64xf32>, vector<32x64xf32> -> vector<32x64xf32>
    %33 = arith.addf %28, %32 : vector<32x64xf32>
    %34 = vector.extract_strided_slice %16 {offsets = [24, 0], sizes = [32, 128], strides = [1, 1]} : vector<56x128xf32> to vector<32x128xf32>
    %c3 = arith.constant 3 : index
    %c0_21 = arith.constant 0 : index
    %c0_22 = arith.constant 0 : index
    %35 = vector.load %arg6[%c3, %c0_21, %c0_22] : memref<4x128x64xf32, #tpu.memory_space<vmem>>, vector<1x128x64xf32>
    %36 = vector.shape_cast %35 : vector<1x128x64xf32> to vector<128x64xf32>
    %cst_23 = arith.constant dense<0.000000e+00> : vector<32x64xf32>
    %37 = tpu.matmul %34, %36, %cst_23 {dimension_numbers = #tpu.dot_dimension_numbers<[1], [0], [0], [1], [0, 0, 1, 1], [], []>} : vector<32x128xf32>, vector<128x64xf32>, vector<32x64xf32> -> vector<32x64xf32>
    %38 = arith.addf %33, %37 : vector<32x64xf32>
    %cst_24 = arith.constant 0.000000e+00 : f32
    %39 = vector.broadcast %cst_24 : f32 to vector<32x64xf32>
    %40 = arith.maximumf %38, %39 : vector<32x64xf32>
    %41 = vector.extract_strided_slice %40 {offsets = [0, 0], sizes = [8, 64], strides = [1, 1]} : vector<32x64xf32> to vector<8x64xf32>
    %42 = vector.extract_strided_slice %40 {offsets = [8, 0], sizes = [8, 64], strides = [1, 1]} : vector<32x64xf32> to vector<8x64xf32>
    %43 = arith.maximumf %41, %42 : vector<8x64xf32>
    %44 = vector.extract_strided_slice %40 {offsets = [16, 0], sizes = [8, 64], strides = [1, 1]} : vector<32x64xf32> to vector<8x64xf32>
    %45 = arith.maximumf %43, %44 : vector<8x64xf32>
    %46 = vector.extract_strided_slice %40 {offsets = [24, 0], sizes = [8, 64], strides = [1, 1]} : vector<32x64xf32> to vector<8x64xf32>
    %47 = arith.maximumf %45, %46 : vector<8x64xf32>
    %c0_25 = arith.constant 0 : index
    %c0_26 = arith.constant 0 : index
    %48 = vector.load %arg2[%c0_25, %c0_26] : memref<8x13xf32, #tpu.memory_space<vmem>>, vector<8x13xf32>
    %c0_27 = arith.constant 0 : index
    %c0_28 = arith.constant 0 : index
    %49 = vector.load %arg8[%c0_27, %c0_28] : memref<13x128xf32, #tpu.memory_space<vmem>>, vector<13x128xf32>
    %cst_29 = arith.constant dense<0.000000e+00> : vector<8x128xf32>
    %50 = tpu.matmul %48, %49, %cst_29 {dimension_numbers = #tpu.dot_dimension_numbers<[1], [0], [0], [1], [0, 0, 1, 1], [], []>} : vector<8x13xf32>, vector<13x128xf32>, vector<8x128xf32> -> vector<8x128xf32>
    %c0_30 = arith.constant 0 : index
    %c0_31 = arith.constant 0 : index
    %51 = vector.load %arg9[%c0_30, %c0_31] : memref<1x128xf32, #tpu.memory_space<vmem>>, vector<1x128xf32>
    %52 = vector.broadcast %51 : vector<1x128xf32> to vector<8x128xf32>
    %53 = arith.addf %50, %52 : vector<8x128xf32>
    %cst_32 = arith.constant 0.000000e+00 : f32
    %54 = vector.broadcast %cst_32 : f32 to vector<8x128xf32>
    %55 = arith.maximumf %53, %54 : vector<8x128xf32>
    %c0_33 = arith.constant 0 : index
    %c0_34 = arith.constant 0 : index
    %56 = vector.load %arg10[%c0_33, %c0_34] : memref<64x128xf32, #tpu.memory_space<vmem>>, vector<64x128xf32>
    %cst_35 = arith.constant dense<0.000000e+00> : vector<8x128xf32>
    %57 = tpu.matmul %47, %56, %cst_35 {dimension_numbers = #tpu.dot_dimension_numbers<[1], [0], [0], [1], [0, 0, 1, 1], [], []>} : vector<8x64xf32>, vector<64x128xf32>, vector<8x128xf32> -> vector<8x128xf32>
    %c0_36 = arith.constant 0 : index
    %c0_37 = arith.constant 0 : index
    %58 = vector.load %arg11[%c0_36, %c0_37] : memref<128x128xf32, #tpu.memory_space<vmem>>, vector<128x128xf32>
    %cst_38 = arith.constant dense<0.000000e+00> : vector<8x128xf32>
    %59 = tpu.matmul %55, %58, %cst_38 {dimension_numbers = #tpu.dot_dimension_numbers<[1], [0], [0], [1], [0, 0, 1, 1], [], []>} : vector<8x128xf32>, vector<128x128xf32>, vector<8x128xf32> -> vector<8x128xf32>
    %60 = arith.addf %57, %59 : vector<8x128xf32>
    %c0_39 = arith.constant 0 : index
    %c0_40 = arith.constant 0 : index
    %61 = vector.load %arg12[%c0_39, %c0_40] : memref<1x128xf32, #tpu.memory_space<vmem>>, vector<1x128xf32>
    %62 = vector.broadcast %61 : vector<1x128xf32> to vector<8x128xf32>
    %63 = arith.addf %60, %62 : vector<8x128xf32>
    %cst_41 = arith.constant 0.000000e+00 : f32
    %64 = vector.broadcast %cst_41 : f32 to vector<8x128xf32>
    %65 = arith.maximumf %63, %64 : vector<8x128xf32>
    %c0_42 = arith.constant 0 : index
    %c0_43 = arith.constant 0 : index
    %66 = vector.load %arg13[%c0_42, %c0_43] : memref<128x64xf32, #tpu.memory_space<vmem>>, vector<128x64xf32>
    %cst_44 = arith.constant dense<0.000000e+00> : vector<8x64xf32>
    %67 = tpu.matmul %65, %66, %cst_44 {dimension_numbers = #tpu.dot_dimension_numbers<[1], [0], [0], [1], [0, 0, 1, 1], [], []>} : vector<8x128xf32>, vector<128x64xf32>, vector<8x64xf32> -> vector<8x64xf32>
    %c0_45 = arith.constant 0 : index
    %c0_46 = arith.constant 0 : index
    %68 = vector.load %arg14[%c0_45, %c0_46] : memref<1x64xf32, #tpu.memory_space<vmem>>, vector<1x64xf32>
    %69 = vector.broadcast %68 : vector<1x64xf32> to vector<8x64xf32>
    %70 = arith.addf %67, %69 : vector<8x64xf32>
    %cst_47 = arith.constant 0.000000e+00 : f32
    %71 = vector.broadcast %cst_47 : f32 to vector<8x64xf32>
    %72 = arith.maximumf %70, %71 : vector<8x64xf32>
    %c0_48 = arith.constant 0 : index
    %c0_49 = arith.constant 0 : index
    %73 = vector.load %arg15[%c0_48, %c0_49] : memref<64x32xf32, #tpu.memory_space<vmem>>, vector<64x32xf32>
    %cst_50 = arith.constant dense<0.000000e+00> : vector<8x32xf32>
    %74 = tpu.matmul %72, %73, %cst_50 {dimension_numbers = #tpu.dot_dimension_numbers<[1], [0], [0], [1], [0, 0, 1, 1], [], []>} : vector<8x64xf32>, vector<64x32xf32>, vector<8x32xf32> -> vector<8x32xf32>
    %c0_51 = arith.constant 0 : index
    %c0_52 = arith.constant 0 : index
    %75 = vector.load %arg16[%c0_51, %c0_52] : memref<1x32xf32, #tpu.memory_space<vmem>>, vector<1x32xf32>
    %76 = vector.broadcast %75 : vector<1x32xf32> to vector<8x32xf32>
    %77 = arith.addf %74, %76 : vector<8x32xf32>
    %cst_53 = arith.constant 0.000000e+00 : f32
    %78 = vector.broadcast %cst_53 : f32 to vector<8x32xf32>
    %79 = arith.maximumf %77, %78 : vector<8x32xf32>
    %c0_54 = arith.constant 0 : index
    %c0_55 = arith.constant 0 : index
    %80 = vector.load %arg17[%c0_54, %c0_55] : memref<32x16xf32, #tpu.memory_space<vmem>>, vector<32x16xf32>
    %cst_56 = arith.constant dense<0.000000e+00> : vector<8x16xf32>
    %81 = tpu.matmul %79, %80, %cst_56 {dimension_numbers = #tpu.dot_dimension_numbers<[1], [0], [0], [1], [0, 0, 1, 1], [], []>} : vector<8x32xf32>, vector<32x16xf32>, vector<8x16xf32> -> vector<8x16xf32>
    %c0_57 = arith.constant 0 : index
    %c0_58 = arith.constant 0 : index
    %82 = vector.load %arg18[%c0_57, %c0_58] : memref<1x16xf32, #tpu.memory_space<vmem>>, vector<1x16xf32>
    %83 = vector.broadcast %82 : vector<1x16xf32> to vector<8x16xf32>
    %84 = arith.addf %81, %83 : vector<8x16xf32>
    %cst_59 = arith.constant 0.000000e+00 : f32
    %85 = vector.broadcast %cst_59 : f32 to vector<8x16xf32>
    %86 = arith.maximumf %84, %85 : vector<8x16xf32>
    %c0_60 = arith.constant 0 : index
    %c0_61 = arith.constant 0 : index
    %87 = vector.load %arg19[%c0_60, %c0_61] : memref<16x2xf32, #tpu.memory_space<vmem>>, vector<16x2xf32>
    %cst_62 = arith.constant dense<0.000000e+00> : vector<8x2xf32>
    %88 = tpu.matmul %86, %87, %cst_62 {dimension_numbers = #tpu.dot_dimension_numbers<[1], [0], [0], [1], [0, 0, 1, 1], [], []>} : vector<8x16xf32>, vector<16x2xf32>, vector<8x2xf32> -> vector<8x2xf32>
    %c0_63 = arith.constant 0 : index
    %c0_64 = arith.constant 0 : index
    %89 = vector.load %arg20[%c0_63, %c0_64] : memref<1x2xf32, #tpu.memory_space<vmem>>, vector<1x2xf32>
    %90 = vector.broadcast %89 : vector<1x2xf32> to vector<8x2xf32>
    %91 = arith.addf %88, %90 : vector<8x2xf32>
    %c0_65 = arith.constant 0 : index
    %c0_66 = arith.constant 0 : index
    %92 = vector.load %arg21[%c0_65, %c0_66] : memref<8x2xf32, #tpu.memory_space<vmem>>, vector<8x2xf32>
    tpu.vector_store %arg21[%c0_65, %c0_66], %91 {strides = array<i32>} : memref<8x2xf32, #tpu.memory_space<vmem>>, vector<8x2xf32>,
    return
  }
  func.func @transform_0(%arg0: i32) -> (i32, i32) {
    %c0_i32 = arith.constant 0 : i32
    %c0_i32_0 = arith.constant 0 : i32
    return %arg0, %c0_i32 : i32, i32
  }
  func.func @transform_1(%arg0: i32) -> (i32, i32) {
    %c0_i32 = arith.constant 0 : i32
    %c0_i32_0 = arith.constant 0 : i32
    return %arg0, %c0_i32 : i32, i32
  }
  func.func @transform_2(%arg0: i32) -> (i32, i32) {
    %c0_i32 = arith.constant 0 : i32
    %c0_i32_0 = arith.constant 0 : i32
    %c0_i32_1 = arith.constant 0 : i32
    return %c0_i32, %c0_i32_0 : i32, i32
  }
  func.func @transform_3(%arg0: i32) -> (i32, i32) {
    %c0_i32 = arith.constant 0 : i32
    %c0_i32_0 = arith.constant 0 : i32
    %c0_i32_1 = arith.constant 0 : i32
    return %c0_i32, %c0_i32_0 : i32, i32
  }
  func.func @transform_4(%arg0: i32) -> (i32, i32) {
    %c0_i32 = arith.constant 0 : i32
    %c0_i32_0 = arith.constant 0 : i32
    %c0_i32_1 = arith.constant 0 : i32
    return %c0_i32, %c0_i32_0 : i32, i32
  }
  func.func @transform_5(%arg0: i32) -> (i32, i32, i32) {
    %c0_i32 = arith.constant 0 : i32
    %c0_i32_0 = arith.constant 0 : i32
    %c0_i32_1 = arith.constant 0 : i32
    %c0_i32_2 = arith.constant 0 : i32
    return %c0_i32, %c0_i32_0, %c0_i32_1 : i32, i32, i32
  }
  func.func @transform_6(%arg0: i32) -> (i32, i32) {
    %c0_i32 = arith.constant 0 : i32
    %c0_i32_0 = arith.constant 0 : i32
    %c0_i32_1 = arith.constant 0 : i32
    return %c0_i32, %c0_i32_0 : i32, i32
  }
  func.func @transform_7(%arg0: i32) -> (i32, i32) {
    %c0_i32 = arith.constant 0 : i32
    %c0_i32_0 = arith.constant 0 : i32
    %c0_i32_1 = arith.constant 0 : i32
    return %c0_i32, %c0_i32_0 : i32, i32
  }
  func.func @transform_8(%arg0: i32) -> (i32, i32) {
    %c0_i32 = arith.constant 0 : i32
    %c0_i32_0 = arith.constant 0 : i32
    %c0_i32_1 = arith.constant 0 : i32
    return %c0_i32, %c0_i32_0 : i32, i32
  }
  func.func @transform_9(%arg0: i32) -> (i32, i32) {
    %c0_i32 = arith.constant 0 : i32
    %c0_i32_0 = arith.constant 0 : i32
    %c0_i32_1 = arith.constant 0 : i32
    return %c0_i32, %c0_i32_0 : i32, i32
  }
  func.func @transform_10(%arg0: i32) -> (i32, i32) {
    %c0_i32 = arith.constant 0 : i32
    %c0_i32_0 = arith.constant 0 : i32
    %c0_i32_1 = arith.constant 0 : i32
    return %c0_i32, %c0_i32_0 : i32, i32
  }
  func.func @transform_11(%arg0: i32) -> (i32, i32) {
    %c0_i32 = arith.constant 0 : i32
    %c0_i32_0 = arith.constant 0 : i32
    %c0_i32_1 = arith.constant 0 : i32
    return %c0_i32, %c0_i32_0 : i32, i32
  }
  func.func @transform_12(%arg0: i32) -> (i32, i32) {
    %c0_i32 = arith.constant 0 : i32
    %c0_i32_0 = arith.constant 0 : i32
    %c0_i32_1 = arith.constant 0 : i32
    return %c0_i32, %c0_i32_0 : i32, i32
  }
  func.func @transform_13(%arg0: i32) -> (i32, i32) {
    %c0_i32 = arith.constant 0 : i32
    %c0_i32_0 = arith.constant 0 : i32
    %c0_i32_1 = arith.constant 0 : i32
    return %c0_i32, %c0_i32_0 : i32, i32
  }
  func.func @transform_14(%arg0: i32) -> (i32, i32) {
    %c0_i32 = arith.constant 0 : i32
    %c0_i32_0 = arith.constant 0 : i32
    %c0_i32_1 = arith.constant 0 : i32
    return %c0_i32, %c0_i32_0 : i32, i32
  }
  func.func @transform_15(%arg0: i32) -> (i32, i32) {
    %c0_i32 = arith.constant 0 : i32
    %c0_i32_0 = arith.constant 0 : i32
    %c0_i32_1 = arith.constant 0 : i32
    return %c0_i32, %c0_i32_0 : i32, i32
  }
  func.func @transform_16(%arg0: i32) -> (i32, i32) {
    %c0_i32 = arith.constant 0 : i32
    %c0_i32_0 = arith.constant 0 : i32
    %c0_i32_1 = arith.constant 0 : i32
    return %c0_i32, %c0_i32_0 : i32, i32
  }
  func.func @transform_17(%arg0: i32) -> (i32, i32) {
    %c0_i32 = arith.constant 0 : i32
    %c0_i32_0 = arith.constant 0 : i32
    %c0_i32_1 = arith.constant 0 : i32
    return %c0_i32, %c0_i32_0 : i32, i32
  }
  func.func @transform_18(%arg0: i32) -> (i32, i32) {
    %c0_i32 = arith.constant 0 : i32
    %c0_i32_0 = arith.constant 0 : i32
    %c0_i32_1 = arith.constant 0 : i32
    return %c0_i32, %c0_i32_0 : i32, i32
  }
  func.func @transform_19(%arg0: i32) -> (i32, i32) {
    %c0_i32 = arith.constant 0 : i32
    %c0_i32_0 = arith.constant 0 : i32
    %c0_i32_1 = arith.constant 0 : i32
    return %c0_i32, %c0_i32_0 : i32, i32
  }
  func.func @transform_20(%arg0: i32) -> (i32, i32) {
    %c0_i32 = arith.constant 0 : i32
    %c0_i32_0 = arith.constant 0 : i32
    return %arg0, %c0_i32 : i32, i32
  }
}

</mosaic_0001>

<bundles_post_ra>
// kernel: tpu_custom_call.1
= control target key start
LH: loop header
LB: loop body
LE: loop exit
PB: predicated region body
PF: predicated region fallthrough
CT: control target
= control target key end

     0   :  { %s7331_s0 = inlined_call_operand.hbm [shape: f32[224,2400], index: 0, kind: input, shape index: {}]   ;;  %s7332_s1 = inlined_call_operand.hbm [shape: f32[8,13], index: 1, kind: input, shape index: {}]   ;;  %s7333_s2 = inlined_call_operand.hbm [shape: f32[56,221], index: 2, kind: input, shape index: {}]   ;;  %s7334_s3 = inlined_call_operand.hbm [shape: f32[2400,128], index: 3, kind: input, shape index: {}]   ;;  %s7335_s4 = inlined_call_operand.hbm [shape: f32[1,128], index: 4, kind: input, shape index: {}]   ;;  %s7336_s5 = inlined_call_operand.vmem [shape: f32[4,128,64], index: 5, kind: input, shape index: {}]   ;;  %s7337_s6 = inlined_call_operand.hbm [shape: f32[1,64], index: 6, kind: input, shape index: {}]   ;;  %s7338_s7 = inlined_call_operand.hbm [shape: f32[13,128], index: 7, kind: input, shape index: {}]   ;;  %s7339_s8 = inlined_call_operand.hbm [shape: f32[1,128], index: 8, kind: input, shape index: {}]   ;;  %s7340_s9 = inlined_call_operand.hbm [shape: f32[64,128], index: 9, kind: input, shape index: {}]   ;;  %s7341_s10 = inlined_call_operand.hbm [shape: f32[128,128], index: 10, kind: input, shape index: {}]   ;;  %s7342_s11 = inlined_call_operand.hbm [shape: f32[1,128], index: 11, kind: input, shape index: {}]   ;;  %s7343_s12 = inlined_call_operand.vmem [shape: f32[128,64], index: 12, kind: input, shape index: {}]   ;;  %s7344_s13 = inlined_call_operand.hbm [shape: f32[1,64], index: 13, kind: input, shape index: {}]   ;;  %s7345_s14 = inlined_call_operand.vmem [shape: f32[64,32], index: 14, kind: input, shape index: {}]   ;;  %s7346_s15 = inlined_call_operand.hbm [shape: f32[1,32], index: 15, kind: input, shape index: {}]   ;;  %s7347_s16 = inlined_call_operand.vmem [shape: f32[32,16], index: 16, kind: input, shape index: {}]   ;;  %s7348_s17 = inlined_call_operand.hbm [shape: f32[1,16], index: 17, kind: input, shape index: {}]   ;;  %s7349_s18 = inlined_call_operand.vmem [shape: f32[16,2], index: 18, kind: input, shape index: {}]   ;;  %s7350_s19 = inlined_call_operand.hbm [shape: f32[1,2], index: 19, kind: input, shape index: {}]   ;;  %s7351_s20 = inlined_call_operand.vmem [shape: f32[8,2], index: 20, kind: output, shape index: {}]  }
   0x1   :  { %7357 = sst [smem:[#allocation37_spill]] %s7331_s0 }
   0x2   :  { %7358 = sst [smem:[#allocation38_spill]] %s7332_s1 }
   0x3   :  { %7359 = sst [smem:[#allocation39_spill]] %s7333_s2 }
   0x4   :  { %7360 = sst [smem:[#allocation40_spill]] %s7334_s3 }
   0x5   :  { %7361 = sst [smem:[#allocation41_spill]] %s7335_s4 }
   0x6   :  { %25 = vsyncpa [#allocation3], 0 }
   0x7   :  { %26 = vsyncpa [#allocation5], 0 }
   0x8   :  { %27 = vsyncpa [#allocation8], 0 }
   0x9   :  { %28 = vsyncpa [#allocation11], 0 }
   0xa   :  { %29 = vsyncpa [#allocation14], 0 }
   0xb   :  { %30 = vsyncpa [#allocation17], 0 }
   0xc   :  { %31 = vsyncpa [#allocation20], 0 }
   0xd   :  { %32 = vsyncpa [#allocation23], 0  ;;  %s5791_s1 = smov [#allocation4]   ;;  %s5792_s23 = smov [#allocation7]  }
   0xe   :  { %s51_s22 = sshll.u32 %s5791_s1, 4  ;;  %s72_s24 = sshll.u32 %s5792_s23, 4  ;;  %s52_s22 = int_to_ptr.vmem [resolvable:$true] %s51_s22  ;;  %s73_s24 = int_to_ptr.vmem [resolvable:$true] %s72_s24 }
   0xf   :  { %s5483_s2 = scalar_lea.vmem %s52_s22, 128  ;;  %p5488_p1 = scmp.lt.s32.totalorder %s52_s22, %s52_s22 }
  0x10   :  { %p5484_p0 = scmp.ne.s32.totalorder %s52_s22, %s5483_s2  ;;  %p5489_p2 = scmp.lt.s32.totalorder %s5483_s2, %s5483_s2 }
  0x12   :  { %p5490_p3 = por %p5489_p2, %p5488_p1 }
  0x14   :  { %p5491_p4 = pnand %p5490_p3, %p5484_p0 }
  0x16   :  { %5494 = shalt.err (!%p5491_p4)
}
  0x17   :  { %s7362_s26 = sld [smem:[#allocation38_spill]]  ;;  %s5503_s27 = scalar_lea.vmem %s73_s24, 38400 }
  0x18   :  { %p5504_p5 = scmp.ne.s32.totalorder %s73_s24, %s5503_s27  ;;  %p5508_p6 = scmp.lt.s32.totalorder %s73_s24, %s73_s24 }
  0x19   :  { %p5509_p7 = scmp.lt.s32.totalorder %s5503_s27, %s5503_s27 }
  0x1b   :  { %p5510_p8 = por %p5509_p7, %p5508_p6 }
  0x1d   :  { %54 = dma.hbm_to_vmem [thread:$0]  %s7362_s26, 128, %s52_s22, [#allocation5]  }
  0x1e   :  { %p5511_p9 = pnand %p5510_p8, %p5504_p5 }
  0x20   :  { %5514 = shalt.err (!%p5511_p9)
}
  0x21   :  { %s5793_s28 = smov 128   ;;  %s5794_s4 = smov 8  }
  0x22   :  { %s7363_s0 = sld [smem:[#allocation40_spill]]  ;;  %s5795_s21 = smov [#allocation10]  }
  0x23   :  { %s97_s1 = sshll.u32 %s5795_s21, 4  ;;  %s5796_s23 = smov [#allocation13]   ;;  %s98_s1 = int_to_ptr.vmem [resolvable:$true] %s97_s1 }
  0x24   :  { %s119_s22 = sshll.u32 %s5796_s23, 4  ;;  %s5523_s2 = scalar_lea.vmem %s98_s1, 16  ;;  %s120_s22 = int_to_ptr.vmem [resolvable:$true] %s119_s22 }
  0x25   :  { %p5524_p10 = scmp.ne.s32.totalorder %s98_s1, %s5523_s2  ;;  %s5527_s25 = scalar_lea.vmem %s98_s1, 32 }
  0x26   :  { %p5528_p11 = scmp.lt.s32.totalorder %s98_s1, %s98_s1  ;;  %p5529_p12 = scmp.lt.s32.totalorder %s5527_s25, %s5523_s2 }
  0x28   :  { %78 = dma.hbm_to_vmem [thread:$0]  %s7363_s0, 38400, %s73_s24, [#allocation8], %s5793_s28, %s5793_s28, %s5794_s4  }
  0x29   :  { %p5530_p13 = por %p5529_p12, %p5528_p11 }
  0x2b   :  { %p5531_p0 = pnand %p5530_p13, %p5524_p10 }
  0x2d   :  { %5534 = shalt.err (!%p5531_p0)
}
  0x2e   :  { %100 = dma.hbm_to_vmem [thread:$0]  %s7337_s6, 16, %s98_s1, [#allocation11]  }
  0x2f   :  { %s5543_s27 = scalar_lea.vmem %s120_s22, 16  ;;  %s5547_s24 = scalar_lea.vmem %s120_s22, 32 }
  0x30   :  { %p5544_p1 = scmp.ne.s32.totalorder %s120_s22, %s5543_s27  ;;  %p5548_p2 = scmp.lt.s32.totalorder %s120_s22, %s120_s22 }
  0x31   :  { %p5549_p3 = scmp.lt.s32.totalorder %s5547_s24, %s5543_s27 }
  0x33   :  { %p5550_p4 = por %p5549_p3, %p5548_p2 }
  0x35   :  { %p5551_p5 = pnand %p5550_p4, %p5544_p1 }
  0x37   :  { %5554 = shalt.err (!%p5551_p5)
}
  0x38   :  { %122 = dma.hbm_to_vmem [thread:$0]  %s7339_s8, 16, %s120_s22, [#allocation14]  }
  0x39   :  { %s5797_s0 = smov [#allocation16]   ;;  %s5798_s23 = smov [#allocation19]  }
  0x3a   :  { %s140_s21 = sshll.u32 %s5797_s0, 4  ;;  %s165_s2 = sshll.u32 %s5798_s23, 4  ;;  %s141_s21 = int_to_ptr.vmem [resolvable:$true] %s140_s21  ;;  %s166_s2 = int_to_ptr.vmem [resolvable:$true] %s165_s2 }
  0x3b   :  { %s5563_s25 = scalar_lea.vmem %s141_s21, 2048  ;;  %p5568_p7 = scmp.lt.s32.totalorder %s141_s21, %s141_s21 }
  0x3c   :  { %p5564_p6 = scmp.ne.s32.totalorder %s141_s21, %s5563_s25  ;;  %p5569_p8 = scmp.lt.s32.totalorder %s5563_s25, %s5563_s25 }
  0x3e   :  { %p5570_p9 = por %p5569_p8, %p5568_p7 }
  0x40   :  { %p5571_p10 = pnand %p5570_p9, %p5564_p6 }
  0x42   :  { %5574 = shalt.err (!%p5571_p10)
}
  0x43   :  { %146 = dma.hbm_to_vmem [thread:$0]  %s7341_s10, 2048, %s141_s21, [#allocation17], %s5793_s28, %s5793_s28, %s5794_s4  }
  0x44   :  { %s5583_s8 = scalar_lea.vmem %s166_s2, 16  ;;  %s5587_s22 = scalar_lea.vmem %s166_s2, 32 }
  0x45   :  { %p5584_p11 = scmp.ne.s32.totalorder %s166_s2, %s5583_s8  ;;  %p5588_p12 = scmp.lt.s32.totalorder %s166_s2, %s166_s2 }
  0x46   :  { %p5589_p13 = scmp.lt.s32.totalorder %s5587_s22, %s5583_s8 }
  0x48   :  { %p5590_p0 = por %p5589_p13, %p5588_p12 }
  0x4a   :  { %p5591_p1 = pnand %p5590_p0, %p5584_p11 }
  0x4c   :  { %5594 = shalt.err (!%p5591_p1)
}
  0x4d   :  { %168 = dma.hbm_to_vmem [thread:$0]  %s7344_s13, 16, %s166_s2, [#allocation20]  }
  0x4e   :  { %s5799_s27 = smov [#allocation22]   ;;  %s5800_s29 = smov [#allocation2]  }
  0x4f   :  { %s189_s24 = sshll.u32 %s5799_s27, 4  ;;  %s38_s30 = sshll.u32 %s5800_s29, 4  ;;  %s190_s24 = int_to_ptr.vmem [resolvable:$true] %s189_s24  ;;  %s39_s30 = int_to_ptr.vmem [resolvable:$true] %s38_s30 }
  0x50   :  { %s5603_s0 = scalar_lea.vmem %s190_s24, 16  ;;  %s5607_s10 = scalar_lea.vmem %s190_s24, 32 }
  0x51   :  { %p5604_p2 = scmp.ne.s32.totalorder %s190_s24, %s5603_s0  ;;  %p5608_p3 = scmp.lt.s32.totalorder %s190_s24, %s190_s24 }
  0x52   :  { %p5609_p4 = scmp.lt.s32.totalorder %s5607_s10, %s5603_s0 }
  0x54   :  { %p5610_p5 = por %p5609_p4, %p5608_p3 }
  0x56   :  { %p5611_p6 = pnand %p5610_p5, %p5604_p2 }
  0x58   :  { %5614 = shalt.err (!%p5611_p6)
}
  0x59   :  { %192 = dma.hbm_to_vmem [thread:$0]  %s7348_s17, 16, %s190_s24, [#allocation23]  }
  0x5a   :  { %s5623_s25 = scalar_lea.vmem %s39_s30, 68096  ;;  %p5628_p8 = scmp.lt.s32.totalorder %s39_s30, %s39_s30 }
  0x5b   :  { %p5624_p7 = scmp.ne.s32.totalorder %s39_s30, %s5623_s25  ;;  %p5629_p9 = scmp.lt.s32.totalorder %s5623_s25, %s5623_s25 }
  0x5d   :  { %p5630_p10 = por %p5629_p9, %p5628_p8 }
  0x5f   :  { %p5631_p11 = pnand %p5630_p10, %p5624_p7 }
  0x61   :  { %5634 = shalt.err (!%p5631_p11)
}
  0x62   :  { %s5801_s13 = smov 2432   ;;  %s5802_s2 = smov 152  }
  0x63   :  { %s7364_s8 = sld [smem:[#allocation37_spill]]  ;;  %s5803_s22 = smov [#allocation6]  }
  0x64   :  { %s60_s3 = sshll.u32 %s5803_s22, 4  ;;  %s61_s3 = int_to_ptr.vmem [resolvable:$true] %s60_s3 }
  0x65   :  { %s5643_s26 = scalar_lea.vmem %s61_s3, 1792  ;;  %p5648_p13 = scmp.lt.s32.totalorder %s61_s3, %s61_s3 }
  0x66   :  { %p5644_p12 = scmp.ne.s32.totalorder %s61_s3, %s5643_s26  ;;  %p5649_p0 = scmp.lt.s32.totalorder %s5643_s26, %s5643_s26 }
  0x68   :  { %p5650_p1 = por %p5649_p0, %p5648_p13 }
  0x69   :  { %44 = dma.hbm_to_vmem [thread:$0]  %s7364_s8, 68096, %s39_s30, [#allocation3], %s5801_s13, %s5801_s13, %s5802_s2  }
  0x6a   :  { %p5651_p2 = pnand %p5650_p1, %p5644_p12 }
  0x6c   :  { %5654 = shalt.err (!%p5651_p2)
}
  0x6d   :  { %s5804_s17 = smov 256   ;;  %s5805_s27 = smov 16  }
  0x6e   :  { %s7365_s0 = sld [smem:[#allocation39_spill]]  ;;  %s5806_s10 = smov [#allocation9]  }
  0x6f   :  { %s85_s21 = sshll.u32 %s5806_s10, 4  ;;  %s5807_s30 = smov [#allocation12]   ;;  %s86_s21 = int_to_ptr.vmem [resolvable:$true] %s85_s21 }
  0x70   :  { %s106_s23 = sshll.u32 %s5807_s30, 4  ;;  %s5663_s25 = scalar_lea.vmem %s86_s21, 16  ;;  %s107_s23 = int_to_ptr.vmem [resolvable:$true] %s106_s23 }
  0x71   :  { %p5664_p3 = scmp.ne.s32.totalorder %s86_s21, %s5663_s25  ;;  %s5667_s13 = scalar_lea.vmem %s86_s21, 32 }
  0x72   :  { %p5668_p4 = scmp.lt.s32.totalorder %s86_s21, %s86_s21  ;;  %p5669_p5 = scmp.lt.s32.totalorder %s5667_s13, %s5663_s25 }
  0x74   :  { %66 = dma.hbm_to_vmem [thread:$0]  %s7365_s0, 1792, %s61_s3, [#allocation5], %s5804_s17, %s5804_s17, %s5805_s27  }
  0x75   :  { %p5670_p6 = por %p5669_p5, %p5668_p4 }
  0x77   :  { %p5671_p7 = pnand %p5670_p6, %p5664_p3 }
  0x79   :  { %5674 = shalt.err (!%p5671_p7)
}
  0x7a   :  { %s7366_s1 = sld [smem:[#allocation41_spill]]  ;;  %s5683_s8 = scalar_lea.vmem %s107_s23, 256 }
  0x7b   :  { %p5684_p8 = scmp.ne.s32.totalorder %s107_s23, %s5683_s8  ;;  %p5688_p9 = scmp.lt.s32.totalorder %s107_s23, %s107_s23 }
  0x7c   :  { %p5689_p10 = scmp.lt.s32.totalorder %s5683_s8, %s5683_s8 }
  0x7e   :  { %p5690_p11 = por %p5689_p10, %p5688_p9 }
  0x80   :  { %88 = dma.hbm_to_vmem [thread:$0]  %s7366_s1, 16, %s86_s21, [#allocation8]  }
  0x81   :  { %p5691_p12 = pnand %p5690_p11, %p5684_p8 }
  0x83   :  { %5694 = shalt.err (!%p5691_p12)
}
  0x84   :  { %112 = dma.hbm_to_vmem [thread:$0]  %s7338_s7, 256, %s107_s23, [#allocation11], %s5793_s28, %s5793_s28, %s5794_s4  }
  0x85   :  { %s5808_s26 = smov [#allocation15]   ;;  %s5809_s27 = smov [#allocation18]  }
  0x86   :  { %s128_s17 = sshll.u32 %s5808_s26, 4  ;;  %s153_s24 = sshll.u32 %s5809_s27, 4  ;;  %s129_s17 = int_to_ptr.vmem [resolvable:$true] %s128_s17  ;;  %s154_s24 = int_to_ptr.vmem [resolvable:$true] %s153_s24 }
  0x87   :  { %s5703_s29 = scalar_lea.vmem %s129_s17, 1024  ;;  %p5708_p0 = scmp.lt.s32.totalorder %s129_s17, %s129_s17 }
  0x88   :  { %p5704_p13 = scmp.ne.s32.totalorder %s129_s17, %s5703_s29  ;;  %p5709_p1 = scmp.lt.s32.totalorder %s5703_s29, %s5703_s29 }
  0x8a   :  { %p5710_p2 = por %p5709_p1, %p5708_p0 }
  0x8c   :  { %p5711_p3 = pnand %p5710_p2, %p5704_p13 }
  0x8e   :  { %5714 = shalt.err (!%p5711_p3)
}
  0x8f   :  { %134 = dma.hbm_to_vmem [thread:$0]  %s7340_s9, 1024, %s129_s17, [#allocation14], %s5793_s28, %s5793_s28, %s5794_s4  }
  0x90   :  { %s5723_s7 = scalar_lea.vmem %s154_s24, 16  ;;  %s5727_s21 = scalar_lea.vmem %s154_s24, 32 }
  0x91   :  { %p5724_p4 = scmp.ne.s32.totalorder %s154_s24, %s5723_s7  ;;  %p5728_p5 = scmp.lt.s32.totalorder %s154_s24, %s154_s24 }
  0x92   :  { %p5729_p6 = scmp.lt.s32.totalorder %s5727_s21, %s5723_s7 }
  0x94   :  { %p5730_p7 = por %p5729_p6, %p5728_p5 }
  0x96   :  { %p5731_p8 = pnand %p5730_p7, %p5724_p4 }
  0x98   :  { %5734 = shalt.err (!%p5731_p8)
}
  0x99   :  { %156 = dma.hbm_to_vmem [thread:$0]  %s7342_s11, 16, %s154_s24, [#allocation17]  }
  0x9a   :  { %s5810_s25 = smov [#allocation21]   ;;  %s5811_s2 = smov [#allocation24]  }
  0x9b   :  { %s177_s13 = sshll.u32 %s5810_s25, 4  ;;  %s201_s6 = sshll.u32 %s5811_s2, 4  ;;  %s178_s13 = int_to_ptr.vmem [resolvable:$true] %s177_s13  ;;  %s202_s6 = int_to_ptr.vmem [resolvable:$true] %s201_s6 }
  0x9c   :  { %s5743_s1 = scalar_lea.vmem %s178_s13, 16  ;;  %s5747_s9 = scalar_lea.vmem %s178_s13, 32 }
  0x9d   :  { %p5744_p9 = scmp.ne.s32.totalorder %s178_s13, %s5743_s1  ;;  %p5748_p10 = scmp.lt.s32.totalorder %s178_s13, %s178_s13 }
  0x9e   :  { %p5749_p11 = scmp.lt.s32.totalorder %s5747_s9, %s5743_s1 }
  0xa0   :  { %p5750_p12 = por %p5749_p11, %p5748_p10 }
  0xa2   :  { %p5751_p13 = pnand %p5750_p12, %p5744_p9 }
  0xa4   :  { %5754 = shalt.err (!%p5751_p13)
}
  0xa5   :  { %180 = dma.hbm_to_vmem [thread:$0]  %s7346_s15, 16, %s178_s13, [#allocation20]  }
  0xa6   :  { %s5763_s8 = scalar_lea.vmem %s202_s6, 16  ;;  %s5767_s11 = scalar_lea.vmem %s202_s6, 32 }
  0xa7   :  { %p5764_p0 = scmp.ne.s32.totalorder %s202_s6, %s5763_s8  ;;  %p5768_p1 = scmp.lt.s32.totalorder %s202_s6, %s202_s6 }
  0xa8   :  { %p5769_p2 = scmp.lt.s32.totalorder %s5767_s11, %s5763_s8 }
  0xaa   :  { %p5770_p3 = por %p5769_p2, %p5768_p1 }
  0xac   :  { %p5771_p4 = pnand %p5770_p3, %p5764_p0 }
  0xae   :  { %5774 = shalt.err (!%p5771_p4)
}
  0xaf   :  { %204 = dma.hbm_to_vmem [thread:$0]  %s7350_s19, 16, %s202_s6, [#allocation23]  }
  0xb0   :  { %5775 = dma.done.wait [#allocation3], 68096  }
  0xb1   :  { %5776 = vsyncadd [#allocation3], 4294899200 }
  0xb2   :  { %5777 = dma.done.wait [#allocation5], 1920  }
  0xb3   :  { %5778 = vsyncadd [#allocation5], 4294965376 }
  0xb4   :  { %5779 = dma.done.wait [#allocation8], 38416  }
  0xb5   :  { %5780 = vsyncadd [#allocation8], 4294928880 }
  0xb6   :  { %5781 = dma.done.wait [#allocation11], 272  }
  0xb7   :  { %5782 = vsyncadd [#allocation11], 4294967024 }
  0xb8   :  { %5783 = dma.done.wait [#allocation14], 1040  }
  0xb9   :  { %5784 = vsyncadd [#allocation14], 4294966256 }
  0xba   :  { %5785 = dma.done.wait [#allocation17], 2064  }
  0xbb   :  { %5786 = vsyncadd [#allocation17], 4294965232 }
  0xbc   :  { %5787 = dma.done.wait [#allocation20], 32  }
  0xbd   :  { %5788 = vsyncadd [#allocation20], 4294967264 }
  0xbe   :  { %5789 = dma.done.wait [#allocation23], 32  }
  0xbf   :  { %5790 = vsyncadd [#allocation23], 4294967264  ;;  %v7352_v0 = vmov 0.0   ;;  %v797_v1 = vld [vmem:[#allocation7 + $0x78] sm:$0xff]  ;;  %v796_v3 = vld [vmem:[#allocation7 + $0x70] sm:$0xff]  ;;  %vm1089_vm0 = vcmask 785408  }
  0xc0   :  { %1174 = vmatprep.subr.mxu0 %v7352_v0  ;;  %1379 = vmatprep.subr.mxu1 %v7352_v0  ;;  %v829_v2 = vld [vmem:[#allocation7 + $0x178] sm:$0xff]  ;;  %v828_v4 = vld [vmem:[#allocation7 + $0x170] sm:$0xff]  ;;  %v795_v5 = vld [vmem:[#allocation7 + $0x68] sm:$0xff]  ;;  %vm3280_vm1 = vcmask 1046528   ;;  %vm3392_vm2 = vcmask 1045504   ;;  %vm3504_vm3 = vcmask 1044480  }
  0xc1   :  { %1175 = vmatpush1.msra.mxu0 %v797_v1  ;;  %1380 = vmatpush1.msra.mxu1 %v829_v2  ;;  %v827_v6 = vld [vmem:[#allocation7 + $0x168] sm:$0xff]  ;;  %v794_v7 = vld [vmem:[#allocation7 + $0x60] sm:$0xff]  ;;  %v793_v9 = vld [vmem:[#allocation7 + $0x58] sm:$0xff]  ;;  %vm3630_vm4 = vcmask 760832   ;;  %vm4198_vm5 = vcmask 105472   ;;  %vm5813_vm6 = vmmov 0  }
  0xc2   :  { %1176 = vmatprep.subr.mxu0 %v7352_v0  ;;  %1381 = vmatprep.subr.mxu1 %v7352_v0  ;;  %v826_v8 = vld [vmem:[#allocation7 + $0x160] sm:$0xff]  ;;  %v825_v10 = vld [vmem:[#allocation7 + $0x158] sm:$0xff]  ;;  %v792_v11 = vld [vmem:[#allocation7 + $0x50] sm:$0xff]  ;;  %vm4370_vm7 = vcmask 523264   ;;  %vm4647_vm8 = vcmask 261120   ;;  %vm4731_vm9 = vcmask 130048  }
  0xc3   :  { %1177 = vmatpush1.msra.mxu0 %v796_v3  ;;  %1382 = vmatpush1.msra.mxu1 %v828_v4  ;;  %v824_v12 = vld [vmem:[#allocation7 + $0x150] sm:$0xff]  ;;  %v791_v13 = vld [vmem:[#allocation7 + $0x48] sm:$0xff]  ;;  %v790_v15 = vld [vmem:[#allocation7 + $0x40] sm:$0xff]  ;;  %vm4805_vm10 = vcmask 15360  }
  0xc4   :  { %1178 = vmatprep.subr.mxu0 %v7352_v0  ;;  %1383 = vmatprep.subr.mxu1 %v7352_v0  ;;  %v823_v14 = vld [vmem:[#allocation7 + $0x148] sm:$0xff]  ;;  %v822_v16 = vld [vmem:[#allocation7 + $0x140] sm:$0xff]  ;;  %v789_v17 = vld [vmem:[#allocation7 + $0x38] sm:$0xff] }
  0xc5   :  { %1179 = vmatpush1.msra.mxu0 %v795_v5  ;;  %1384 = vmatpush1.msra.mxu1 %v827_v6  ;;  %v821_v18 = vld [vmem:[#allocation7 + $0x138] sm:$0xff]  ;;  %v788_v19 = vld [vmem:[#allocation7 + $0x30] sm:$0xff]  ;;  %v787_v21 = vld [vmem:[#allocation7 + $0x28] sm:$0xff] }
  0xc6   :  { %1180 = vmatprep.subr.mxu0 %v7352_v0  ;;  %1385 = vmatprep.subr.mxu1 %v7352_v0  ;;  %v820_v20 = vld [vmem:[#allocation7 + $0x130] sm:$0xff]  ;;  %v819_v22 = vld [vmem:[#allocation7 + $0x128] sm:$0xff]  ;;  %v786_v23 = vld [vmem:[#allocation7 + $0x20] sm:$0xff] }
  0xc7   :  { %1181 = vmatpush1.msra.mxu0 %v794_v7  ;;  %1386 = vmatpush1.msra.mxu1 %v826_v8  ;;  %v818_v24 = vld [vmem:[#allocation7 + $0x120] sm:$0xff]  ;;  %v785_v25 = vld [vmem:[#allocation7 + $0x18] sm:$0xff]  ;;  %v784_v27 = vld [vmem:[#allocation7 + $0x10] sm:$0xff] }
  0xc8   :  { %1182 = vmatprep.subr.mxu0 %v7352_v0  ;;  %1387 = vmatprep.subr.mxu1 %v7352_v0  ;;  %v817_v26 = vld [vmem:[#allocation7 + $0x118] sm:$0xff]  ;;  %v816_v28 = vld [vmem:[#allocation7 + $0x110] sm:$0xff]  ;;  %v783_v29 = vld [vmem:[#allocation7 + $0x8] sm:$0xff] }
  0xc9   :  { %1183 = vmatpush1.msra.mxu0 %v793_v9  ;;  %1388 = vmatpush1.msra.mxu1 %v825_v10  ;;  %v815_v30 = vld [vmem:[#allocation7 + $0x108] sm:$0xff]  ;;  %v782_v31 = vld [vmem:[#allocation7] sm:$0xff]  ;;  %v813_v33 = vld [vmem:[#allocation7 + $0xf8] sm:$0xff] }
  0xca   :  { %1184 = vmatprep.subr.mxu0 %v7352_v0  ;;  %1389 = vmatprep.subr.mxu1 %v7352_v0  ;;  %v814_v32 = vld [vmem:[#allocation7 + $0x100] sm:$0xff]  ;;  %v845_v34 = vld [vmem:[#allocation7 + $0x1f8] sm:$0xff]  ;;  %v812_v35 = vld [vmem:[#allocation7 + $0xf0] sm:$0xff] }
  0xcb   :  { %1185 = vmatpush1.msra.mxu0 %v792_v11  ;;  %1390 = vmatpush1.msra.mxu1 %v824_v12  ;;  %v844_v36 = vld [vmem:[#allocation7 + $0x1f0] sm:$0xff]  ;;  %v811_v37 = vld [vmem:[#allocation7 + $0xe8] sm:$0xff]  ;;  %v810_v39 = vld [vmem:[#allocation7 + $0xe0] sm:$0xff] }
  0xcc   :  { %1186 = vmatprep.subr.mxu0 %v7352_v0  ;;  %1391 = vmatprep.subr.mxu1 %v7352_v0  ;;  %v843_v38 = vld [vmem:[#allocation7 + $0x1e8] sm:$0xff]  ;;  %v842_v40 = vld [vmem:[#allocation7 + $0x1e0] sm:$0xff]  ;;  %v809_v41 = vld [vmem:[#allocation7 + $0xd8] sm:$0xff] }
  0xcd   :  { %1187 = vmatpush1.msra.mxu0 %v791_v13  ;;  %1392 = vmatpush1.msra.mxu1 %v823_v14  ;;  %v841_v42 = vld [vmem:[#allocation7 + $0x1d8] sm:$0xff]  ;;  %v808_v43 = vld [vmem:[#allocation7 + $0xd0] sm:$0xff]  ;;  %v807_v45 = vld [vmem:[#allocation7 + $0xc8] sm:$0xff] }
  0xce   :  { %1188 = vmatprep.subr.mxu0 %v7352_v0  ;;  %1393 = vmatprep.subr.mxu1 %v7352_v0  ;;  %v840_v44 = vld [vmem:[#allocation7 + $0x1d0] sm:$0xff]  ;;  %v839_v46 = vld [vmem:[#allocation7 + $0x1c8] sm:$0xff]  ;;  %v806_v47 = vld [vmem:[#allocation7 + $0xc0] sm:$0xff] }
  0xcf   :  { %1189 = vmatpush1.msra.mxu0 %v790_v15  ;;  %1394 = vmatpush1.msra.mxu1 %v822_v16  ;;  %v838_v48 = vld [vmem:[#allocation7 + $0x1c0] sm:$0xff]  ;;  %v805_v49 = vld [vmem:[#allocation7 + $0xb8] sm:$0xff]  ;;  %v804_v51 = vld [vmem:[#allocation7 + $0xb0] sm:$0xff] }
  0xd0   :  { %1190 = vmatprep.subr.mxu0 %v7352_v0  ;;  %1395 = vmatprep.subr.mxu1 %v7352_v0  ;;  %v837_v50 = vld [vmem:[#allocation7 + $0x1b8] sm:$0xff]  ;;  %v836_v52 = vld [vmem:[#allocation7 + $0x1b0] sm:$0xff]  ;;  %v803_v53 = vld [vmem:[#allocation7 + $0xa8] sm:$0xff] }
  0xd1   :  { %1191 = vmatpush1.msra.mxu0 %v789_v17  ;;  %1396 = vmatpush1.msra.mxu1 %v821_v18  ;;  %v835_v54 = vld [vmem:[#allocation7 + $0x1a8] sm:$0xff]  ;;  %v802_v55 = vld [vmem:[#allocation7 + $0xa0] sm:$0xff]  ;;  %v801_v57 = vld [vmem:[#allocation7 + $0x98] sm:$0xff] }
  0xd2   :  { %1192 = vmatprep.subr.mxu0 %v7352_v0  ;;  %1397 = vmatprep.subr.mxu1 %v7352_v0  ;;  %v834_v56 = vld [vmem:[#allocation7 + $0x1a0] sm:$0xff]  ;;  %v833_v58 = vld [vmem:[#allocation7 + $0x198] sm:$0xff]  ;;  %v800_v59 = vld [vmem:[#allocation7 + $0x90] sm:$0xff] }
  0xd3   :  { %1193 = vmatpush1.msra.mxu0 %v788_v19  ;;  %1398 = vmatpush1.msra.mxu1 %v820_v20  ;;  %v832_v60 = vld [vmem:[#allocation7 + $0x190] sm:$0xff]  ;;  %v799_v61 = vld [vmem:[#allocation7 + $0x88] sm:$0xff]  ;;  %v798_v63 = vld [vmem:[#allocation7 + $0x80] sm:$0xff] }
  0xd4   :  { %1194 = vmatprep.subr.mxu0 %v7352_v0  ;;  %1399 = vmatprep.subr.mxu1 %v7352_v0  ;;  %v831_v62 = vld [vmem:[#allocation7 + $0x188] sm:$0xff]  ;;  %v251_v1 = vld [vmem:[#allocation2 + $0x8] sm:$0xff]  ;;  %v830_v2 = vld [vmem:[#allocation7 + $0x180] sm:$0xff] }
  0xd5   :  { %1195 = vmatpush1.msra.mxu0 %v787_v21  ;;  %1400 = vmatpush1.msra.mxu1 %v819_v22  ;;  %v253_v3 = vld [vmem:[#allocation2 + $0x18] sm:$0xff]  ;;  %v250_v4 = vld [vmem:[#allocation2] sm:$0xff]  ;;  %v252_v5 = vld [vmem:[#allocation2 + $0x10] sm:$0xff] }
  0xd6   :  { %1196 = vmatprep.subr.mxu0 %v7352_v0  ;;  %1401 = vmatprep.subr.mxu1 %v7352_v0  ;;  %v270_v6 = vld [vmem:[#allocation2 + $0xa0] sm:$0xff]  ;;  %v861_v7 = vld [vmem:[#allocation7 + $0x278] sm:$0xff]  ;;  %v269_v9 = vld [vmem:[#allocation2 + $0x98] sm:$0xff] }
  0xd7   :  { %1197 = vmatpush1.msra.mxu0 %v786_v23  ;;  %1402 = vmatpush1.msra.mxu1 %v818_v24  ;;  %v272_v8 = vld [vmem:[#allocation2 + $0xb0] sm:$0xff]  ;;  %v271_v10 = vld [vmem:[#allocation2 + $0xa8] sm:$0xff]  ;;  %v289_v12 = vld [vmem:[#allocation2 + $0x138] sm:$0xff] }
  0xd8   :  { %1198 = vmatprep.subr.mxu0 %v7352_v0  ;;  %1403 = vmatprep.subr.mxu1 %v7352_v0  ;;  %v860_v11 = vld [vmem:[#allocation7 + $0x270] sm:$0xff]  ;;  %v859_v14 = vld [vmem:[#allocation7 + $0x268] sm:$0xff]  ;;  %v893_v15 = vld [vmem:[#allocation7 + $0x378] sm:$0xff] }
  0xd9   :  { %1199 = vmatpush1.msra.mxu0 %v785_v25  ;;  %1404 = vmatpush1.msra.mxu1 %v817_v26  ;;  %v291_v13 = vld [vmem:[#allocation2 + $0x148] sm:$0xff]  ;;  %v288_v16 = vld [vmem:[#allocation2 + $0x130] sm:$0xff]  ;;  %v290_v17 = vld [vmem:[#allocation2 + $0x140] sm:$0xff] }
  0xda   :  { %1200 = vmatprep.subr.mxu0 %v7352_v0  ;;  %1405 = vmatprep.subr.mxu1 %v7352_v0  ;;  %v308_v18 = vld [vmem:[#allocation2 + $0x1d0] sm:$0xff]  ;;  %v310_v19 = vld [vmem:[#allocation2 + $0x1e0] sm:$0xff]  ;;  %v858_v20 = vld [vmem:[#allocation7 + $0x260] sm:$0xff] }
  0xdb   :  { %1201 = vmatpush1.msra.mxu0 %v784_v27  ;;  %1406 = vmatpush1.msra.mxu1 %v816_v28  ;;  %v892_v21 = vld [vmem:[#allocation7 + $0x370] sm:$0xff]  ;;  %v309_v23 = vld [vmem:[#allocation2 + $0x1d8] sm:$0xff]  ;;  %v857_v26 = vld [vmem:[#allocation7 + $0x258] sm:$0xff] }
  0xdc   :  { %1202 = vmatprep.subr.mxu0 %v7352_v0  ;;  %1407 = vmatprep.subr.mxu1 %v7352_v0  ;;  %v307_v22 = vld [vmem:[#allocation2 + $0x1c8] sm:$0xff]  ;;  %v329_v25 = vld [vmem:[#allocation2 + $0x278] sm:$0xff]  ;;  %v326_v27 = vld [vmem:[#allocation2 + $0x260] sm:$0xff] }
  0xdd   :  { %1203 = vmatpush1.msra.mxu0 %v783_v29  ;;  %1408 = vmatpush1.msra.mxu1 %v815_v30  ;;  %v327_v24 = vld [vmem:[#allocation2 + $0x268] sm:$0xff]  ;;  %v328_v28 = vld [vmem:[#allocation2 + $0x270] sm:$0xff]  ;;  %v346_v29 = vld [vmem:[#allocation2 + $0x300] sm:$0xff] }
  0xde   :  { %1204 = vmatprep.subr.mxu0 %v7352_v0  ;;  %1409 = vmatprep.subr.mxu1 %v7352_v0  ;;  %v348_v30 = vld [vmem:[#allocation2 + $0x310] sm:$0xff] }
  0xdf   :  { %1205 = vmatpush1.msra.mxu0 %v782_v31  ;;  %1410 = vmatpush1.msra.mxu1 %v814_v32  ;;  %v856_v31 = vld [vmem:[#allocation7 + $0x250] sm:$0xff]  ;;  %v891_v32 = vld [vmem:[#allocation7 + $0x368] sm:$0xff] }
  0xe0   :  { %1206 = vmatprep.subr.mxu0 %v7352_v0  ;;  %1411 = vmatprep.subr.mxu1 %v7352_v0 }
  0xe1   :  { %1207 = vmatpush2.msra.mxu0 %v813_v33  ;;  %1412 = vmatpush2.msra.mxu1 %v845_v34  ;;  %v345_v33 = vld [vmem:[#allocation2 + $0x2f8] sm:$0xff]  ;;  %v347_v34 = vld [vmem:[#allocation2 + $0x308] sm:$0xff] }
  0xe2   :  { %1208 = vmatprep.subr.mxu0 %v7352_v0  ;;  %1413 = vmatprep.subr.mxu1 %v7352_v0 }
  0xe3   :  { %1209 = vmatpush2.msra.mxu0 %v812_v35  ;;  %1414 = vmatpush2.msra.mxu1 %v844_v36  ;;  %v855_v35 = vld [vmem:[#allocation7 + $0x248] sm:$0xff]  ;;  %v365_v36 = vld [vmem:[#allocation2 + $0x398] sm:$0xff] }
  0xe4   :  { %1210 = vmatprep.subr.mxu0 %v7352_v0  ;;  %1415 = vmatprep.subr.mxu1 %v7352_v0 }
  0xe5   :  { %1211 = vmatpush2.msra.mxu0 %v811_v37  ;;  %1416 = vmatpush2.msra.mxu1 %v843_v38  ;;  %v367_v37 = vld [vmem:[#allocation2 + $0x3a8] sm:$0xff]  ;;  %v854_v38 = vld [vmem:[#allocation7 + $0x240] sm:$0xff] }
  0xe6   :  { %1212 = vmatprep.subr.mxu0 %v7352_v0  ;;  %1417 = vmatprep.subr.mxu1 %v7352_v0 }
  0xe7   :  { %1213 = vmatpush2.msra.mxu0 %v810_v39  ;;  %1418 = vmatpush2.msra.mxu1 %v842_v40  ;;  %v890_v39 = vld [vmem:[#allocation7 + $0x360] sm:$0xff]  ;;  %v364_v40 = vld [vmem:[#allocation2 + $0x390] sm:$0xff] }
  0xe8   :  { %1214 = vmatprep.subr.mxu0 %v7352_v0  ;;  %1419 = vmatprep.subr.mxu1 %v7352_v0 }
  0xe9   :  { %1215 = vmatpush2.msra.mxu0 %v809_v41  ;;  %1420 = vmatpush2.msra.mxu1 %v841_v42  ;;  %v366_v41 = vld [vmem:[#allocation2 + $0x3a0] sm:$0xff]  ;;  %v384_v42 = vld [vmem:[#allocation2 + $0x430] sm:$0xff] }
  0xea   :  { %1216 = vmatprep.subr.mxu0 %v7352_v0  ;;  %1421 = vmatprep.subr.mxu1 %v7352_v0 }
  0xeb   :  { %1217 = vmatpush2.msra.mxu0 %v808_v43  ;;  %1422 = vmatpush2.msra.mxu1 %v840_v44  ;;  %v386_v43 = vld [vmem:[#allocation2 + $0x440] sm:$0xff]  ;;  %v853_v44 = vld [vmem:[#allocation7 + $0x238] sm:$0xff] }
  0xec   :  { %1218 = vmatprep.subr.mxu0 %v7352_v0  ;;  %1423 = vmatprep.subr.mxu1 %v7352_v0 }
  0xed   :  { %1219 = vmatpush2.msra.mxu0 %v807_v45  ;;  %1424 = vmatpush2.msra.mxu1 %v839_v46  ;;  %v889_v45 = vld [vmem:[#allocation7 + $0x358] sm:$0xff]  ;;  %v383_v46 = vld [vmem:[#allocation2 + $0x428] sm:$0xff] }
  0xee   :  { %1220 = vmatprep.subr.mxu0 %v7352_v0  ;;  %1425 = vmatprep.subr.mxu1 %v7352_v0 }
  0xef   :  { %1221 = vmatpush2.msra.mxu0 %v806_v47  ;;  %1426 = vmatpush2.msra.mxu1 %v838_v48  ;;  %v385_v47 = vld [vmem:[#allocation2 + $0x438] sm:$0xff]  ;;  %v403_v48 = vld [vmem:[#allocation2 + $0x4c8] sm:$0xff] }
  0xf0   :  { %1222 = vmatprep.subr.mxu0 %v7352_v0  ;;  %1427 = vmatprep.subr.mxu1 %v7352_v0 }
  0xf1   :  { %1223 = vmatpush2.msra.mxu0 %v805_v49  ;;  %1428 = vmatpush2.msra.mxu1 %v837_v50  ;;  %v405_v49 = vld [vmem:[#allocation2 + $0x4d8] sm:$0xff]  ;;  %v852_v50 = vld [vmem:[#allocation7 + $0x230] sm:$0xff] }
  0xf2   :  { %1224 = vmatprep.subr.mxu0 %v7352_v0  ;;  %1429 = vmatprep.subr.mxu1 %v7352_v0 }
  0xf3   :  { %1225 = vmatpush2.msra.mxu0 %v804_v51  ;;  %1430 = vmatpush2.msra.mxu1 %v836_v52  ;;  %v888_v51 = vld [vmem:[#allocation7 + $0x350] sm:$0xff]  ;;  %v402_v52 = vld [vmem:[#allocation2 + $0x4c0] sm:$0xff] }
  0xf4   :  { %1226 = vmatprep.subr.mxu0 %v7352_v0  ;;  %1431 = vmatprep.subr.mxu1 %v7352_v0 }
  0xf5   :  { %1227 = vmatpush2.msra.mxu0 %v803_v53  ;;  %1432 = vmatpush2.msra.mxu1 %v835_v54  ;;  %v404_v53 = vld [vmem:[#allocation2 + $0x4d0] sm:$0xff]  ;;  %v422_v54 = vld [vmem:[#allocation2 + $0x560] sm:$0xff] }
  0xf6   :  { %1228 = vmatprep.subr.mxu0 %v7352_v0  ;;  %1433 = vmatprep.subr.mxu1 %v7352_v0 }
  0xf7   :  { %1229 = vmatpush2.msra.mxu0 %v802_v55  ;;  %1434 = vmatpush2.msra.mxu1 %v834_v56  ;;  %v424_v55 = vld [vmem:[#allocation2 + $0x570] sm:$0xff]  ;;  %v851_v56 = vld [vmem:[#allocation7 + $0x228] sm:$0xff] }
  0xf8   :  { %1230 = vmatprep.subr.mxu0 %v7352_v0  ;;  %1435 = vmatprep.subr.mxu1 %v7352_v0 }
  0xf9   :  { %1231 = vmatpush2.msra.mxu0 %v801_v57  ;;  %1436 = vmatpush2.msra.mxu1 %v833_v58  ;;  %v887_v57 = vld [vmem:[#allocation7 + $0x348] sm:$0xff]  ;;  %v421_v58 = vld [vmem:[#allocation2 + $0x558] sm:$0xff] }
  0xfa   :  { %1232 = vmatprep.subr.mxu0 %v7352_v0  ;;  %1437 = vmatprep.subr.mxu1 %v7352_v0 }
  0xfb   :  { %1233 = vmatpush2.msra.mxu0 %v800_v59  ;;  %1438 = vmatpush2.msra.mxu1 %v832_v60  ;;  %v423_v59 = vld [vmem:[#allocation2 + $0x568] sm:$0xff]  ;;  %v441_v60 = vld [vmem:[#allocation2 + $0x5f8] sm:$0xff] }
  0xfc   :  { %1234 = vmatprep.subr.mxu0 %v7352_v0  ;;  %1439 = vmatprep.subr.mxu1 %v7352_v0 }
  0xfd   :  { %1235 = vmatpush2.msra.mxu0 %v799_v61  ;;  %1440 = vmatpush2.msra.mxu1 %v831_v62  ;;  %v443_v61 = vld [vmem:[#allocation2 + $0x608] sm:$0xff]  ;;  %v850_v62 = vld [vmem:[#allocation7 + $0x220] sm:$0xff] }
  0xfe   :  { %1236 = vmatprep.subr.mxu0 %v7352_v0  ;;  %1441 = vmatprep.subr.mxu1 %v7352_v0 }
  0xff   :  { %1237 = vmatpush2.msra.mxu0 %v798_v63  ;;  %1238 = vmatprep.mubr.f32.mxu0 %v251_v1  ;;  %v886_v63 = vld [vmem:[#allocation7 + $0x340] sm:$0xff]  ;;  %v440_v1 = vld [vmem:[#allocation2 + $0x5f0] sm:$0xff] }
 0x100   :  { %1442 = vmatpush2.msra.mxu1 %v830_v2  ;;  %1443 = vmatprep.mubr.f32.mxu1 %v253_v3  ;;  %v442_v2 = vld [vmem:[#allocation2 + $0x600] sm:$0xff]  ;;  %v460_v3 = vld [vmem:[#allocation2 + $0x690] sm:$0xff] }
 0x101   :  { %1239 = vmatmul.mubr.f32.vlgmr.msra.gmra.mxu0 %v250_v4  ;;  %1444 = vmatmul.mubr.f32.vlgmr.msra.gmra.mxu1 %v252_v5  ;;  %v462_v4 = vld [vmem:[#allocation2 + $0x6a0] sm:$0xff]  ;;  %v849_v5 = vld [vmem:[#allocation7 + $0x218] sm:$0xff] }
 0x102   :  { %1584 = vmatprep.subr.mxu0 %v7352_v0  ;;  %1243 = vmatprep.mubr.f32.mxu0 %v270_v6  ;;  %v459_v6 = vld [vmem:[#allocation2 + $0x688] sm:$0xff] }
 0x103   :  { %1585 = vmatpush1.msra.mxu0 %v861_v7  ;;  %1448 = vmatprep.mubr.f32.mxu1 %v272_v8  ;;  %v461_v7 = vld [vmem:[#allocation2 + $0x698] sm:$0xff]  ;;  %v479_v8 = vld [vmem:[#allocation2 + $0x728] sm:$0xff] }
 0x104   :  { %1586 = vmatprep.subr.mxu0 %v7352_v0  ;;  %1789 = vmatprep.subr.mxu1 %v7352_v0 }
 0x105   :  { %1244 = vmatmul.mubr.f32.gmra.mxu0 %v269_v9  ;;  %1449 = vmatmul.mubr.f32.gmra.mxu1 %v271_v10  ;;  %v481_v9 = vld [vmem:[#allocation2 + $0x738] sm:$0xff]  ;;  %v848_v10 = vld [vmem:[#allocation7 + $0x210] sm:$0xff] }
 0x106   :  { %1587 = vmatpush1.msra.mxu0 %v860_v11  ;;  %1248 = vmatprep.mubr.f32.mxu0 %v289_v12  ;;  %v885_v11 = vld [vmem:[#allocation7 + $0x338] sm:$0xff]  ;;  %v478_v12 = vld [vmem:[#allocation2 + $0x720] sm:$0xff] }
 0x107   :  { %1453 = vmatprep.mubr.f32.mxu1 %v291_v13  ;;  %1588 = vmatprep.subr.mxu0 %v7352_v0  ;;  %v480_v13 = vld [vmem:[#allocation2 + $0x730] sm:$0xff] }
 0x108   :  { %1589 = vmatpush1.msra.mxu0 %v859_v14  ;;  %1790 = vmatpush1.msra.mxu1 %v893_v15  ;;  %v847_v14 = vld [vmem:[#allocation7 + $0x208] sm:$0xff] }
 0x109   :  { %1249 = vmatmul.mubr.f32.gmra.mxu0 %v288_v16  ;;  %1454 = vmatmul.mubr.f32.gmra.mxu1 %v290_v17  ;;  %v498_v15 = vld [vmem:[#allocation2 + $0x7c0] sm:$0xff]  ;;  %v500_v16 = vld [vmem:[#allocation2 + $0x7d0] sm:$0xff]  ;;  %v846_v17 = vld [vmem:[#allocation7 + $0x200] sm:$0xff] }
 0x10a   :  { %1253 = vmatprep.mubr.f32.mxu0 %v308_v18  ;;  %1458 = vmatprep.mubr.f32.mxu1 %v310_v19  ;;  %v884_v18 = vld [vmem:[#allocation7 + $0x330] sm:$0xff]  ;;  %v497_v19 = vld [vmem:[#allocation2 + $0x7b8] sm:$0xff] }
 0x10b   :  { %1590 = vmatprep.subr.mxu0 %v7352_v0  ;;  %1791 = vmatprep.subr.mxu1 %v7352_v0 }
 0x10c   :  { %1591 = vmatpush1.msra.mxu0 %v858_v20  ;;  %1792 = vmatpush1.msra.mxu1 %v892_v21  ;;  %v499_v20 = vld [vmem:[#allocation2 + $0x7c8] sm:$0xff]  ;;  %v517_v21 = vld [vmem:[#allocation2 + $0x858] sm:$0xff] }
 0x10d   :  { %1254 = vmatmul.mubr.f32.gmra.mxu0 %v307_v22  ;;  %1459 = vmatmul.mubr.f32.gmra.mxu1 %v309_v23  ;;  %v519_v22 = vld [vmem:[#allocation2 + $0x868] sm:$0xff]  ;;  %v877_v23 = vld [vmem:[#allocation7 + $0x2f8] sm:$0xff] }
 0x10e   :  { %1592 = vmatprep.subr.mxu0 %v7352_v0  ;;  %1258 = vmatprep.mubr.f32.mxu0 %v327_v24  ;;  %v883_v24 = vld [vmem:[#allocation7 + $0x328] sm:$0xff] }
 0x10f   :  { %1463 = vmatprep.mubr.f32.mxu1 %v329_v25  ;;  %1593 = vmatpush1.msra.mxu0 %v857_v26  ;;  %v516_v25 = vld [vmem:[#allocation2 + $0x850] sm:$0xff]  ;;  %v518_v26 = vld [vmem:[#allocation2 + $0x860] sm:$0xff] }
 0x110   :  { %1594 = vmatprep.subr.mxu0 %v7352_v0  ;;  %1793 = vmatprep.subr.mxu1 %v7352_v0 }
 0x111   :  { %1259 = vmatmul.mubr.f32.gmra.mxu0 %v326_v27  ;;  %1464 = vmatmul.mubr.f32.gmra.mxu1 %v328_v28  ;;  %v536_v27 = vld [vmem:[#allocation2 + $0x8f0] sm:$0xff]  ;;  %v538_v28 = vld [vmem:[#allocation2 + $0x900] sm:$0xff] }
 0x112   :  { %1263 = vmatprep.mubr.f32.mxu0 %v346_v29  ;;  %1468 = vmatprep.mubr.f32.mxu1 %v348_v30  ;;  %v876_v29 = vld [vmem:[#allocation7 + $0x2f0] sm:$0xff]  ;;  %v882_v30 = vld [vmem:[#allocation7 + $0x320] sm:$0xff] }
 0x113   :  { %1595 = vmatpush1.msra.mxu0 %v856_v31  ;;  %1794 = vmatpush1.msra.mxu1 %v891_v32  ;;  %v535_v31 = vld [vmem:[#allocation2 + $0x8e8] sm:$0xff]  ;;  %v537_v32 = vld [vmem:[#allocation2 + $0x8f8] sm:$0xff] }
 0x114   :  { %1596 = vmatprep.subr.mxu0 %v7352_v0  ;;  %1795 = vmatprep.subr.mxu1 %v7352_v0 }
 0x115   :  { %1264 = vmatmul.mubr.f32.gmra.mxu0 %v345_v33  ;;  %1469 = vmatmul.mubr.f32.gmra.mxu1 %v347_v34  ;;  %v555_v33 = vld [vmem:[#allocation2 + $0x988] sm:$0xff]  ;;  %v557_v34 = vld [vmem:[#allocation2 + $0x998] sm:$0xff] }
 0x116   :  { %1597 = vmatpush1.msra.mxu0 %v855_v35  ;;  %1268 = vmatprep.mubr.f32.mxu0 %v365_v36  ;;  %v875_v35 = vld [vmem:[#allocation7 + $0x2e8] sm:$0xff]  ;;  %v881_v36 = vld [vmem:[#allocation7 + $0x318] sm:$0xff] }
 0x117   :  { %1473 = vmatprep.mubr.f32.mxu1 %v367_v37  ;;  %1598 = vmatprep.subr.mxu0 %v7352_v0  ;;  %v554_v37 = vld [vmem:[#allocation2 + $0x980] sm:$0xff] }
 0x118   :  { %1599 = vmatpush1.msra.mxu0 %v854_v38  ;;  %1796 = vmatpush1.msra.mxu1 %v890_v39  ;;  %v556_v38 = vld [vmem:[#allocation2 + $0x990] sm:$0xff]  ;;  %v574_v39 = vld [vmem:[#allocation2 + $0xa20] sm:$0xff] }
 0x119   :  { %1269 = vmatmul.mubr.f32.gmra.mxu0 %v364_v40  ;;  %1474 = vmatmul.mubr.f32.gmra.mxu1 %v366_v41  ;;  %v576_v40 = vld [vmem:[#allocation2 + $0xa30] sm:$0xff]  ;;  %v874_v41 = vld [vmem:[#allocation7 + $0x2e0] sm:$0xff] }
 0x11a   :  { %1273 = vmatprep.mubr.f32.mxu0 %v384_v42  ;;  %1478 = vmatprep.mubr.f32.mxu1 %v386_v43  ;;  %v880_v42 = vld [vmem:[#allocation7 + $0x310] sm:$0xff]  ;;  %v573_v43 = vld [vmem:[#allocation2 + $0xa18] sm:$0xff] }
 0x11b   :  { %1600 = vmatprep.subr.mxu0 %v7352_v0  ;;  %1797 = vmatprep.subr.mxu1 %v7352_v0 }
 0x11c   :  { %1601 = vmatpush1.msra.mxu0 %v853_v44  ;;  %1798 = vmatpush1.msra.mxu1 %v889_v45  ;;  %v575_v44 = vld [vmem:[#allocation2 + $0xa28] sm:$0xff]  ;;  %v593_v45 = vld [vmem:[#allocation2 + $0xab8] sm:$0xff] }
 0x11d   :  { %1274 = vmatmul.mubr.f32.gmra.mxu0 %v383_v46  ;;  %1479 = vmatmul.mubr.f32.gmra.mxu1 %v385_v47  ;;  %v595_v46 = vld [vmem:[#allocation2 + $0xac8] sm:$0xff]  ;;  %v873_v47 = vld [vmem:[#allocation7 + $0x2d8] sm:$0xff] }
 0x11e   :  { %1278 = vmatprep.mubr.f32.mxu0 %v403_v48  ;;  %1483 = vmatprep.mubr.f32.mxu1 %v405_v49  ;;  %v592_v48 = vld [vmem:[#allocation2 + $0xab0] sm:$0xff]  ;;  %v594_v49 = vld [vmem:[#allocation2 + $0xac0] sm:$0xff] }
 0x11f   :  { %1602 = vmatprep.subr.mxu0 %v7352_v0  ;;  %1799 = vmatprep.subr.mxu1 %v7352_v0 }
 0x120   :  { %1603 = vmatpush1.msra.mxu0 %v852_v50  ;;  %1800 = vmatpush1.msra.mxu1 %v888_v51  ;;  %v612_v50 = vld [vmem:[#allocation2 + $0xb50] sm:$0xff]  ;;  %v614_v51 = vld [vmem:[#allocation2 + $0xb60] sm:$0xff] }
 0x121   :  { %1279 = vmatmul.mubr.f32.gmra.mxu0 %v402_v52  ;;  %1484 = vmatmul.mubr.f32.gmra.mxu1 %v404_v53  ;;  %v872_v52 = vld [vmem:[#allocation7 + $0x2d0] sm:$0xff]  ;;  %v879_v53 = vld [vmem:[#allocation7 + $0x308] sm:$0xff] }
 0x122   :  { %1283 = vmatprep.mubr.f32.mxu0 %v422_v54  ;;  %1488 = vmatprep.mubr.f32.mxu1 %v424_v55  ;;  %v611_v54 = vld [vmem:[#allocation2 + $0xb48] sm:$0xff]  ;;  %v613_v55 = vld [vmem:[#allocation2 + $0xb58] sm:$0xff] }
 0x123   :  { %1604 = vmatprep.subr.mxu0 %v7352_v0  ;;  %1801 = vmatprep.subr.mxu1 %v7352_v0 }
 0x124   :  { %1605 = vmatpush1.msra.mxu0 %v851_v56  ;;  %1802 = vmatpush1.msra.mxu1 %v887_v57  ;;  %v871_v56 = vld [vmem:[#allocation7 + $0x2c8] sm:$0xff]  ;;  %v631_v57 = vld [vmem:[#allocation2 + $0xbe8] sm:$0xff] }
 0x125   :  { %1284 = vmatmul.mubr.f32.gmra.mxu0 %v421_v58  ;;  %1489 = vmatmul.mubr.f32.gmra.mxu1 %v423_v59  ;;  %v633_v58 = vld [vmem:[#allocation2 + $0xbf8] sm:$0xff] }
 0x126   :  { %1288 = vmatprep.mubr.f32.mxu0 %v441_v60  ;;  %1493 = vmatprep.mubr.f32.mxu1 %v443_v61  ;;  %v878_v59 = vld [vmem:[#allocation7 + $0x300] sm:$0xff]  ;;  %v630_v60 = vld [vmem:[#allocation2 + $0xbe0] sm:$0xff]  ;;  %v632_v61 = vld [vmem:[#allocation2 + $0xbf0] sm:$0xff] }
 0x127   :  { %1606 = vmatprep.subr.mxu0 %v7352_v0  ;;  %1803 = vmatprep.subr.mxu1 %v7352_v0 }
 0x128   :  { %1607 = vmatpush1.msra.mxu0 %v850_v62  ;;  %1804 = vmatpush1.msra.mxu1 %v886_v63  ;;  %v909_v62 = vld [vmem:[#allocation7 + $0x3f8] sm:$0xff]  ;;  %v870_v63 = vld [vmem:[#allocation7 + $0x2c0] sm:$0xff] }
 0x129   :  { %1289 = vmatmul.mubr.f32.gmra.mxu0 %v440_v1  ;;  %1494 = vmatmul.mubr.f32.gmra.mxu1 %v442_v2  ;;  %v650_v1 = vld [vmem:[#allocation2 + $0xc80] sm:$0xff]  ;;  %v652_v2 = vld [vmem:[#allocation2 + $0xc90] sm:$0xff] }
 0x12a   :  { %1608 = vmatprep.subr.mxu0 %v7352_v0  ;;  %1293 = vmatprep.mubr.f32.mxu0 %v460_v3  ;;  %v908_v3 = vld [vmem:[#allocation7 + $0x3f0] sm:$0xff] }
 0x12b   :  { %1498 = vmatprep.mubr.f32.mxu1 %v462_v4  ;;  %1609 = vmatpush1.msra.mxu0 %v849_v5  ;;  %v649_v4 = vld [vmem:[#allocation2 + $0xc78] sm:$0xff]  ;;  %v651_v5 = vld [vmem:[#allocation2 + $0xc88] sm:$0xff] }
 0x12c   :  { %1610 = vmatprep.subr.mxu0 %v7352_v0  ;;  %1805 = vmatprep.subr.mxu1 %v7352_v0 }
 0x12d   :  { %1294 = vmatmul.mubr.f32.gmra.mxu0 %v459_v6  ;;  %1499 = vmatmul.mubr.f32.gmra.mxu1 %v461_v7  ;;  %v869_v6 = vld [vmem:[#allocation7 + $0x2b8] sm:$0xff]  ;;  %v907_v7 = vld [vmem:[#allocation7 + $0x3e8] sm:$0xff] }
 0x12e   :  { %1298 = vmatprep.mubr.f32.mxu0 %v479_v8  ;;  %1503 = vmatprep.mubr.f32.mxu1 %v481_v9  ;;  %v669_v8 = vld [vmem:[#allocation2 + $0xd18] sm:$0xff]  ;;  %v671_v9 = vld [vmem:[#allocation2 + $0xd28] sm:$0xff] }
 0x12f   :  { %1611 = vmatpush1.msra.mxu0 %v848_v10  ;;  %1806 = vmatpush1.msra.mxu1 %v885_v11  ;;  %v906_v10 = vld [vmem:[#allocation7 + $0x3e0] sm:$0xff]  ;;  %v668_v11 = vld [vmem:[#allocation2 + $0xd10] sm:$0xff] }
 0x130   :  { %1612 = vmatprep.subr.mxu0 %v7352_v0  ;;  %1807 = vmatprep.subr.mxu1 %v7352_v0 }
 0x131   :  { %1299 = vmatmul.mubr.f32.gmra.mxu0 %v478_v12  ;;  %1504 = vmatmul.mubr.f32.gmra.mxu1 %v480_v13  ;;  %v670_v12 = vld [vmem:[#allocation2 + $0xd20] sm:$0xff]  ;;  %v868_v13 = vld [vmem:[#allocation7 + $0x2b0] sm:$0xff] }
 0x132   :  { %1613 = vmatpush1.msra.mxu0 %v847_v14  ;;  %1303 = vmatprep.mubr.f32.mxu0 %v498_v15  ;;  %v905_v14 = vld [vmem:[#allocation7 + $0x3d8] sm:$0xff] }
 0x133   :  { %1508 = vmatprep.mubr.f32.mxu1 %v500_v16  ;;  %1614 = vmatprep.subr.mxu0 %v7352_v0  ;;  %v688_v15 = vld [vmem:[#allocation2 + $0xdb0] sm:$0xff]  ;;  %v690_v16 = vld [vmem:[#allocation2 + $0xdc0] sm:$0xff] }
 0x134   :  { %1615 = vmatpush1.msra.mxu0 %v846_v17  ;;  %1808 = vmatpush1.msra.mxu1 %v884_v18  ;;  %v904_v17 = vld [vmem:[#allocation7 + $0x3d0] sm:$0xff] }
 0x135   :  { %1304 = vmatmul.mubr.f32.gmra.mxu0 %v497_v19  ;;  %1509 = vmatmul.mubr.f32.gmra.mxu1 %v499_v20  ;;  %v687_v18 = vld [vmem:[#allocation2 + $0xda8] sm:$0xff]  ;;  %v689_v19 = vld [vmem:[#allocation2 + $0xdb8] sm:$0xff]  ;;  %v867_v20 = vld [vmem:[#allocation7 + $0x2a8] sm:$0xff] }
 0x136   :  { %1308 = vmatprep.mubr.f32.mxu0 %v517_v21  ;;  %1513 = vmatprep.mubr.f32.mxu1 %v519_v22  ;;  %v707_v21 = vld [vmem:[#allocation2 + $0xe48] sm:$0xff]  ;;  %v903_v22 = vld [vmem:[#allocation7 + $0x3c8] sm:$0xff] }
 0x137   :  { %1616 = vmatprep.subr.mxu0 %v7352_v0  ;;  %1809 = vmatprep.subr.mxu1 %v7352_v0 }
 0x138   :  { %1617 = vmatpush2.msra.mxu0 %v877_v23  ;;  %1810 = vmatpush1.msra.mxu1 %v883_v24  ;;  %v709_v23 = vld [vmem:[#allocation2 + $0xe58] sm:$0xff] }
 0x139   :  { %1309 = vmatmul.mubr.f32.gmra.mxu0 %v516_v25  ;;  %1514 = vmatmul.mubr.f32.gmra.mxu1 %v518_v26  ;;  %v902_v24 = vld [vmem:[#allocation7 + $0x3c0] sm:$0xff]  ;;  %v706_v25 = vld [vmem:[#allocation2 + $0xe40] sm:$0xff]  ;;  %v708_v26 = vld [vmem:[#allocation2 + $0xe50] sm:$0xff] }
 0x13a   :  { %1313 = vmatprep.mubr.f32.mxu0 %v536_v27  ;;  %1518 = vmatprep.mubr.f32.mxu1 %v538_v28  ;;  %v866_v27 = vld [vmem:[#allocation7 + $0x2a0] sm:$0xff]  ;;  %v901_v28 = vld [vmem:[#allocation7 + $0x3b8] sm:$0xff] }
 0x13b   :  { %1618 = vmatprep.subr.mxu0 %v7352_v0  ;;  %1811 = vmatprep.subr.mxu1 %v7352_v0 }
 0x13c   :  { %1619 = vmatpush2.msra.mxu0 %v876_v29  ;;  %1812 = vmatpush1.msra.mxu1 %v882_v30  ;;  %v726_v29 = vld [vmem:[#allocation2 + $0xee0] sm:$0xff]  ;;  %v728_v30 = vld [vmem:[#allocation2 + $0xef0] sm:$0xff] }
 0x13d   :  { %1314 = vmatmul.mubr.f32.gmra.mxu0 %v535_v31  ;;  %1519 = vmatmul.mubr.f32.gmra.mxu1 %v537_v32  ;;  %v865_v31 = vld [vmem:[#allocation7 + $0x298] sm:$0xff]  ;;  %v900_v32 = vld [vmem:[#allocation7 + $0x3b0] sm:$0xff] }
 0x13e   :  { %1318 = vmatprep.mubr.f32.mxu0 %v555_v33  ;;  %1523 = vmatprep.mubr.f32.mxu1 %v557_v34  ;;  %v725_v33 = vld [vmem:[#allocation2 + $0xed8] sm:$0xff]  ;;  %v727_v34 = vld [vmem:[#allocation2 + $0xee8] sm:$0xff] }
 0x13f   :  { %1620 = vmatprep.subr.mxu0 %v7352_v0  ;;  %1813 = vmatprep.subr.mxu1 %v7352_v0 }
 0x140   :  { %1621 = vmatpush2.msra.mxu0 %v875_v35  ;;  %1814 = vmatpush1.msra.mxu1 %v881_v36  ;;  %v899_v35 = vld [vmem:[#allocation7 + $0x3a8] sm:$0xff]  ;;  %v745_v36 = vld [vmem:[#allocation2 + $0xf78] sm:$0xff] }
 0x141   :  { %1319 = vmatmul.mubr.f32.gmra.mxu0 %v554_v37  ;;  %1524 = vmatmul.mubr.f32.gmra.mxu1 %v556_v38  ;;  %v747_v37 = vld [vmem:[#allocation2 + $0xf88] sm:$0xff] }
 0x142   :  { %1323 = vmatprep.mubr.f32.mxu0 %v574_v39  ;;  %1528 = vmatprep.mubr.f32.mxu1 %v576_v40  ;;  %v864_v38 = vld [vmem:[#allocation7 + $0x290] sm:$0xff]  ;;  %v898_v39 = vld [vmem:[#allocation7 + $0x3a0] sm:$0xff]  ;;  %v744_v40 = vld [vmem:[#allocation2 + $0xf70] sm:$0xff] }
 0x143   :  { %1622 = vmatprep.subr.mxu0 %v7352_v0  ;;  %1815 = vmatprep.subr.mxu1 %v7352_v0 }
 0x144   :  { %1623 = vmatpush2.msra.mxu0 %v874_v41  ;;  %1816 = vmatpush1.msra.mxu1 %v880_v42  ;;  %v746_v41 = vld [vmem:[#allocation2 + $0xf80] sm:$0xff]  ;;  %v897_v42 = vld [vmem:[#allocation7 + $0x398] sm:$0xff] }
 0x145   :  { %1324 = vmatmul.mubr.f32.gmra.mxu0 %v573_v43  ;;  %1529 = vmatmul.mubr.f32.gmra.mxu1 %v575_v44  ;;  %v863_v43 = vld [vmem:[#allocation7 + $0x288] sm:$0xff]  ;;  %v764_v44 = vld [vmem:[#allocation2 + $0x1010] sm:$0xff] }
 0x146   :  { %1624 = vmatprep.subr.mxu0 %v7352_v0  ;;  %1328 = vmatprep.mubr.f32.mxu0 %v593_v45  ;;  %v766_v45 = vld [vmem:[#allocation2 + $0x1020] sm:$0xff] }
 0x147   :  { %1533 = vmatprep.mubr.f32.mxu1 %v595_v46  ;;  %1625 = vmatpush2.msra.mxu0 %v873_v47  ;;  %v896_v46 = vld [vmem:[#allocation7 + $0x390] sm:$0xff] }
 0x148   :  { %1626 = vmatprep.subr.mxu0 %v7352_v0  ;;  %1817 = vmatprep.subr.mxu1 %v7352_v0  ;;  %v763_v47 = vld [vmem:[#allocation2 + $0x1008] sm:$0xff] }
 0x149   :  { %1329 = vmatmul.mubr.f32.gmra.mxu0 %v592_v48  ;;  %1534 = vmatmul.mubr.f32.gmra.mxu1 %v594_v49  ;;  %v765_v48 = vld [vmem:[#allocation2 + $0x1018] sm:$0xff]  ;;  %v895_v49 = vld [vmem:[#allocation7 + $0x388] sm:$0xff] }
 0x14a   :  { %1333 = vmatprep.mubr.f32.mxu0 %v612_v50  ;;  %1538 = vmatprep.mubr.f32.mxu1 %v614_v51  ;;  %v862_v50 = vld [vmem:[#allocation7 + $0x280] sm:$0xff]  ;;  %v255_v51 = vld [vmem:[#allocation2 + $0x28] sm:$0xff] }
 0x14b   :  { %1627 = vmatpush2.msra.mxu0 %v872_v52  ;;  %1818 = vmatpush1.msra.mxu1 %v879_v53  ;;  %v894_v52 = vld [vmem:[#allocation7 + $0x380] sm:$0xff] }
 0x14c   :  { %1628 = vmatprep.subr.mxu0 %v7352_v0  ;;  %1819 = vmatprep.subr.mxu1 %v7352_v0  ;;  %v257_v53 = vld [vmem:[#allocation2 + $0x38] sm:$0xff] }
 0x14d   :  { %1334 = vmatmul.mubr.f32.gmra.mxu0 %v611_v54  ;;  %1539 = vmatmul.mubr.f32.gmra.mxu1 %v613_v55  ;;  %v254_v54 = vld [vmem:[#allocation2 + $0x20] sm:$0xff]  ;;  %v256_v55 = vld [vmem:[#allocation2 + $0x30] sm:$0xff] }
 0x14e   :  { %1629 = vmatpush2.msra.mxu0 %v871_v56  ;;  %1338 = vmatprep.mubr.f32.mxu0 %v631_v57  ;;  %v274_v56 = vld [vmem:[#allocation2 + $0xc0] sm:$0xff]  ;;  %v925_v57 = vld [vmem:[#allocation7 + $0x478] sm:$0xff] }
 0x14f   :  { %1543 = vmatprep.mubr.f32.mxu1 %v633_v58  ;;  %1820 = vmatpush1.msra.mxu1 %v878_v59  ;;  %v276_v58 = vld [vmem:[#allocation2 + $0xd0] sm:$0xff]  ;;  %v273_v59 = vld [vmem:[#allocation2 + $0xb8] sm:$0xff] }
 0x150   :  { %1821 = vmatprep.subr.mxu1 %v7352_v0  ;;  %1630 = vmatprep.subr.mxu0 %v7352_v0 }
 0x151   :  { %1339 = vmatmul.mubr.f32.gmra.mxu0 %v630_v60  ;;  %1544 = vmatmul.mubr.f32.gmra.mxu1 %v632_v61  ;;  %v275_v60 = vld [vmem:[#allocation2 + $0xc8] sm:$0xff] }
 0x152   :  { %1822 = vmatpush2.msra.mxu1 %v909_v62  ;;  %1631 = vmatpush2.msra.mxu0 %v870_v63  ;;  %v924_v61 = vld [vmem:[#allocation7 + $0x470] sm:$0xff]  ;;  %v293_v62 = vld [vmem:[#allocation2 + $0x158] sm:$0xff] }
 0x153   :  { %1823 = vmatprep.subr.mxu1 %v7352_v0  ;;  %1343 = vmatprep.mubr.f32.mxu0 %v650_v1  ;;  %v295_v63 = vld [vmem:[#allocation2 + $0x168] sm:$0xff]  ;;  %v923_v1 = vld [vmem:[#allocation7 + $0x468] sm:$0xff] }
 0x154   :  { %1548 = vmatprep.mubr.f32.mxu1 %v652_v2  ;;  %1824 = vmatpush2.msra.mxu1 %v908_v3  ;;  %v957_v2 = vld [vmem:[#allocation7 + $0x578] sm:$0xff] }
 0x155   :  { %1344 = vmatmul.mubr.f32.gmra.mxu0 %v649_v4  ;;  %1549 = vmatmul.mubr.f32.gmra.mxu1 %v651_v5  ;;  %v292_v3 = vld [vmem:[#allocation2 + $0x150] sm:$0xff]  ;;  %v294_v4 = vld [vmem:[#allocation2 + $0x160] sm:$0xff] }
 0x156   :  { %1632 = vmatprep.subr.mxu0 %v7352_v0  ;;  %1825 = vmatprep.subr.mxu1 %v7352_v0  ;;  %v312_v5 = vld [vmem:[#allocation2 + $0x1f0] sm:$0xff] }
 0x157   :  { %1633 = vmatpush2.msra.mxu0 %v869_v6  ;;  %1826 = vmatpush2.msra.mxu1 %v907_v7  ;;  %v314_v6 = vld [vmem:[#allocation2 + $0x200] sm:$0xff]  ;;  %v922_v7 = vld [vmem:[#allocation7 + $0x460] sm:$0xff] }
 0x158   :  { %1827 = vmatprep.subr.mxu1 %v7352_v0  ;;  %1348 = vmatprep.mubr.f32.mxu0 %v669_v8  ;;  %v956_v8 = vld [vmem:[#allocation7 + $0x570] sm:$0xff] }
 0x159   :  { %1553 = vmatprep.mubr.f32.mxu1 %v671_v9  ;;  %1828 = vmatpush2.msra.mxu1 %v906_v10  ;;  %v311_v9 = vld [vmem:[#allocation2 + $0x1e8] sm:$0xff]  ;;  %v313_v10 = vld [vmem:[#allocation2 + $0x1f8] sm:$0xff] }
 0x15a   :  { %1349 = vmatmul.mubr.f32.gmra.mxu0 %v668_v11  ;;  %1554 = vmatmul.mubr.f32.gmra.mxu1 %v670_v12  ;;  %v331_v11 = vld [vmem:[#allocation2 + $0x288] sm:$0xff]  ;;  %v333_v12 = vld [vmem:[#allocation2 + $0x298] sm:$0xff] }
 0x15b   :  { %1634 = vmatprep.subr.mxu0 %v7352_v0  ;;  %1829 = vmatprep.subr.mxu1 %v7352_v0 }
 0x15c   :  { %1635 = vmatpush2.msra.mxu0 %v868_v13  ;;  %1830 = vmatpush2.msra.mxu1 %v905_v14  ;;  %v921_v13 = vld [vmem:[#allocation7 + $0x458] sm:$0xff]  ;;  %v330_v14 = vld [vmem:[#allocation2 + $0x280] sm:$0xff] }
 0x15d   :  { %1831 = vmatprep.subr.mxu1 %v7352_v0  ;;  %1353 = vmatprep.mubr.f32.mxu0 %v688_v15  ;;  %v332_v15 = vld [vmem:[#allocation2 + $0x290] sm:$0xff] }
 0x15e   :  { %1558 = vmatprep.mubr.f32.mxu1 %v690_v16  ;;  %1636 = vmatprep.subr.mxu0 %v7352_v0  ;;  %v350_v16 = vld [vmem:[#allocation2 + $0x320] sm:$0xff] }
 0x15f   :  { %1832 = vmatpush2.msra.mxu1 %v904_v17  ;;  %1354 = vmatmul.mubr.f32.gmra.mxu0 %v687_v18  ;;  %v352_v17 = vld [vmem:[#allocation2 + $0x330] sm:$0xff]  ;;  %v920_v18 = vld [vmem:[#allocation7 + $0x450] sm:$0xff] }
 0x160   :  { %1559 = vmatmul.mubr.f32.gmra.mxu1 %v689_v19  ;;  %1637 = vmatpush2.msra.mxu0 %v867_v20  ;;  %v955_v19 = vld [vmem:[#allocation7 + $0x568] sm:$0xff]  ;;  %v349_v20 = vld [vmem:[#allocation2 + $0x318] sm:$0xff] }
 0x161   :  { %1833 = vmatprep.subr.mxu1 %v7352_v0  ;;  %1358 = vmatprep.mubr.f32.mxu0 %v707_v21  ;;  %v351_v21 = vld [vmem:[#allocation2 + $0x328] sm:$0xff] }
 0x162   :  { %1834 = vmatpush2.msra.mxu1 %v903_v22  ;;  %1563 = vmatprep.mubr.f32.mxu1 %v709_v23  ;;  %v919_v22 = vld [vmem:[#allocation7 + $0x448] sm:$0xff]  ;;  %v369_v23 = vld [vmem:[#allocation2 + $0x3b8] sm:$0xff] }
 0x163   :  { %1835 = vmatprep.subr.mxu1 %v7352_v0  ;;  %1638 = vmatprep.subr.mxu0 %v7352_v0 }
 0x164   :  { %1836 = vmatpush2.msra.mxu1 %v902_v24  ;;  %1359 = vmatmul.mubr.f32.gmra.mxu0 %v706_v25  ;;  %v371_v24 = vld [vmem:[#allocation2 + $0x3c8] sm:$0xff]  ;;  %v918_v25 = vld [vmem:[#allocation7 + $0x440] sm:$0xff] }
 0x165   :  { %1564 = vmatmul.mubr.f32.gmra.mxu1 %v708_v26  ;;  %1639 = vmatpush2.msra.mxu0 %v866_v27  ;;  %v954_v26 = vld [vmem:[#allocation7 + $0x560] sm:$0xff]  ;;  %v368_v27 = vld [vmem:[#allocation2 + $0x3b0] sm:$0xff] }
 0x166   :  { %1837 = vmatprep.subr.mxu1 %v7352_v0  ;;  %1640 = vmatprep.subr.mxu0 %v7352_v0 }
 0x167   :  { %1838 = vmatpush2.msra.mxu1 %v901_v28  ;;  %1363 = vmatprep.mubr.f32.mxu0 %v726_v29  ;;  %v370_v28 = vld [vmem:[#allocation2 + $0x3c0] sm:$0xff]  ;;  %v388_v29 = vld [vmem:[#allocation2 + $0x450] sm:$0xff] }
 0x168   :  { %1839 = vmatprep.subr.mxu1 %v7352_v0  ;;  %1568 = vmatprep.mubr.f32.mxu1 %v728_v30  ;;  %v390_v30 = vld [vmem:[#allocation2 + $0x460] sm:$0xff] }
 0x169   :  { %1641 = vmatpush2.msra.mxu0 %v865_v31  ;;  %1840 = vmatpush2.msra.mxu1 %v900_v32  ;;  %v917_v31 = vld [vmem:[#allocation7 + $0x438] sm:$0xff] }
 0x16a   :  { %1364 = vmatmul.mubr.f32.gmra.mxu0 %v725_v33  ;;  %1569 = vmatmul.mubr.f32.gmra.mxu1 %v727_v34  ;;  %v953_v32 = vld [vmem:[#allocation7 + $0x558] sm:$0xff]  ;;  %v387_v33 = vld [vmem:[#allocation2 + $0x448] sm:$0xff]  ;;  %v389_v34 = vld [vmem:[#allocation2 + $0x458] sm:$0xff] }
 0x16b   :  { %1841 = vmatprep.subr.mxu1 %v7352_v0  ;;  %1642 = vmatprep.subr.mxu0 %v7352_v0 }
 0x16c   :  { %1842 = vmatpush2.msra.mxu1 %v899_v35  ;;  %1368 = vmatprep.mubr.f32.mxu0 %v745_v36  ;;  %v407_v35 = vld [vmem:[#allocation2 + $0x4e8] sm:$0xff]  ;;  %v409_v36 = vld [vmem:[#allocation2 + $0x4f8] sm:$0xff] }
 0x16d   :  { %1843 = vmatprep.subr.mxu1 %v7352_v0  ;;  %1573 = vmatprep.mubr.f32.mxu1 %v747_v37  ;;  %v916_v37 = vld [vmem:[#allocation7 + $0x430] sm:$0xff] }
 0x16e   :  { %1643 = vmatpush2.msra.mxu0 %v864_v38  ;;  %1844 = vmatpush2.msra.mxu1 %v898_v39  ;;  %v952_v38 = vld [vmem:[#allocation7 + $0x550] sm:$0xff]  ;;  %v406_v39 = vld [vmem:[#allocation2 + $0x4e0] sm:$0xff] }
 0x16f   :  { %1369 = vmatmul.mubr.f32.gmra.mxu0 %v744_v40  ;;  %1574 = vmatmul.mubr.f32.gmra.mxu1 %v746_v41  ;;  %v408_v40 = vld [vmem:[#allocation2 + $0x4f0] sm:$0xff]  ;;  %v426_v41 = vld [vmem:[#allocation2 + $0x580] sm:$0xff] }
 0x170   :  { %1845 = vmatprep.subr.mxu1 %v7352_v0  ;;  %1644 = vmatprep.subr.mxu0 %v7352_v0 }
 0x171   :  { %1846 = vmatpush2.msra.mxu1 %v897_v42  ;;  %1645 = vmatpush2.msra.mxu0 %v863_v43  ;;  %v428_v42 = vld [vmem:[#allocation2 + $0x590] sm:$0xff]  ;;  %v915_v43 = vld [vmem:[#allocation7 + $0x428] sm:$0xff] }
 0x172   :  { %1847 = vmatprep.subr.mxu1 %v7352_v0  ;;  %1373 = vmatprep.mubr.f32.mxu0 %v764_v44  ;;  %v951_v44 = vld [vmem:[#allocation7 + $0x548] sm:$0xff] }
 0x173   :  { %1578 = vmatprep.mubr.f32.mxu1 %v766_v45  ;;  %1848 = vmatpush2.msra.mxu1 %v896_v46  ;;  %v425_v45 = vld [vmem:[#allocation2 + $0x578] sm:$0xff]  ;;  %v427_v46 = vld [vmem:[#allocation2 + $0x588] sm:$0xff] }
 0x174   :  { %1374 = vmatmul.mubr.f32.gmra.mxu0 %v763_v47  ;;  %1579 = vmatmul.mubr.f32.gmra.mxu1 %v765_v48  ;;  %v445_v47 = vld [vmem:[#allocation2 + $0x618] sm:$0xff]  ;;  %v447_v48 = vld [vmem:[#allocation2 + $0x628] sm:$0xff] }
 0x175   :  { %1849 = vmatprep.subr.mxu1 %v7352_v0  ;;  %1646 = vmatprep.subr.mxu0 %v7352_v0 }
 0x176   :  { %1850 = vmatpush2.msra.mxu1 %v895_v49  ;;  %1647 = vmatpush2.msra.mxu0 %v862_v50  ;;  %v914_v49 = vld [vmem:[#allocation7 + $0x420] sm:$0xff] }
 0x177   :  { %1851 = vmatprep.subr.mxu1 %v7352_v0  ;;  %1648 = vmatprep.mubr.f32.mxu0 %v255_v51  ;;  %v950_v50 = vld [vmem:[#allocation7 + $0x540] sm:$0xff]  ;;  %v444_v51 = vld [vmem:[#allocation2 + $0x610] sm:$0xff] }
 0x178   :  { %1852 = vmatpush2.msra.mxu1 %v894_v52  ;;  %1853 = vmatprep.mubr.f32.mxu1 %v257_v53  ;;  %v446_v52 = vld [vmem:[#allocation2 + $0x620] sm:$0xff]  ;;  %v464_v53 = vld [vmem:[#allocation2 + $0x6b0] sm:$0xff] }
 0x179   :  { %1649 = vmatmul.mubr.f32.vlgmr.msra.gmra.mxu0 %v254_v54  ;;  %1854 = vmatmul.mubr.f32.vlgmr.msra.gmra.mxu1 %v256_v55  ;;  %v466_v54 = vld [vmem:[#allocation2 + $0x6c0] sm:$0xff]  ;;  %v913_v55 = vld [vmem:[#allocation7 + $0x418] sm:$0xff] }
 0x17a   :  { %1994 = vmatprep.subr.mxu0 %v7352_v0  ;;  %1653 = vmatprep.mubr.f32.mxu0 %v274_v56  ;;  %v463_v56 = vld [vmem:[#allocation2 + $0x6a8] sm:$0xff] }
 0x17b   :  { %1995 = vmatpush1.msra.mxu0 %v925_v57  ;;  %1858 = vmatprep.mubr.f32.mxu1 %v276_v58  ;;  %v465_v57 = vld [vmem:[#allocation2 + $0x6b8] sm:$0xff]  ;;  %v483_v58 = vld [vmem:[#allocation2 + $0x748] sm:$0xff] }
 0x17c   :  { %1996 = vmatprep.subr.mxu0 %v7352_v0  ;;  %2199 = vmatprep.subr.mxu1 %v7352_v0 }
 0x17d   :  { %1654 = vmatmul.mubr.f32.gmra.mxu0 %v273_v59  ;;  %1859 = vmatmul.mubr.f32.gmra.mxu1 %v275_v60  ;;  %v485_v59 = vld [vmem:[#allocation2 + $0x758] sm:$0xff]  ;;  %v912_v60 = vld [vmem:[#allocation7 + $0x410] sm:$0xff] }
 0x17e   :  { %1997 = vmatpush1.msra.mxu0 %v924_v61  ;;  %1658 = vmatprep.mubr.f32.mxu0 %v293_v62  ;;  %v949_v61 = vld [vmem:[#allocation7 + $0x538] sm:$0xff]  ;;  %v482_v62 = vld [vmem:[#allocation2 + $0x740] sm:$0xff] }
 0x17f   :  { %1863 = vmatprep.mubr.f32.mxu1 %v295_v63  ;;  %1998 = vmatprep.subr.mxu0 %v7352_v0  ;;  %v484_v63 = vld [vmem:[#allocation2 + $0x750] sm:$0xff] }
 0x180   :  { %1999 = vmatpush1.msra.mxu0 %v923_v1  ;;  %2200 = vmatpush1.msra.mxu1 %v957_v2  ;;  %v911_v1 = vld [vmem:[#allocation7 + $0x408] sm:$0xff] }
 0x181   :  { %1659 = vmatmul.mubr.f32.gmra.mxu0 %v292_v3  ;;  %1864 = vmatmul.mubr.f32.gmra.mxu1 %v294_v4  ;;  %v502_v2 = vld [vmem:[#allocation2 + $0x7e0] sm:$0xff]  ;;  %v504_v3 = vld [vmem:[#allocation2 + $0x7f0] sm:$0xff]  ;;  %v910_v4 = vld [vmem:[#allocation7 + $0x400] sm:$0xff] }
 0x182   :  { %1663 = vmatprep.mubr.f32.mxu0 %v312_v5  ;;  %1868 = vmatprep.mubr.f32.mxu1 %v314_v6  ;;  %v948_v5 = vld [vmem:[#allocation7 + $0x530] sm:$0xff]  ;;  %v501_v6 = vld [vmem:[#allocation2 + $0x7d8] sm:$0xff] }
 0x183   :  { %2000 = vmatprep.subr.mxu0 %v7352_v0  ;;  %2201 = vmatprep.subr.mxu1 %v7352_v0 }
 0x184   :  { %2001 = vmatpush1.msra.mxu0 %v922_v7  ;;  %2202 = vmatpush1.msra.mxu1 %v956_v8  ;;  %v503_v7 = vld [vmem:[#allocation2 + $0x7e8] sm:$0xff]  ;;  %v521_v8 = vld [vmem:[#allocation2 + $0x878] sm:$0xff] }
 0x185   :  { %1664 = vmatmul.mubr.f32.gmra.mxu0 %v311_v9  ;;  %1869 = vmatmul.mubr.f32.gmra.mxu1 %v313_v10  ;;  %v523_v9 = vld [vmem:[#allocation2 + $0x888] sm:$0xff]  ;;  %v941_v10 = vld [vmem:[#allocation7 + $0x4f8] sm:$0xff] }
 0x186   :  { %2002 = vmatprep.subr.mxu0 %v7352_v0  ;;  %1668 = vmatprep.mubr.f32.mxu0 %v331_v11  ;;  %v947_v11 = vld [vmem:[#allocation7 + $0x528] sm:$0xff] }
 0x187   :  { %1873 = vmatprep.mubr.f32.mxu1 %v333_v12  ;;  %2003 = vmatpush1.msra.mxu0 %v921_v13  ;;  %v520_v12 = vld [vmem:[#allocation2 + $0x870] sm:$0xff]  ;;  %v522_v13 = vld [vmem:[#allocation2 + $0x880] sm:$0xff] }
 0x188   :  { %2004 = vmatprep.subr.mxu0 %v7352_v0  ;;  %2203 = vmatprep.subr.mxu1 %v7352_v0 }
 0x189   :  { %1669 = vmatmul.mubr.f32.gmra.mxu0 %v330_v14  ;;  %1874 = vmatmul.mubr.f32.gmra.mxu1 %v332_v15  ;;  %v540_v14 = vld [vmem:[#allocation2 + $0x910] sm:$0xff]  ;;  %v542_v15 = vld [vmem:[#allocation2 + $0x920] sm:$0xff] }
 0x18a   :  { %1673 = vmatprep.mubr.f32.mxu0 %v350_v16  ;;  %1878 = vmatprep.mubr.f32.mxu1 %v352_v17  ;;  %v940_v16 = vld [vmem:[#allocation7 + $0x4f0] sm:$0xff]  ;;  %v946_v17 = vld [vmem:[#allocation7 + $0x520] sm:$0xff] }
 0x18b   :  { %2005 = vmatpush1.msra.mxu0 %v920_v18  ;;  %2204 = vmatpush1.msra.mxu1 %v955_v19  ;;  %v539_v18 = vld [vmem:[#allocation2 + $0x908] sm:$0xff]  ;;  %v541_v19 = vld [vmem:[#allocation2 + $0x918] sm:$0xff] }
 0x18c   :  { %2006 = vmatprep.subr.mxu0 %v7352_v0  ;;  %2205 = vmatprep.subr.mxu1 %v7352_v0 }
 0x18d   :  { %1674 = vmatmul.mubr.f32.gmra.mxu0 %v349_v20  ;;  %1879 = vmatmul.mubr.f32.gmra.mxu1 %v351_v21  ;;  %v559_v20 = vld [vmem:[#allocation2 + $0x9a8] sm:$0xff]  ;;  %v561_v21 = vld [vmem:[#allocation2 + $0x9b8] sm:$0xff] }
 0x18e   :  { %2007 = vmatpush1.msra.mxu0 %v919_v22  ;;  %1678 = vmatprep.mubr.f32.mxu0 %v369_v23  ;;  %v939_v22 = vld [vmem:[#allocation7 + $0x4e8] sm:$0xff]  ;;  %v945_v23 = vld [vmem:[#allocation7 + $0x518] sm:$0xff] }
 0x18f   :  { %1883 = vmatprep.mubr.f32.mxu1 %v371_v24  ;;  %2008 = vmatprep.subr.mxu0 %v7352_v0  ;;  %v558_v24 = vld [vmem:[#allocation2 + $0x9a0] sm:$0xff] }
 0x190   :  { %2009 = vmatpush1.msra.mxu0 %v918_v25  ;;  %2206 = vmatpush1.msra.mxu1 %v954_v26  ;;  %v560_v25 = vld [vmem:[#allocation2 + $0x9b0] sm:$0xff]  ;;  %v578_v26 = vld [vmem:[#allocation2 + $0xa40] sm:$0xff] }
 0x191   :  { %1679 = vmatmul.mubr.f32.gmra.mxu0 %v368_v27  ;;  %1884 = vmatmul.mubr.f32.gmra.mxu1 %v370_v28  ;;  %v580_v27 = vld [vmem:[#allocation2 + $0xa50] sm:$0xff]  ;;  %v938_v28 = vld [vmem:[#allocation7 + $0x4e0] sm:$0xff] }
 0x192   :  { %1683 = vmatprep.mubr.f32.mxu0 %v388_v29  ;;  %1888 = vmatprep.mubr.f32.mxu1 %v390_v30  ;;  %v944_v29 = vld [vmem:[#allocation7 + $0x510] sm:$0xff]  ;;  %v577_v30 = vld [vmem:[#allocation2 + $0xa38] sm:$0xff] }
 0x193   :  { %2010 = vmatprep.subr.mxu0 %v7352_v0  ;;  %2207 = vmatprep.subr.mxu1 %v7352_v0 }
 0x194   :  { %2011 = vmatpush1.msra.mxu0 %v917_v31  ;;  %2208 = vmatpush1.msra.mxu1 %v953_v32  ;;  %v579_v31 = vld [vmem:[#allocation2 + $0xa48] sm:$0xff]  ;;  %v597_v32 = vld [vmem:[#allocation2 + $0xad8] sm:$0xff] }
 0x195   :  { %1684 = vmatmul.mubr.f32.gmra.mxu0 %v387_v33  ;;  %1889 = vmatmul.mubr.f32.gmra.mxu1 %v389_v34  ;;  %v599_v33 = vld [vmem:[#allocation2 + $0xae8] sm:$0xff]  ;;  %v937_v34 = vld [vmem:[#allocation7 + $0x4d8] sm:$0xff] }
 0x196   :  { %1688 = vmatprep.mubr.f32.mxu0 %v407_v35  ;;  %1893 = vmatprep.mubr.f32.mxu1 %v409_v36  ;;  %v596_v35 = vld [vmem:[#allocation2 + $0xad0] sm:$0xff]  ;;  %v598_v36 = vld [vmem:[#allocation2 + $0xae0] sm:$0xff] }
 0x197   :  { %2012 = vmatprep.subr.mxu0 %v7352_v0  ;;  %2209 = vmatprep.subr.mxu1 %v7352_v0 }
 0x198   :  { %2013 = vmatpush1.msra.mxu0 %v916_v37  ;;  %2210 = vmatpush1.msra.mxu1 %v952_v38  ;;  %v616_v37 = vld [vmem:[#allocation2 + $0xb70] sm:$0xff]  ;;  %v618_v38 = vld [vmem:[#allocation2 + $0xb80] sm:$0xff] }
 0x199   :  { %1689 = vmatmul.mubr.f32.gmra.mxu0 %v406_v39  ;;  %1894 = vmatmul.mubr.f32.gmra.mxu1 %v408_v40  ;;  %v6139_v39 = vld [vmem:[#allocation9] ss:$0 sm:$0xff]  ;;  %v936_v40 = vld [vmem:[#allocation7 + $0x4d0] sm:$0xff] }
 0x19a   :  { %1693 = vmatprep.mubr.f32.mxu0 %v426_v41  ;;  %1898 = vmatprep.mubr.f32.mxu1 %v428_v42  ;;  %v943_v41 = vld [vmem:[#allocation7 + $0x508] sm:$0xff] }
 0x19b   :  { %2014 = vmatprep.subr.mxu0 %v7352_v0  ;;  %2211 = vmatprep.subr.mxu1 %v7352_v0 }
 0x19c   :  { %2015 = vmatpush1.msra.mxu0 %v915_v43  ;;  %2212 = vmatpush1.msra.mxu1 %v951_v44  ;;  %v615_v44 = vld [vmem:[#allocation2 + $0xb68] sm:$0xff] }
 0x19d   :  { %1694 = vmatmul.mubr.f32.gmra.mxu0 %v425_v45  ;;  %1899 = vmatmul.mubr.f32.gmra.mxu1 %v427_v46  ;;  %v617_v45 = vld [vmem:[#allocation2 + $0xb78] sm:$0xff] }
 0x19e   :  { %1698 = vmatprep.mubr.f32.mxu0 %v445_v47  ;;  %1903 = vmatprep.mubr.f32.mxu1 %v447_v48  ;;  %v935_v47 = vld [vmem:[#allocation7 + $0x4c8] sm:$0xff]  ;;  %v635_v48 = vld [vmem:[#allocation2 + $0xc08] sm:$0xff] }
 0x19f   :  { %2016 = vmatprep.subr.mxu0 %v7352_v0  ;;  %2213 = vmatprep.subr.mxu1 %v7352_v0 }
 0x1a0   :  { %2017 = vmatpush1.msra.mxu0 %v914_v49  ;;  %2214 = vmatpush1.msra.mxu1 %v950_v50 }
 0x1a1   :  { %1699 = vmatmul.mubr.f32.gmra.mxu0 %v444_v51  ;;  %1904 = vmatmul.mubr.f32.gmra.mxu1 %v446_v52  ;;  %v637_v51 = vld [vmem:[#allocation2 + $0xc18] sm:$0xff] }
 0x1a2   :  { %2018 = vmatprep.subr.mxu0 %v7352_v0  ;;  %1703 = vmatprep.mubr.f32.mxu0 %v464_v53  ;;  %v942_v52 = vld [vmem:[#allocation7 + $0x500] sm:$0xff] }
 0x1a3   :  { %1908 = vmatprep.mubr.f32.mxu1 %v466_v54  ;;  %2019 = vmatpush1.msra.mxu0 %v913_v55 }
 0x1a4   :  { %2020 = vmatprep.subr.mxu0 %v7352_v0  ;;  %2215 = vmatprep.subr.mxu1 %v7352_v0 }
 0x1a5   :  { %1704 = vmatmul.mubr.f32.gmra.mxu0 %v463_v56  ;;  %1909 = vmatmul.mubr.f32.gmra.mxu1 %v465_v57  ;;  %v634_v56 = vld [vmem:[#allocation2 + $0xc00] sm:$0xff]  ;;  %v636_v57 = vld [vmem:[#allocation2 + $0xc10] sm:$0xff] }
 0x1a6   :  { %1708 = vmatprep.mubr.f32.mxu0 %v483_v58  ;;  %1913 = vmatprep.mubr.f32.mxu1 %v485_v59  ;;  %v973_v59 = vld [vmem:[#allocation7 + $0x5f8] sm:$0xff] }
 0x1a7   :  { %2021 = vmatpush1.msra.mxu0 %v912_v60  ;;  %2216 = vmatpush1.msra.mxu1 %v949_v61  ;;  %v934_v60 = vld [vmem:[#allocation7 + $0x4c0] sm:$0xff] }
 0x1a8   :  { %2022 = vmatprep.subr.mxu0 %v7352_v0  ;;  %2217 = vmatprep.subr.mxu1 %v7352_v0 }
 0x1a9   :  { %1709 = vmatmul.mubr.f32.gmra.mxu0 %v482_v62  ;;  %1914 = vmatmul.mubr.f32.gmra.mxu1 %v484_v63  ;;  %v654_v63 = vld [vmem:[#allocation2 + $0xca0] sm:$0xff] }
 0x1aa   :  { %2023 = vmatpush1.msra.mxu0 %v911_v1  ;;  %1713 = vmatprep.mubr.f32.mxu0 %v502_v2  ;;  %v656_v2 = vld [vmem:[#allocation2 + $0xcb0] sm:$0xff] }
 0x1ab   :  { %1918 = vmatprep.mubr.f32.mxu1 %v504_v3  ;;  %2024 = vmatprep.subr.mxu0 %v7352_v0  ;;  %v972_v3 = vld [vmem:[#allocation7 + $0x5f0] sm:$0xff] }
 0x1ac   :  { %2025 = vmatpush1.msra.mxu0 %v910_v4  ;;  %2218 = vmatpush1.msra.mxu1 %v948_v5 }
 0x1ad   :  { %1714 = vmatmul.mubr.f32.gmra.mxu0 %v501_v6  ;;  %1919 = vmatmul.mubr.f32.gmra.mxu1 %v503_v7  ;;  %v653_v6 = vld [vmem:[#allocation2 + $0xc98] sm:$0xff]  ;;  %v655_v7 = vld [vmem:[#allocation2 + $0xca8] sm:$0xff] }
 0x1ae   :  { %1718 = vmatprep.mubr.f32.mxu0 %v521_v8  ;;  %1923 = vmatprep.mubr.f32.mxu1 %v523_v9 }
 0x1af   :  { %2026 = vmatprep.subr.mxu0 %v7352_v0  ;;  %2219 = vmatprep.subr.mxu1 %v7352_v0 }
 0x1b0   :  { %2027 = vmatpush2.msra.mxu0 %v941_v10  ;;  %2220 = vmatpush1.msra.mxu1 %v947_v11  ;;  %v933_v11 = vld [vmem:[#allocation7 + $0x4b8] sm:$0xff] }
 0x1b1   :  { %1719 = vmatmul.mubr.f32.gmra.mxu0 %v520_v12  ;;  %1924 = vmatmul.mubr.f32.gmra.mxu1 %v522_v13  ;;  %v971_v12 = vld [vmem:[#allocation7 + $0x5e8] sm:$0xff] }
 0x1b2   :  { %1723 = vmatprep.mubr.f32.mxu0 %v540_v14  ;;  %1928 = vmatprep.mubr.f32.mxu1 %v542_v15  ;;  %v673_v14 = vld [vmem:[#allocation2 + $0xd38] sm:$0xff] }
 0x1b3   :  { %2028 = vmatprep.subr.mxu0 %v7352_v0  ;;  %2221 = vmatprep.subr.mxu1 %v7352_v0 }
 0x1b4   :  { %2029 = vmatpush2.msra.mxu0 %v940_v16  ;;  %2222 = vmatpush1.msra.mxu1 %v946_v17  ;;  %v675_v17 = vld [vmem:[#allocation2 + $0xd48] sm:$0xff] }
 0x1b5   :  { %1724 = vmatmul.mubr.f32.gmra.mxu0 %v539_v18  ;;  %1929 = vmatmul.mubr.f32.gmra.mxu1 %v541_v19  ;;  %v970_v18 = vld [vmem:[#allocation7 + $0x5e0] sm:$0xff] }
 0x1b6   :  { %1728 = vmatprep.mubr.f32.mxu0 %v559_v20  ;;  %1933 = vmatprep.mubr.f32.mxu1 %v561_v21  ;;  %v672_v20 = vld [vmem:[#allocation2 + $0xd30] sm:$0xff]  ;;  %v674_v21 = vld [vmem:[#allocation2 + $0xd40] sm:$0xff] }
 0x1b7   :  { %2030 = vmatprep.subr.mxu0 %v7352_v0  ;;  %2223 = vmatprep.subr.mxu1 %v7352_v0 }
 0x1b8   :  { %2031 = vmatpush2.msra.mxu0 %v939_v22  ;;  %2224 = vmatpush1.msra.mxu1 %v945_v23 }
 0x1b9   :  { %1729 = vmatmul.mubr.f32.gmra.mxu0 %v558_v24  ;;  %1934 = vmatmul.mubr.f32.gmra.mxu1 %v560_v25  ;;  %v932_v25 = vld [vmem:[#allocation7 + $0x4b0] sm:$0xff] }
 0x1ba   :  { %1733 = vmatprep.mubr.f32.mxu0 %v578_v26  ;;  %1938 = vmatprep.mubr.f32.mxu1 %v580_v27  ;;  %v969_v26 = vld [vmem:[#allocation7 + $0x5d8] sm:$0xff] }
 0x1bb   :  { %2032 = vmatprep.subr.mxu0 %v7352_v0  ;;  %2225 = vmatprep.subr.mxu1 %v7352_v0 }
 0x1bc   :  { %2033 = vmatpush2.msra.mxu0 %v938_v28  ;;  %2226 = vmatpush1.msra.mxu1 %v944_v29  ;;  %v692_v29 = vld [vmem:[#allocation2 + $0xdd0] sm:$0xff] }
 0x1bd   :  { %1734 = vmatmul.mubr.f32.gmra.mxu0 %v577_v30  ;;  %1939 = vmatmul.mubr.f32.gmra.mxu1 %v579_v31  ;;  %v694_v31 = vld [vmem:[#allocation2 + $0xde0] sm:$0xff] }
 0x1be   :  { %2034 = vmatprep.subr.mxu0 %v7352_v0  ;;  %1738 = vmatprep.mubr.f32.mxu0 %v597_v32 }
 0x1bf   :  { %1943 = vmatprep.mubr.f32.mxu1 %v599_v33  ;;  %2035 = vmatpush2.msra.mxu0 %v937_v34  ;;  %v968_v34 = vld [vmem:[#allocation7 + $0x5d0] sm:$0xff] }
 0x1c0   :  { %2036 = vmatprep.subr.mxu0 %v7352_v0  ;;  %2227 = vmatprep.subr.mxu1 %v7352_v0 }
 0x1c1   :  { %1739 = vmatmul.mubr.f32.gmra.mxu0 %v596_v35  ;;  %1944 = vmatmul.mubr.f32.gmra.mxu1 %v598_v36  ;;  %v1240_v42 = vpop.f32.mrf.mxu0  ;;  %v1445_v43 = vpop.f32.mrf.mxu1  ;;  %v691_v35 = vld [vmem:[#allocation2 + $0xdc8] sm:$0xff] }
 0x1c2   :  { %1743 = vmatprep.mubr.f32.mxu0 %v616_v37  ;;  %1948 = vmatprep.mubr.f32.mxu1 %v618_v38  ;;  %v1241_v46 = vadd.f32 %v6139_v39, %v1240_v42  ;;  %v693_v37 = vld [vmem:[#allocation2 + $0xdd8] sm:$0xff]  ;;  %v931_v38 = vld [vmem:[#allocation7 + $0x4a8] sm:$0xff]  ;;  %v711_v42 = vld [vmem:[#allocation2 + $0xe68] sm:$0xff] }
 0x1c3   :  { %2037 = vmatpush2.msra.mxu0 %v936_v40  ;;  %2228 = vmatpush1.msra.mxu1 %v943_v41  ;;  %v1242_v49 = vpop.f32.mrf.mxu0  ;;  %v1447_v50 = vpop.f32.mrf.mxu1 }
 0x1c4   :  { %2038 = vmatprep.subr.mxu0 %v7352_v0  ;;  %2229 = vmatprep.subr.mxu1 %v7352_v0  ;;  %v6146_v53 = vadd.f32 %v1445_v43, %v1241_v46  ;;  %v966_v49 = vld [vmem:[#allocation7 + $0x5c0] sm:$0xff]  ;;  %v710_v50 = vld [vmem:[#allocation2 + $0xe60] sm:$0xff] }
 0x1c5   :  { %1744 = vmatmul.mubr.f32.gmra.mxu0 %v615_v44  ;;  %1949 = vmatmul.mubr.f32.gmra.mxu1 %v617_v45  ;;  %v1245_v54 = vpop.f32.mrf.mxu0  ;;  %v1450_v55 = vpop.f32.mrf.mxu1  ;;  %v967_v44 = vld [vmem:[#allocation7 + $0x5c8] sm:$0xff]  ;;  %v713_v45 = vld [vmem:[#allocation2 + $0xe78] sm:$0xff] }
 0x1c6   :  { %2039 = vmatpush2.msra.mxu0 %v935_v47  ;;  %1748 = vmatprep.mubr.f32.mxu0 %v635_v48  ;;  %v1246_v58 = vadd.f32 %v6139_v39, %v1245_v54  ;;  %v712_v54 = vld [vmem:[#allocation2 + $0xe70] sm:$0xff] }
 0x1c7   :  { %1953 = vmatprep.mubr.f32.mxu1 %v637_v51  ;;  %2230 = vmatpush1.msra.mxu1 %v942_v52  ;;  %v1247_v61 = vpop.f32.mrf.mxu0  ;;  %v1452_v62 = vpop.f32.mrf.mxu1 }
 0x1c8   :  { %2231 = vmatprep.subr.mxu1 %v7352_v0  ;;  %2040 = vmatprep.subr.mxu0 %v7352_v0  ;;  %v6151_v1 = vadd.f32 %v1450_v55, %v1246_v58  ;;  %v930_v55 = vld [vmem:[#allocation7 + $0x4a0] sm:$0xff]  ;;  %v732_v62 = vld [vmem:[#allocation2 + $0xf10] sm:$0xff] }
 0x1c9   :  { %1749 = vmatmul.mubr.f32.gmra.mxu0 %v634_v56  ;;  %1954 = vmatmul.mubr.f32.gmra.mxu1 %v636_v57  ;;  %v1250_v4 = vpop.f32.mrf.mxu0  ;;  %v1455_v5 = vpop.f32.mrf.mxu1 }
 0x1ca   :  { %2232 = vmatpush2.msra.mxu1 %v973_v59  ;;  %2041 = vmatpush2.msra.mxu0 %v934_v60  ;;  %v1251_v8 = vadd.f32 %v6139_v39, %v1250_v4  ;;  %v965_v59 = vld [vmem:[#allocation7 + $0x5b8] sm:$0xff]  ;;  %v730_v60 = vld [vmem:[#allocation2 + $0xf00] sm:$0xff]  ;;  %v964_v4 = vld [vmem:[#allocation7 + $0x5b0] sm:$0xff] }
 0x1cb   :  { %2233 = vmatprep.subr.mxu1 %v7352_v0  ;;  %1753 = vmatprep.mubr.f32.mxu0 %v654_v63  ;;  %v1252_v9 = vpop.f32.mrf.mxu0  ;;  %v1457_v10 = vpop.f32.mrf.mxu1 }
 0x1cc   :  { %1958 = vmatprep.mubr.f32.mxu1 %v656_v2  ;;  %2234 = vmatpush2.msra.mxu1 %v972_v3  ;;  %v6155_v13 = vadd.f32 %v1455_v5, %v1251_v8  ;;  %v929_v3 = vld [vmem:[#allocation7 + $0x498] sm:$0xff] }
 0x1cd   :  { %1754 = vmatmul.mubr.f32.gmra.mxu0 %v653_v6  ;;  %1959 = vmatmul.mubr.f32.gmra.mxu1 %v655_v7  ;;  %v1255_v15 = vpop.f32.mrf.mxu0  ;;  %v1460_v16 = vpop.f32.mrf.mxu1  ;;  %v729_v6 = vld [vmem:[#allocation2 + $0xef8] sm:$0xff]  ;;  %v731_v7 = vld [vmem:[#allocation2 + $0xf08] sm:$0xff] }
 0x1ce   :  { %2042 = vmatprep.subr.mxu0 %v7352_v0  ;;  %2235 = vmatprep.subr.mxu1 %v7352_v0  ;;  %v1256_v19 = vadd.f32 %v6139_v39, %v1255_v15 }
 0x1cf   :  { %2043 = vmatpush2.msra.mxu0 %v933_v11  ;;  %2236 = vmatpush2.msra.mxu1 %v971_v12  ;;  %v1257_v22 = vpop.f32.mrf.mxu0  ;;  %v1462_v23 = vpop.f32.mrf.mxu1  ;;  %v963_v11 = vld [vmem:[#allocation7 + $0x5a8] sm:$0xff]  ;;  %v749_v12 = vld [vmem:[#allocation2 + $0xf98] sm:$0xff] }
 0x1d0   :  { %2237 = vmatprep.subr.mxu1 %v7352_v0  ;;  %1758 = vmatprep.mubr.f32.mxu0 %v673_v14  ;;  %v6161_v24 = vadd.f32 %v1460_v16, %v1256_v19  ;;  %v751_v16 = vld [vmem:[#allocation2 + $0xfa8] sm:$0xff]  ;;  %v962_v19 = vld [vmem:[#allocation7 + $0x5a0] sm:$0xff]  ;;  %v748_v22 = vld [vmem:[#allocation2 + $0xf90] sm:$0xff] }
 0x1d1   :  { %1963 = vmatprep.mubr.f32.mxu1 %v675_v17  ;;  %2238 = vmatpush2.msra.mxu1 %v970_v18  ;;  %v1260_v27 = vpop.f32.mrf.mxu0  ;;  %v1465_v28 = vpop.f32.mrf.mxu1  ;;  %v928_v18 = vld [vmem:[#allocation7 + $0x490] sm:$0xff]  ;;  %v750_v23 = vld [vmem:[#allocation2 + $0xfa0] sm:$0xff] }
 0x1d2   :  { %1759 = vmatmul.mubr.f32.gmra.mxu0 %v672_v20  ;;  %1964 = vmatmul.mubr.f32.gmra.mxu1 %v674_v21  ;;  %v1261_v30 = vadd.f32 %v6139_v39, %v1260_v27 }
 0x1d3   :  { %2044 = vmatprep.subr.mxu0 %v7352_v0  ;;  %2239 = vmatprep.subr.mxu1 %v7352_v0  ;;  %v1262_v32 = vpop.f32.mrf.mxu0  ;;  %v1467_v33 = vpop.f32.mrf.mxu1 }
 0x1d4   :  { %2045 = vmatpush2.msra.mxu0 %v932_v25  ;;  %2240 = vmatpush2.msra.mxu1 %v969_v26  ;;  %v6166_v36 = vadd.f32 %v1465_v28, %v1261_v30  ;;  %v961_v28 = vld [vmem:[#allocation7 + $0x598] sm:$0xff] }
 0x1d5   :  { %2241 = vmatprep.subr.mxu1 %v7352_v0  ;;  %1763 = vmatprep.mubr.f32.mxu0 %v692_v29  ;;  %v1265_v40 = vpop.f32.mrf.mxu0  ;;  %v1470_v41 = vpop.f32.mrf.mxu1  ;;  %v927_v29 = vld [vmem:[#allocation7 + $0x488] sm:$0xff] }
 0x1d6   :  { %1968 = vmatprep.mubr.f32.mxu1 %v694_v31  ;;  %2046 = vmatprep.subr.mxu0 %v7352_v0  ;;  %v1266_v43 = vadd.f32 %v6139_v39, %v1265_v40  ;;  %v768_v31 = vld [vmem:[#allocation2 + $0x1030] sm:$0xff]  ;;  %v769_v40 = vld [vmem:[#allocation2 + $0x1038] sm:$0xff] }
 0x1d7   :  { %2242 = vmatpush2.msra.mxu1 %v968_v34  ;;  %1764 = vmatmul.mubr.f32.gmra.mxu0 %v691_v35  ;;  %v1267_v46 = vpop.f32.mrf.mxu0  ;;  %v1472_v47 = vpop.f32.mrf.mxu1  ;;  %v770_v34 = vld [vmem:[#allocation2 + $0x1040] sm:$0xff]  ;;  %v960_v35 = vld [vmem:[#allocation7 + $0x590] sm:$0xff] }
 0x1d8   :  { %1969 = vmatmul.mubr.f32.gmra.mxu1 %v693_v37  ;;  %2047 = vmatpush2.msra.mxu0 %v931_v38  ;;  %v6171_v48 = vadd.f32 %v1470_v41, %v1266_v43  ;;  %v767_v38 = vld [vmem:[#allocation2 + $0x1028] sm:$0xff] }
 0x1d9   :  { %2243 = vmatprep.subr.mxu1 %v7352_v0  ;;  %1768 = vmatprep.mubr.f32.mxu0 %v711_v42  ;;  %v1270_v51 = vpop.f32.mrf.mxu0  ;;  %v1475_v52 = vpop.f32.mrf.mxu1 }
 0x1da   :  { %2244 = vmatpush2.msra.mxu1 %v967_v44  ;;  %1973 = vmatprep.mubr.f32.mxu1 %v713_v45  ;;  %v1271_v56 = vadd.f32 %v6139_v39, %v1270_v51  ;;  %v959_v44 = vld [vmem:[#allocation7 + $0x588] sm:$0xff]  ;;  %v926_v45 = vld [vmem:[#allocation7 + $0x480] sm:$0xff] }
 0x1db   :  { %2245 = vmatprep.subr.mxu1 %v7352_v0  ;;  %2048 = vmatprep.subr.mxu0 %v7352_v0  ;;  %v1272_v57 = vpop.f32.mrf.mxu0  ;;  %v1477_v58 = vpop.f32.mrf.mxu1  ;;  %v958_v51 = vld [vmem:[#allocation7 + $0x580] sm:$0xff] }
 0x1dc   :  { %2246 = vmatpush2.msra.mxu1 %v966_v49  ;;  %1769 = vmatmul.mubr.f32.gmra.mxu0 %v710_v50  ;;  %v6177_v61 = vadd.f32 %v1475_v52, %v1271_v56  ;;  %v259_v49 = vld [vmem:[#allocation2 + $0x48] sm:$0xff]  ;;  %v261_v52 = vld [vmem:[#allocation2 + $0x58] sm:$0xff]  ;;  %v258_v56 = vld [vmem:[#allocation2 + $0x40] sm:$0xff] }
 0x1dd   :  { %1974 = vmatmul.mubr.f32.gmra.mxu1 %v712_v54  ;;  %2049 = vmatpush2.msra.mxu0 %v930_v55  ;;  %v1275_v63 = vpop.f32.mrf.mxu0  ;;  %v1480_v2 = vpop.f32.mrf.mxu1  ;;  %v260_v57 = vld [vmem:[#allocation2 + $0x50] sm:$0xff] }
 0x1de   :  { %2247 = vmatprep.subr.mxu1 %v7352_v0  ;;  %2050 = vmatprep.subr.mxu0 %v7352_v0  ;;  %v1276_v5 = vadd.f32 %v6139_v39, %v1275_v63  ;;  %v989_v63 = vld [vmem:[#allocation7 + $0x678] sm:$0xff] }
 0x1df   :  { %2248 = vmatpush2.msra.mxu1 %v965_v59  ;;  %1773 = vmatprep.mubr.f32.mxu0 %v730_v60  ;;  %v1277_v8 = vpop.f32.mrf.mxu0  ;;  %v1482_v9 = vpop.f32.mrf.mxu1  ;;  %v278_v59 = vld [vmem:[#allocation2 + $0xe0] sm:$0xff] }
 0x1e0   :  { %2249 = vmatprep.subr.mxu1 %v7352_v0  ;;  %1978 = vmatprep.mubr.f32.mxu1 %v732_v62  ;;  %v6183_v10 = vadd.f32 %v1480_v2, %v1276_v5  ;;  %v280_v2 = vld [vmem:[#allocation2 + $0xf0] sm:$0xff]  ;;  %v988_v9 = vld [vmem:[#allocation7 + $0x670] sm:$0xff] }
 0x1e1   :  { %2051 = vmatpush2.msra.mxu0 %v929_v3  ;;  %2250 = vmatpush2.msra.mxu1 %v964_v4  ;;  %v1280_v14 = vpop.f32.mrf.mxu0  ;;  %v1485_v15 = vpop.f32.mrf.mxu1 }
 0x1e2   :  { %1774 = vmatmul.mubr.f32.gmra.mxu0 %v729_v6  ;;  %1979 = vmatmul.mubr.f32.gmra.mxu1 %v731_v7  ;;  %v1281_v17 = vadd.f32 %v6139_v39, %v1280_v14  ;;  %v277_v6 = vld [vmem:[#allocation2 + $0xd8] sm:$0xff]  ;;  %v279_v7 = vld [vmem:[#allocation2 + $0xe8] sm:$0xff] }
 0x1e3   :  { %2251 = vmatprep.subr.mxu1 %v7352_v0  ;;  %2052 = vmatprep.subr.mxu0 %v7352_v0  ;;  %v1282_v20 = vpop.f32.mrf.mxu0  ;;  %v1487_v21 = vpop.f32.mrf.mxu1 }
 0x1e4   :  { %2252 = vmatpush2.msra.mxu1 %v963_v11  ;;  %1778 = vmatprep.mubr.f32.mxu0 %v749_v12  ;;  %v6188_v25 = vadd.f32 %v1485_v15, %v1281_v17  ;;  %v297_v11 = vld [vmem:[#allocation2 + $0x178] sm:$0xff]  ;;  %v299_v15 = vld [vmem:[#allocation2 + $0x188] sm:$0xff]  ;;  %v987_v17 = vld [vmem:[#allocation7 + $0x668] sm:$0xff] }
 0x1e5   :  { %2253 = vmatprep.subr.mxu1 %v7352_v0  ;;  %1983 = vmatprep.mubr.f32.mxu1 %v751_v16  ;;  %v1285_v26 = vpop.f32.mrf.mxu0  ;;  %v1490_v27 = vpop.f32.mrf.mxu1  ;;  %v1021_v20 = vld [vmem:[#allocation7 + $0x778] sm:$0xff] }
 0x1e6   :  { %2053 = vmatpush2.msra.mxu0 %v928_v18  ;;  %2254 = vmatpush2.msra.mxu1 %v962_v19  ;;  %v1286_v30 = vadd.f32 %v6139_v39, %v1285_v26  ;;  %v296_v21 = vld [vmem:[#allocation2 + $0x170] sm:$0xff] }
 0x1e7   :  { %1779 = vmatmul.mubr.f32.gmra.mxu0 %v748_v22  ;;  %1984 = vmatmul.mubr.f32.gmra.mxu1 %v750_v23  ;;  %v1287_v32 = vpop.f32.mrf.mxu0  ;;  %v1492_v33 = vpop.f32.mrf.mxu1  ;;  %v298_v22 = vld [vmem:[#allocation2 + $0x180] sm:$0xff]  ;;  %v316_v26 = vld [vmem:[#allocation2 + $0x210] sm:$0xff] }
 0x1e8   :  { %2255 = vmatprep.subr.mxu1 %v7352_v0  ;;  %2054 = vmatprep.subr.mxu0 %v7352_v0  ;;  %v6194_v37 = vadd.f32 %v1490_v27, %v1286_v30  ;;  %v318_v27 = vld [vmem:[#allocation2 + $0x220] sm:$0xff] }
 0x1e9   :  { %2256 = vmatpush2.msra.mxu1 %v961_v28  ;;  %2055 = vmatpush2.msra.mxu0 %v927_v29  ;;  %v1290_v41 = vpop.f32.mrf.mxu0  ;;  %v1495_v42 = vpop.f32.mrf.mxu1 }
 0x1ea   :  { %2257 = vmatprep.subr.mxu1 %v7352_v0  ;;  %1783 = vmatprep.mubr.f32.mxu0 %v768_v31  ;;  %v1291_v43 = vadd.f32 %v6139_v39, %v1290_v41  ;;  %v986_v31 = vld [vmem:[#allocation7 + $0x660] sm:$0xff]  ;;  %v335_v41 = vld [vmem:[#allocation2 + $0x2a8] sm:$0xff] }
 0x1eb   :  { %1988 = vmatprep.mubr.f32.mxu1 %v770_v34  ;;  %2258 = vmatpush2.msra.mxu1 %v960_v35  ;;  %v1292_v46 = vpop.f32.mrf.mxu0  ;;  %v1497_v47 = vpop.f32.mrf.mxu1  ;;  %v1020_v34 = vld [vmem:[#allocation7 + $0x770] sm:$0xff] }
 0x1ec   :  { %1784 = vmatmul.mubr.f32.gmra.mxu0 %v767_v38  ;;  %1989 = vmatmul.mubr.f32.gmra.mxu1 %v769_v40  ;;  %v6198_v50 = vadd.f32 %v1495_v42, %v1291_v43  ;;  %v315_v35 = vld [vmem:[#allocation2 + $0x208] sm:$0xff]  ;;  %v317_v38 = vld [vmem:[#allocation2 + $0x218] sm:$0xff] }
 0x1ed   :  { %2259 = vmatprep.subr.mxu1 %v7352_v0  ;;  %2056 = vmatprep.subr.mxu0 %v7352_v0  ;;  %v1295_v54 = vpop.f32.mrf.mxu0  ;;  %v1500_v55 = vpop.f32.mrf.mxu1 }
 0x1ee   :  { %2260 = vmatpush2.msra.mxu1 %v959_v44  ;;  %2057 = vmatpush2.msra.mxu0 %v926_v45  ;;  %v1296_v58 = vadd.f32 %v6139_v39, %v1295_v54  ;;  %v337_v44 = vld [vmem:[#allocation2 + $0x2b8] sm:$0xff]  ;;  %v985_v45 = vld [vmem:[#allocation7 + $0x658] sm:$0xff] }
 0x1ef   :  { %2261 = vmatprep.subr.mxu1 %v7352_v0  ;;  %2058 = vmatprep.mubr.f32.mxu0 %v259_v49  ;;  %v1297_v60 = vpop.f32.mrf.mxu0  ;;  %v1502_v62 = vpop.f32.mrf.mxu1 }
 0x1f0   :  { %2262 = vmatpush2.msra.mxu1 %v958_v51  ;;  %2263 = vmatprep.mubr.f32.mxu1 %v261_v52  ;;  %v6204_v3 = vadd.f32 %v1500_v55, %v1296_v58  ;;  %v334_v51 = vld [vmem:[#allocation2 + $0x2a0] sm:$0xff]  ;;  %v336_v52 = vld [vmem:[#allocation2 + $0x2b0] sm:$0xff] }
 0x1f1   :  { %2059 = vmatmul.mubr.f32.vlgmr.msra.gmra.mxu0 %v258_v56  ;;  %2264 = vmatmul.mubr.f32.vlgmr.msra.gmra.mxu1 %v260_v57  ;;  %v1300_v4 = vpop.f32.mrf.mxu0  ;;  %v1505_v5 = vpop.f32.mrf.mxu1  ;;  %v354_v55 = vld [vmem:[#allocation2 + $0x340] sm:$0xff]  ;;  %v356_v56 = vld [vmem:[#allocation2 + $0x350] sm:$0xff] }
 0x1f2   :  { %2404 = vmatprep.subr.mxu0 %v7352_v0  ;;  %2063 = vmatprep.mubr.f32.mxu0 %v278_v59  ;;  %v1301_v8 = vadd.f32 %v6139_v39, %v1300_v4  ;;  %v984_v59 = vld [vmem:[#allocation7 + $0x650] sm:$0xff]  ;;  %v1019_v62 = vld [vmem:[#allocation7 + $0x768] sm:$0xff]  ;;  %v353_v4 = vld [vmem:[#allocation2 + $0x338] sm:$0xff] }
 0x1f3   :  { %2405 = vmatpush1.msra.mxu0 %v989_v63  ;;  %2268 = vmatprep.mubr.f32.mxu1 %v280_v2  ;;  %v1302_v12 = vpop.f32.mrf.mxu0  ;;  %v1507_v14 = vpop.f32.mrf.mxu1 }
 0x1f4   :  { %2406 = vmatprep.subr.mxu0 %v7352_v0  ;;  %v6209_v16 = vadd.f32 %v1505_v5, %v1301_v8  ;;  %2609 = vmatprep.subr.mxu1 %v7352_v0  ;;  %v355_v5 = vld [vmem:[#allocation2 + $0x348] sm:$0xff]  ;;  %v373_v8 = vld [vmem:[#allocation2 + $0x3d8] sm:$0xff] }
 0x1f5   :  { %2064 = vmatmul.mubr.f32.gmra.mxu0 %v277_v6  ;;  %2269 = vmatmul.mubr.f32.gmra.mxu1 %v279_v7  ;;  %v1305_v18 = vpop.f32.mrf.mxu0  ;;  %v1510_v19 = vpop.f32.mrf.mxu1  ;;  %v983_v7 = vld [vmem:[#allocation7 + $0x648] sm:$0xff]  ;;  %v375_v12 = vld [vmem:[#allocation2 + $0x3e8] sm:$0xff] }
 0x1f6   :  { %2407 = vmatpush1.msra.mxu0 %v988_v9  ;;  %2068 = vmatprep.mubr.f32.mxu0 %v297_v11  ;;  %v1306_v23 = vadd.f32 %v6139_v39, %v1305_v18 }
 0x1f7   :  { %2273 = vmatprep.mubr.f32.mxu1 %v299_v15  ;;  %2408 = vmatprep.subr.mxu0 %v7352_v0  ;;  %v1307_v28 = vpop.f32.mrf.mxu0  ;;  %v1512_v29 = vpop.f32.mrf.mxu1  ;;  %v982_v15 = vld [vmem:[#allocation7 + $0x640] sm:$0xff] }
 0x1f8   :  { %2409 = vmatpush1.msra.mxu0 %v987_v17  ;;  %v6214_v30 = vadd.f32 %v1510_v19, %v1306_v23  ;;  %2610 = vmatpush1.msra.mxu1 %v1021_v20  ;;  %v1018_v19 = vld [vmem:[#allocation7 + $0x760] sm:$0xff]  ;;  %v372_v20 = vld [vmem:[#allocation2 + $0x3d0] sm:$0xff] }
 0x1f9   :  { %2069 = vmatmul.mubr.f32.gmra.mxu0 %v296_v21  ;;  %2274 = vmatmul.mubr.f32.gmra.mxu1 %v298_v22  ;;  %v1310_v32 = vpop.f32.mrf.mxu0  ;;  %v1515_v33 = vpop.f32.mrf.mxu1  ;;  %v374_v21 = vld [vmem:[#allocation2 + $0x3e0] sm:$0xff]  ;;  %v392_v23 = vld [vmem:[#allocation2 + $0x470] sm:$0xff] }
 0x1fa   :  { %2073 = vmatprep.mubr.f32.mxu0 %v316_v26  ;;  %2278 = vmatprep.mubr.f32.mxu1 %v318_v27  ;;  %v1311_v40 = vadd.f32 %v6139_v39, %v1310_v32  ;;  %v394_v26 = vld [vmem:[#allocation2 + $0x480] sm:$0xff] }
 0x1fb   :  { %2410 = vmatprep.subr.mxu0 %v7352_v0  ;;  %v1312_v42 = vpop.f32.mrf.mxu0  ;;  %v1517_v43 = vpop.f32.mrf.mxu1  ;;  %2611 = vmatprep.subr.mxu1 %v7352_v0 }
 0x1fc   :  { %2411 = vmatpush1.msra.mxu0 %v986_v31  ;;  %v6219_v46 = vadd.f32 %v1515_v33, %v1311_v40  ;;  %2612 = vmatpush1.msra.mxu1 %v1020_v34  ;;  %v981_v31 = vld [vmem:[#allocation7 + $0x638] sm:$0xff]  ;;  %v413_v42 = vld [vmem:[#allocation2 + $0x518] sm:$0xff] }
 0x1fd   :  { %2074 = vmatmul.mubr.f32.gmra.mxu0 %v315_v35  ;;  %2279 = vmatmul.mubr.f32.gmra.mxu1 %v317_v38  ;;  %v1315_v47 = vpop.f32.mrf.mxu0  ;;  %v1520_v49 = vpop.f32.mrf.mxu1  ;;  %v1017_v34 = vld [vmem:[#allocation7 + $0x758] sm:$0xff]  ;;  %v391_v35 = vld [vmem:[#allocation2 + $0x468] sm:$0xff]  ;;  %v393_v38 = vld [vmem:[#allocation2 + $0x478] sm:$0xff] }
 0x1fe   :  { %2412 = vmatprep.subr.mxu0 %v7352_v0  ;;  %2078 = vmatprep.mubr.f32.mxu0 %v335_v41  ;;  %v1316_v54 = vadd.f32 %v6139_v39, %v1315_v47  ;;  %v411_v41 = vld [vmem:[#allocation2 + $0x508] sm:$0xff] }
 0x1ff   :  { %2283 = vmatprep.mubr.f32.mxu1 %v337_v44  ;;  %2413 = vmatpush1.msra.mxu0 %v985_v45  ;;  %v1317_v57 = vpop.f32.mrf.mxu0  ;;  %v1522_v58 = vpop.f32.mrf.mxu1  ;;  %v980_v47 = vld [vmem:[#allocation7 + $0x630] sm:$0xff] }
 0x200   :  { %2414 = vmatprep.subr.mxu0 %v7352_v0  ;;  %v6224_v60 = vadd.f32 %v1520_v49, %v1316_v54  ;;  %2613 = vmatprep.subr.mxu1 %v7352_v0  ;;  %v410_v54 = vld [vmem:[#allocation2 + $0x500] sm:$0xff]  ;;  %v432_v58 = vld [vmem:[#allocation2 + $0x5b0] sm:$0xff] }
 0x201   :  { %2079 = vmatmul.mubr.f32.gmra.mxu0 %v334_v51  ;;  %2284 = vmatmul.mubr.f32.gmra.mxu1 %v336_v52  ;;  %v1320_v63 = vpop.f32.mrf.mxu0  ;;  %v1525_v2 = vpop.f32.mrf.mxu1  ;;  %v1016_v52 = vld [vmem:[#allocation7 + $0x750] sm:$0xff]  ;;  %v430_v57 = vld [vmem:[#allocation2 + $0x5a0] sm:$0xff] }
 0x202   :  { %2083 = vmatprep.mubr.f32.mxu0 %v354_v55  ;;  %2288 = vmatprep.mubr.f32.mxu1 %v356_v56  ;;  %v1321_v6 = vadd.f32 %v6139_v39, %v1320_v63  ;;  %v412_v55 = vld [vmem:[#allocation2 + $0x510] sm:$0xff] }
 0x203   :  { %2415 = vmatpush1.msra.mxu0 %v984_v59  ;;  %v1322_v9 = vpop.f32.mrf.mxu0  ;;  %v1527_v11 = vpop.f32.mrf.mxu1  ;;  %2614 = vmatpush1.msra.mxu1 %v1019_v62 }
 0x204   :  { %2416 = vmatprep.subr.mxu0 %v7352_v0  ;;  %v6229_v14 = vadd.f32 %v1525_v2, %v1321_v6  ;;  %2615 = vmatprep.subr.mxu1 %v7352_v0  ;;  %v979_v2 = vld [vmem:[#allocation7 + $0x628] sm:$0xff]  ;;  %v449_v11 = vld [vmem:[#allocation2 + $0x638] sm:$0xff] }
 0x205   :  { %2084 = vmatmul.mubr.f32.gmra.mxu0 %v353_v4  ;;  %2289 = vmatmul.mubr.f32.gmra.mxu1 %v355_v5  ;;  %v1325_v17 = vpop.f32.mrf.mxu0  ;;  %v1530_v18 = vpop.f32.mrf.mxu1  ;;  %v1015_v6 = vld [vmem:[#allocation7 + $0x748] sm:$0xff] }
 0x206   :  { %2417 = vmatpush1.msra.mxu0 %v983_v7  ;;  %2088 = vmatprep.mubr.f32.mxu0 %v373_v8  ;;  %v1326_v22 = vadd.f32 %v6139_v39, %v1325_v17  ;;  %v429_v7 = vld [vmem:[#allocation2 + $0x598] sm:$0xff]  ;;  %v431_v8 = vld [vmem:[#allocation2 + $0x5a8] sm:$0xff] }
 0x207   :  { %2293 = vmatprep.mubr.f32.mxu1 %v375_v12  ;;  %2418 = vmatprep.subr.mxu0 %v7352_v0  ;;  %v1327_v27 = vpop.f32.mrf.mxu0  ;;  %v1532_v28 = vpop.f32.mrf.mxu1  ;;  %v451_v12 = vld [vmem:[#allocation2 + $0x648] sm:$0xff] }
 0x208   :  { %2419 = vmatpush1.msra.mxu0 %v982_v15  ;;  %v6234_v29 = vadd.f32 %v1530_v18, %v1326_v22  ;;  %2616 = vmatpush1.msra.mxu1 %v1018_v19  ;;  %v978_v19 = vld [vmem:[#allocation7 + $0x620] sm:$0xff]  ;;  %v468_v28 = vld [vmem:[#allocation2 + $0x6d0] sm:$0xff] }
 0x209   :  { %2089 = vmatmul.mubr.f32.gmra.mxu0 %v372_v20  ;;  %2294 = vmatmul.mubr.f32.gmra.mxu1 %v374_v21  ;;  %v1330_v32 = vpop.f32.mrf.mxu0  ;;  %v1535_v33 = vpop.f32.mrf.mxu1  ;;  %v1014_v22 = vld [vmem:[#allocation7 + $0x740] sm:$0xff] }
 0x20a   :  { %2093 = vmatprep.mubr.f32.mxu0 %v392_v23  ;;  %2298 = vmatprep.mubr.f32.mxu1 %v394_v26  ;;  %v1331_v40 = vadd.f32 %v6139_v39, %v1330_v32  ;;  %v448_v23 = vld [vmem:[#allocation2 + $0x630] sm:$0xff]  ;;  %v450_v26 = vld [vmem:[#allocation2 + $0x640] sm:$0xff] }
 0x20b   :  { %2420 = vmatprep.subr.mxu0 %v7352_v0  ;;  %v1332_v43 = vpop.f32.mrf.mxu0  ;;  %v1537_v44 = vpop.f32.mrf.mxu1  ;;  %2617 = vmatprep.subr.mxu1 %v7352_v0 }
 0x20c   :  { %2421 = vmatpush1.msra.mxu0 %v981_v31  ;;  %v6239_v45 = vadd.f32 %v1535_v33, %v1331_v40  ;;  %2618 = vmatpush1.msra.mxu1 %v1017_v34  ;;  %v470_v33 = vld [vmem:[#allocation2 + $0x6e0] sm:$0xff]  ;;  %v977_v34 = vld [vmem:[#allocation7 + $0x618] sm:$0xff]  ;;  %v469_v40 = vld [vmem:[#allocation2 + $0x6d8] sm:$0xff] }
 0x20d   :  { %2094 = vmatmul.mubr.f32.gmra.mxu0 %v391_v35  ;;  %2299 = vmatmul.mubr.f32.gmra.mxu1 %v393_v38  ;;  %v1335_v49 = vpop.f32.mrf.mxu0  ;;  %v1540_v51 = vpop.f32.mrf.mxu1  ;;  %v467_v38 = vld [vmem:[#allocation2 + $0x6c8] sm:$0xff]  ;;  %v489_v44 = vld [vmem:[#allocation2 + $0x778] sm:$0xff] }
 0x20e   :  { %2098 = vmatprep.mubr.f32.mxu0 %v411_v41  ;;  %2303 = vmatprep.mubr.f32.mxu1 %v413_v42  ;;  %v1336_v56 = vadd.f32 %v6139_v39, %v1335_v49  ;;  %v487_v43 = vld [vmem:[#allocation2 + $0x768] sm:$0xff] }
 0x20f   :  { %2422 = vmatprep.subr.mxu0 %v7352_v0  ;;  %v1337_v59 = vpop.f32.mrf.mxu0  ;;  %v1542_v62 = vpop.f32.mrf.mxu1  ;;  %2619 = vmatprep.subr.mxu1 %v7352_v0  ;;  %v976_v49 = vld [vmem:[#allocation7 + $0x610] sm:$0xff] }
 0x210   :  { %2423 = vmatpush1.msra.mxu0 %v980_v47  ;;  %v6244_v63 = vadd.f32 %v1540_v51, %v1336_v56  ;;  %2620 = vmatpush1.msra.mxu1 %v1016_v52  ;;  %v486_v56 = vld [vmem:[#allocation2 + $0x760] sm:$0xff] }
 0x211   :  { %2099 = vmatmul.mubr.f32.gmra.mxu0 %v410_v54  ;;  %2304 = vmatmul.mubr.f32.gmra.mxu1 %v412_v55  ;;  %v1340_v4 = vpop.f32.mrf.mxu0  ;;  %v1545_v5 = vpop.f32.mrf.mxu1  ;;  %v1013_v54 = vld [vmem:[#allocation7 + $0x738] sm:$0xff]  ;;  %v506_v59 = vld [vmem:[#allocation2 + $0x800] sm:$0xff] }
 0x212   :  { %2103 = vmatprep.mubr.f32.mxu0 %v430_v57  ;;  %2308 = vmatprep.mubr.f32.mxu1 %v432_v58  ;;  %v1341_v9 = vadd.f32 %v6139_v39, %v1340_v4  ;;  %v488_v57 = vld [vmem:[#allocation2 + $0x770] sm:$0xff]  ;;  %v975_v58 = vld [vmem:[#allocation7 + $0x608] sm:$0xff] }
 0x213   :  { %2424 = vmatprep.subr.mxu0 %v7352_v0  ;;  %v1342_v15 = vpop.f32.mrf.mxu0  ;;  %v1547_v17 = vpop.f32.mrf.mxu1  ;;  %2621 = vmatprep.subr.mxu1 %v7352_v0 }
 0x214   :  { %2425 = vmatpush1.msra.mxu0 %v979_v2  ;;  %v6249_v18 = vadd.f32 %v1545_v5, %v1341_v9  ;;  %2622 = vmatpush1.msra.mxu1 %v1015_v6  ;;  %v508_v2 = vld [vmem:[#allocation2 + $0x810] sm:$0xff]  ;;  %v974_v6 = vld [vmem:[#allocation7 + $0x600] sm:$0xff] }
 0x215   :  { %2104 = vmatmul.mubr.f32.gmra.mxu0 %v429_v7  ;;  %2309 = vmatmul.mubr.f32.gmra.mxu1 %v431_v8  ;;  %v1345_v20 = vpop.f32.mrf.mxu0  ;;  %v1550_v21 = vpop.f32.mrf.mxu1  ;;  %v1012_v8 = vld [vmem:[#allocation7 + $0x730] sm:$0xff]  ;;  %v505_v9 = vld [vmem:[#allocation2 + $0x7f8] sm:$0xff] }
 0x216   :  { %2108 = vmatprep.mubr.f32.mxu0 %v449_v11  ;;  %2313 = vmatprep.mubr.f32.mxu1 %v451_v12  ;;  %v1346_v27 = vadd.f32 %v6139_v39, %v1345_v20  ;;  %v507_v11 = vld [vmem:[#allocation2 + $0x808] sm:$0xff]  ;;  %v525_v17 = vld [vmem:[#allocation2 + $0x898] sm:$0xff] }
 0x217   :  { %2426 = vmatprep.subr.mxu0 %v7352_v0  ;;  %v1347_v31 = vpop.f32.mrf.mxu0  ;;  %v1552_v32 = vpop.f32.mrf.mxu1  ;;  %2623 = vmatprep.subr.mxu1 %v7352_v0 }
 0x218   :  { %2427 = vmatpush1.msra.mxu0 %v978_v19  ;;  %v6254_v35 = vadd.f32 %v1550_v21, %v1346_v27  ;;  %2624 = vmatpush1.msra.mxu1 %v1014_v22  ;;  %v527_v19 = vld [vmem:[#allocation2 + $0x8a8] sm:$0xff]  ;;  %v1005_v21 = vld [vmem:[#allocation7 + $0x6f8] sm:$0xff] }
 0x219   :  { %2109 = vmatmul.mubr.f32.gmra.mxu0 %v448_v23  ;;  %2314 = vmatmul.mubr.f32.gmra.mxu1 %v450_v26  ;;  %v1011_v26 = vld [vmem:[#allocation7 + $0x728] sm:$0xff]  ;;  %v524_v27 = vld [vmem:[#allocation2 + $0x890] sm:$0xff] }
 0x21a   :  { %2428 = vmatprep.subr.mxu0 %v7352_v0  ;;  %2113 = vmatprep.mubr.f32.mxu0 %v468_v28  ;;  %v1350_v41 = vpop.f32.mrf.mxu0  ;;  %v1555_v42 = vpop.f32.mrf.mxu1  ;;  %v526_v28 = vld [vmem:[#allocation2 + $0x8a0] sm:$0xff]  ;;  %v544_v32 = vld [vmem:[#allocation2 + $0x930] sm:$0xff] }
 0x21b   :  { %2318 = vmatprep.mubr.f32.mxu1 %v470_v33  ;;  %2429 = vmatpush1.msra.mxu0 %v977_v34  ;;  %v1351_v47 = vadd.f32 %v6139_v39, %v1350_v41  ;;  %v546_v33 = vld [vmem:[#allocation2 + $0x940] sm:$0xff]  ;;  %v543_v41 = vld [vmem:[#allocation2 + $0x928] sm:$0xff] }
 0x21c   :  { %2430 = vmatprep.subr.mxu0 %v7352_v0  ;;  %v1352_v51 = vpop.f32.mrf.mxu0  ;;  %v1557_v52 = vpop.f32.mrf.mxu1  ;;  %2625 = vmatprep.subr.mxu1 %v7352_v0 }
 0x21d   :  { %2114 = vmatmul.mubr.f32.gmra.mxu0 %v467_v38  ;;  %2319 = vmatmul.mubr.f32.gmra.mxu1 %v469_v40  ;;  %v6260_v55 = vadd.f32 %v1555_v42, %v1351_v47  ;;  %v1010_v40 = vld [vmem:[#allocation7 + $0x720] sm:$0xff]  ;;  %v563_v47 = vld [vmem:[#allocation2 + $0x9c8] sm:$0xff] }
 0x21e   :  { %2118 = vmatprep.mubr.f32.mxu0 %v487_v43  ;;  %2323 = vmatprep.mubr.f32.mxu1 %v489_v44  ;;  %v545_v42 = vld [vmem:[#allocation2 + $0x938] sm:$0xff] }
 0x21f   :  { %2431 = vmatpush1.msra.mxu0 %v976_v49  ;;  %v1355_v62 = vpop.f32.mrf.mxu0  ;;  %2626 = vmatpush1.msra.mxu1 %v1013_v54  ;;  %v565_v49 = vld [vmem:[#allocation2 + $0x9d8] sm:$0xff] }
 0x220   :  { %2432 = vmatprep.subr.mxu0 %v7352_v0  ;;  %v1356_v4 = vadd.f32 %v6139_v39, %v1355_v62  ;;  %v1560_v5 = vpop.f32.mrf.mxu1  ;;  %2627 = vmatprep.subr.mxu1 %v7352_v0  ;;  %v5474_v51 = vld [vmem:[#allocation9] ss:$0 sm:$0xff]  ;;  %v562_v62 = vld [vmem:[#allocation2 + $0x9c0] sm:$0xff] }
 0x221   :  { %2119 = vmatmul.mubr.f32.gmra.mxu0 %v486_v56  ;;  %2324 = vmatmul.mubr.f32.gmra.mxu1 %v488_v57  ;;  %v1357_v7 = vpop.f32.mrf.mxu0  ;;  %v1003_v57 = vld [vmem:[#allocation7 + $0x6e8] sm:$0xff] }
 0x222   :  { %2433 = vmatpush1.msra.mxu0 %v975_v58  ;;  %2123 = vmatprep.mubr.f32.mxu0 %v506_v59  ;;  %v6265_v12 = vadd.f32 %v1560_v5, %v1356_v4  ;;  %v1562_v15 = vpop.f32.mrf.mxu1  ;;  %v1009_v59 = vld [vmem:[#allocation7 + $0x718] sm:$0xff]  ;;  %v582_v4 = vld [vmem:[#allocation2 + $0xa60] sm:$0xff] }
 0x223   :  { %2328 = vmatprep.mubr.f32.mxu1 %v508_v2  ;;  %2434 = vmatprep.subr.mxu0 %v7352_v0  ;;  %v564_v2 = vld [vmem:[#allocation2 + $0x9d0] sm:$0xff] }
 0x224   :  { %2435 = vmatpush1.msra.mxu0 %v974_v6  ;;  %v1360_v20 = vpop.f32.mrf.mxu0  ;;  %2628 = vmatpush1.msra.mxu1 %v1012_v8  ;;  %v584_v5 = vld [vmem:[#allocation2 + $0xa70] sm:$0xff] }
 0x225   :  { %2124 = vmatmul.mubr.f32.gmra.mxu0 %v505_v9  ;;  %2329 = vmatmul.mubr.f32.gmra.mxu1 %v507_v11  ;;  %v1361_v22 = vadd.f32 %v6139_v39, %v1360_v20  ;;  %v1565_v23 = vpop.f32.mrf.mxu1  ;;  %v1004_v39 = vld [vmem:[#allocation7 + $0x6f0] sm:$0xff]  ;;  %v1002_v9 = vld [vmem:[#allocation7 + $0x6e0] sm:$0xff] }
 0x226   :  { %2128 = vmatprep.mubr.f32.mxu0 %v525_v17  ;;  %2333 = vmatprep.mubr.f32.mxu1 %v527_v19  ;;  %v1362_v31 = vpop.f32.mrf.mxu0  ;;  %v1008_v17 = vld [vmem:[#allocation7 + $0x710] sm:$0xff]  ;;  %v581_v19 = vld [vmem:[#allocation2 + $0xa58] sm:$0xff] }
 0x227   :  { %2436 = vmatprep.subr.mxu0 %v7352_v0  ;;  %v6270_v34 = vadd.f32 %v1565_v23, %v1361_v22  ;;  %v1567_v38 = vpop.f32.mrf.mxu1  ;;  %2629 = vmatprep.subr.mxu1 %v7352_v0  ;;  %v583_v20 = vld [vmem:[#allocation2 + $0xa68] sm:$0xff]  ;;  %v601_v22 = vld [vmem:[#allocation2 + $0xaf8] sm:$0xff] }
 0x228   :  { %2437 = vmatpush2.msra.mxu0 %v1005_v21  ;;  %2630 = vmatpush1.msra.mxu1 %v1011_v26  ;;  %v603_v23 = vld [vmem:[#allocation2 + $0xb08] sm:$0xff]  ;;  %v1001_v26 = vld [vmem:[#allocation7 + $0x6d8] sm:$0xff] }
 0x229   :  { %2129 = vmatmul.mubr.f32.gmra.mxu0 %v524_v27  ;;  %2334 = vmatmul.mubr.f32.gmra.mxu1 %v526_v28 }
 0x22a   :  { %2133 = vmatprep.mubr.f32.mxu0 %v544_v32  ;;  %2338 = vmatprep.mubr.f32.mxu1 %v546_v33  ;;  %v1365_v43 = vpop.f32.mrf.mxu0  ;;  %v1570_v44 = vpop.f32.mrf.mxu1  ;;  %v600_v32 = vld [vmem:[#allocation2 + $0xaf0] sm:$0xff]  ;;  %v602_v33 = vld [vmem:[#allocation2 + $0xb00] sm:$0xff] }
 0x22b   :  { %2438 = vmatprep.subr.mxu0 %v7352_v0  ;;  %v1366_v52 = vadd.f32 %v5474_v51, %v1365_v43  ;;  %2631 = vmatprep.subr.mxu1 %v7352_v0  ;;  %v1000_v43 = vld [vmem:[#allocation7 + $0x6d0] sm:$0xff] }
 0x22c   :  { %2439 = vmatpush2.msra.mxu0 %v1004_v39  ;;  %v1367_v54 = vpop.f32.mrf.mxu0  ;;  %v1572_v56 = vpop.f32.mrf.mxu1  ;;  %2632 = vmatpush1.msra.mxu1 %v1010_v40  ;;  %v620_v40 = vld [vmem:[#allocation2 + $0xb90] sm:$0xff] }
 0x22d   :  { %2134 = vmatmul.mubr.f32.gmra.mxu0 %v543_v41  ;;  %2339 = vmatmul.mubr.f32.gmra.mxu1 %v545_v42  ;;  %v6275_v58 = vadd.f32 %v1570_v44, %v1366_v52  ;;  %v622_v41 = vld [vmem:[#allocation2 + $0xba0] sm:$0xff]  ;;  %v621_v52 = vld [vmem:[#allocation2 + $0xb98] sm:$0xff] }
 0x22e   :  { %2138 = vmatprep.mubr.f32.mxu0 %v563_v47  ;;  %2343 = vmatprep.mubr.f32.mxu1 %v565_v49  ;;  %v1007_v44 = vld [vmem:[#allocation7 + $0x708] sm:$0xff] }
 0x22f   :  { %2440 = vmatprep.subr.mxu0 %v7352_v0  ;;  %v1370_v6 = vpop.f32.mrf.mxu0  ;;  %v1575_v7 = vpop.f32.mrf.mxu1  ;;  %2633 = vmatprep.subr.mxu1 %v7352_v0  ;;  %v999_v56 = vld [vmem:[#allocation7 + $0x6c8] sm:$0xff] }
 0x230   :  { %2441 = vmatpush2.msra.mxu0 %v1003_v57  ;;  %v1371_v8 = vadd.f32 %v5474_v51, %v1370_v6  ;;  %2634 = vmatpush1.msra.mxu1 %v1009_v59  ;;  %v639_v57 = vld [vmem:[#allocation2 + $0xc28] sm:$0xff] }
 0x231   :  { %2139 = vmatmul.mubr.f32.gmra.mxu0 %v562_v62  ;;  %2344 = vmatmul.mubr.f32.gmra.mxu1 %v564_v2  ;;  %v1372_v11 = vpop.f32.mrf.mxu0  ;;  %v1577_v15 = vpop.f32.mrf.mxu1  ;;  %v641_v2 = vld [vmem:[#allocation2 + $0xc38] sm:$0xff] }
 0x232   :  { %2143 = vmatprep.mubr.f32.mxu0 %v582_v4  ;;  %2348 = vmatprep.mubr.f32.mxu1 %v584_v5  ;;  %v6279_v21 = vadd.f32 %v1575_v7, %v1371_v8  ;;  %v1006_v4 = vld [vmem:[#allocation7 + $0x700] sm:$0xff]  ;;  %v640_v8 = vld [vmem:[#allocation2 + $0xc30] sm:$0xff] }
 0x233   :  { %2442 = vmatprep.subr.mxu0 %v7352_v0  ;;  %2635 = vmatprep.subr.mxu1 %v7352_v0  ;;  %v1037_v11 = vld [vmem:[#allocation7 + $0x7f8] sm:$0xff]  ;;  %v998_v15 = vld [vmem:[#allocation7 + $0x6c0] sm:$0xff] }
 0x234   :  { %2443 = vmatpush2.msra.mxu0 %v1002_v9  ;;  %2636 = vmatpush1.msra.mxu1 %v1008_v17  ;;  %v1375_v27 = vpop.f32.mrf.mxu0  ;;  %v1580_v28 = vpop.f32.mrf.mxu1 }
 0x235   :  { %2144 = vmatmul.mubr.f32.gmra.mxu0 %v581_v19  ;;  %2349 = vmatmul.mubr.f32.gmra.mxu1 %v583_v20  ;;  %v1376_v31 = vadd.f32 %v5474_v51, %v1375_v27  ;;  %v619_v51 = vld [vmem:[#allocation2 + $0xb88] sm:$0xff]  ;;  %v658_v20 = vld [vmem:[#allocation2 + $0xcc0] sm:$0xff] }
 0x236   :  { %2444 = vmatprep.subr.mxu0 %v7352_v0  ;;  %2148 = vmatprep.mubr.f32.mxu0 %v601_v22  ;;  %v1377_v38 = vpop.f32.mrf.mxu0  ;;  %v1582_v39 = vpop.f32.mrf.mxu1 }
 0x237   :  { %2353 = vmatprep.mubr.f32.mxu1 %v603_v23  ;;  %2445 = vmatpush2.msra.mxu0 %v1001_v26  ;;  %v6284_v42 = vadd.f32 %v1580_v28, %v1376_v31  ;;  %v660_v23 = vld [vmem:[#allocation2 + $0xcd0] sm:$0xff]  ;;  %v1036_v26 = vld [vmem:[#allocation7 + $0x7f0] sm:$0xff] }
 0x238   :  { %2446 = vmatprep.subr.mxu0 %v7352_v0  ;;  %2637 = vmatprep.subr.mxu1 %v7352_v0  ;;  %v659_v31 = vld [vmem:[#allocation2 + $0xcc8] sm:$0xff]  ;;  %v997_v39 = vld [vmem:[#allocation7 + $0x6b8] sm:$0xff] }
 0x239   :  { %2149 = vmatmul.mubr.f32.gmra.mxu0 %v600_v32  ;;  %2354 = vmatmul.mubr.f32.gmra.mxu1 %v602_v33  ;;  %v1650_v47 = vpop.f32.mrf.mxu0  ;;  %v1855_v49 = vpop.f32.mrf.mxu1 }
 0x23a   :  { %2153 = vmatprep.mubr.f32.mxu0 %v620_v40  ;;  %2358 = vmatprep.mubr.f32.mxu1 %v622_v41  ;;  %v1651_v54 = vadd.f32 %v1650_v47, %v6146_v53  ;;  %v638_v53 = vld [vmem:[#allocation2 + $0xc20] sm:$0xff] }
 0x23b   :  { %2447 = vmatpush2.msra.mxu0 %v1000_v43  ;;  %2638 = vmatpush1.msra.mxu1 %v1007_v44  ;;  %v1652_v59 = vpop.f32.mrf.mxu0  ;;  %v1857_v62 = vpop.f32.mrf.mxu1  ;;  %v1035_v40 = vld [vmem:[#allocation7 + $0x7e8] sm:$0xff]  ;;  %v677_v43 = vld [vmem:[#allocation2 + $0xd58] sm:$0xff] }
 0x23c   :  { %2448 = vmatprep.subr.mxu0 %v7352_v0  ;;  %2639 = vmatprep.subr.mxu1 %v7352_v0  ;;  %v6291_v5 = vadd.f32 %v1855_v49, %v1651_v54  ;;  %v1034_v49 = vld [vmem:[#allocation7 + $0x7e0] sm:$0xff]  ;;  %v678_v54 = vld [vmem:[#allocation2 + $0xd60] sm:$0xff]  ;;  %v996_v62 = vld [vmem:[#allocation7 + $0x6b0] sm:$0xff] }
 0x23d   :  { %2154 = vmatmul.mubr.f32.gmra.mxu0 %v619_v51  ;;  %2359 = vmatmul.mubr.f32.gmra.mxu1 %v621_v52  ;;  %v1655_v6 = vpop.f32.mrf.mxu0  ;;  %v1860_v7 = vpop.f32.mrf.mxu1  ;;  %v676_v52 = vld [vmem:[#allocation2 + $0xd50] sm:$0xff] }
 0x23e   :  { %2449 = vmatpush2.msra.mxu0 %v999_v56  ;;  %2158 = vmatprep.mubr.f32.mxu0 %v639_v57  ;;  %v1656_v9 = vadd.f32 %v1655_v6, %v6151_v1  ;;  %v657_v1 = vld [vmem:[#allocation2 + $0xcb8] sm:$0xff] }
 0x23f   :  { %2363 = vmatprep.mubr.f32.mxu1 %v641_v2  ;;  %2640 = vmatpush1.msra.mxu1 %v1006_v4  ;;  %v1657_v17 = vpop.f32.mrf.mxu0  ;;  %v1862_v19 = vpop.f32.mrf.mxu1  ;;  %v1033_v2 = vld [vmem:[#allocation7 + $0x7d8] sm:$0xff] }
 0x240   :  { %2641 = vmatprep.subr.mxu1 %v7352_v0  ;;  %2450 = vmatprep.subr.mxu0 %v7352_v0  ;;  %v6296_v22 = vadd.f32 %v1860_v7, %v1656_v9  ;;  %v697_v19 = vld [vmem:[#allocation2 + $0xdf8] sm:$0xff] }
 0x241   :  { %2159 = vmatmul.mubr.f32.gmra.mxu0 %v638_v53  ;;  %2364 = vmatmul.mubr.f32.gmra.mxu1 %v640_v8  ;;  %v1660_v27 = vpop.f32.mrf.mxu0  ;;  %v1865_v28 = vpop.f32.mrf.mxu1  ;;  %v698_v53 = vld [vmem:[#allocation2 + $0xe00] sm:$0xff] }
 0x242   :  { %2642 = vmatpush2.msra.mxu1 %v1037_v11  ;;  %2451 = vmatpush2.msra.mxu0 %v998_v15  ;;  %v1661_v32 = vadd.f32 %v1660_v27, %v6155_v13  ;;  %v679_v13 = vld [vmem:[#allocation2 + $0xd68] sm:$0xff] }
 0x243   :  { %2643 = vmatprep.subr.mxu1 %v7352_v0  ;;  %2163 = vmatprep.mubr.f32.mxu0 %v658_v20  ;;  %v1662_v33 = vpop.f32.mrf.mxu0  ;;  %v1867_v38 = vpop.f32.mrf.mxu1  ;;  %v1032_v11 = vld [vmem:[#allocation7 + $0x7d0] sm:$0xff]  ;;  %v995_v20 = vld [vmem:[#allocation7 + $0x6a8] sm:$0xff] }
 0x244   :  { %2368 = vmatprep.mubr.f32.mxu1 %v660_v23  ;;  %2644 = vmatpush2.msra.mxu1 %v1036_v26  ;;  %v6300_v41 = vadd.f32 %v1865_v28, %v1661_v32  ;;  %v695_v15 = vld [vmem:[#allocation2 + $0xde8] sm:$0xff]  ;;  %v1031_v28 = vld [vmem:[#allocation7 + $0x7c8] sm:$0xff]  ;;  %v1030_v38 = vld [vmem:[#allocation7 + $0x7c0] sm:$0xff] }
 0x245   :  { %2164 = vmatmul.mubr.f32.gmra.mxu0 %v657_v1  ;;  %2369 = vmatmul.mubr.f32.gmra.mxu1 %v659_v31  ;;  %v1665_v44 = vpop.f32.mrf.mxu0  ;;  %v1870_v47 = vpop.f32.mrf.mxu1  ;;  %v715_v26 = vld [vmem:[#allocation2 + $0xe88] sm:$0xff]  ;;  %v717_v1 = vld [vmem:[#allocation2 + $0xe98] sm:$0xff] }
 0x246   :  { %2452 = vmatprep.subr.mxu0 %v7352_v0  ;;  %2645 = vmatprep.subr.mxu1 %v7352_v0  ;;  %v1666_v51 = vadd.f32 %v1665_v44, %v6161_v24  ;;  %v696_v24 = vld [vmem:[#allocation2 + $0xdf0] sm:$0xff]  ;;  %v994_v44 = vld [vmem:[#allocation7 + $0x6a0] sm:$0xff] }
 0x247   :  { %2453 = vmatpush2.msra.mxu0 %v997_v39  ;;  %2646 = vmatpush2.msra.mxu1 %v1035_v40  ;;  %v1667_v56 = vpop.f32.mrf.mxu0  ;;  %v1872_v57 = vpop.f32.mrf.mxu1  ;;  %v714_v39 = vld [vmem:[#allocation2 + $0xe80] sm:$0xff] }
 0x248   :  { %2647 = vmatprep.subr.mxu1 %v7352_v0  ;;  %2168 = vmatprep.mubr.f32.mxu0 %v677_v43  ;;  %v6306_v59 = vadd.f32 %v1870_v47, %v1666_v51  ;;  %v1029_v51 = vld [vmem:[#allocation7 + $0x7b8] sm:$0xff] }
 0x249   :  { %2373 = vmatprep.mubr.f32.mxu1 %v679_v13  ;;  %2648 = vmatpush2.msra.mxu1 %v1034_v49  ;;  %v1670_v4 = vpop.f32.mrf.mxu0  ;;  %v1875_v6 = vpop.f32.mrf.mxu1  ;;  %v736_v56 = vld [vmem:[#allocation2 + $0xf30] sm:$0xff] }
 0x24a   :  { %2169 = vmatmul.mubr.f32.gmra.mxu0 %v676_v52  ;;  %2374 = vmatmul.mubr.f32.gmra.mxu1 %v678_v54  ;;  %v1671_v7 = vadd.f32 %v1670_v4, %v6166_v36  ;;  %v734_v52 = vld [vmem:[#allocation2 + $0xf20] sm:$0xff] }
 0x24b   :  { %2454 = vmatprep.subr.mxu0 %v7352_v0  ;;  %2649 = vmatprep.subr.mxu1 %v7352_v0  ;;  %v1672_v8 = vpop.f32.mrf.mxu0  ;;  %v1877_v9 = vpop.f32.mrf.mxu1 }
 0x24c   :  { %2455 = vmatpush2.msra.mxu0 %v996_v62  ;;  %2650 = vmatpush2.msra.mxu1 %v1033_v2  ;;  %v6311_v17 = vadd.f32 %v1875_v6, %v1671_v7  ;;  %v1028_v2 = vld [vmem:[#allocation7 + $0x7b0] sm:$0xff]  ;;  %v733_v6 = vld [vmem:[#allocation2 + $0xf18] sm:$0xff]  ;;  %v1027_v9 = vld [vmem:[#allocation7 + $0x7a8] sm:$0xff] }
 0x24d   :  { %2651 = vmatprep.subr.mxu1 %v7352_v0  ;;  %2173 = vmatprep.mubr.f32.mxu0 %v696_v24  ;;  %v1675_v23 = vpop.f32.mrf.mxu0  ;;  %v1880_v36 = vpop.f32.mrf.mxu1  ;;  %v735_v24 = vld [vmem:[#allocation2 + $0xf28] sm:$0xff] }
 0x24e   :  { %2378 = vmatprep.mubr.f32.mxu1 %v698_v53  ;;  %2456 = vmatprep.subr.mxu0 %v7352_v0  ;;  %v1676_v27 = vadd.f32 %v1675_v23, %v6171_v48  ;;  %v716_v48 = vld [vmem:[#allocation2 + $0xe90] sm:$0xff]  ;;  %v992_v23 = vld [vmem:[#allocation7 + $0x690] sm:$0xff] }
 0x24f   :  { %2652 = vmatpush2.msra.mxu1 %v1032_v11  ;;  %2174 = vmatmul.mubr.f32.gmra.mxu0 %v695_v15  ;;  %v1677_v31 = vpop.f32.mrf.mxu0  ;;  %v1882_v32 = vpop.f32.mrf.mxu1  ;;  %v753_v11 = vld [vmem:[#allocation2 + $0xfb8] sm:$0xff] }
 0x250   :  { %2379 = vmatmul.mubr.f32.gmra.mxu1 %v697_v19  ;;  %2457 = vmatpush2.msra.mxu0 %v995_v20  ;;  %v6316_v33 = vadd.f32 %v1880_v36, %v1676_v27  ;;  %v1026_v36 = vld [vmem:[#allocation7 + $0x7a0] sm:$0xff] }
 0x251   :  { %2653 = vmatprep.subr.mxu1 %v7352_v0  ;;  %2178 = vmatprep.mubr.f32.mxu0 %v715_v26  ;;  %v1680_v40 = vpop.f32.mrf.mxu0  ;;  %v1885_v43 = vpop.f32.mrf.mxu1 }
 0x252   :  { %2654 = vmatpush2.msra.mxu1 %v1031_v28  ;;  %2383 = vmatprep.mubr.f32.mxu1 %v717_v1  ;;  %v1681_v47 = vadd.f32 %v1680_v40, %v6177_v61  ;;  %v993_v61 = vld [vmem:[#allocation7 + $0x698] sm:$0xff]  ;;  %v754_v1 = vld [vmem:[#allocation2 + $0xfc0] sm:$0xff] }
 0x253   :  { %2655 = vmatprep.subr.mxu1 %v7352_v0  ;;  %2458 = vmatprep.subr.mxu0 %v7352_v0  ;;  %v1682_v13 = vpop.f32.mrf.mxu0  ;;  %v1887_v49 = vpop.f32.mrf.mxu1  ;;  %v752_v28 = vld [vmem:[#allocation2 + $0xfb0] sm:$0xff] }
 0x254   :  { %2656 = vmatpush2.msra.mxu1 %v1030_v38  ;;  %2179 = vmatmul.mubr.f32.gmra.mxu0 %v714_v39  ;;  %v6322_v54 = vadd.f32 %v1885_v43, %v1681_v47  ;;  %v991_v39 = vld [vmem:[#allocation7 + $0x688] sm:$0xff]  ;;  %v772_v43 = vld [vmem:[#allocation2 + $0x1050] sm:$0xff]  ;;  %v1024_v13 = vld [vmem:[#allocation7 + $0x790] sm:$0xff] }
 0x255   :  { %2384 = vmatmul.mubr.f32.gmra.mxu1 %v716_v48  ;;  %2459 = vmatpush2.msra.mxu0 %v994_v44  ;;  %v1685_v57 = vpop.f32.mrf.mxu0  ;;  %v1890_v62 = vpop.f32.mrf.mxu1  ;;  %v774_v47 = vld [vmem:[#allocation2 + $0x1060] sm:$0xff] }
 0x256   :  { %2657 = vmatprep.subr.mxu1 %v7352_v0  ;;  %2460 = vmatprep.subr.mxu0 %v7352_v0  ;;  %v1686_v4 = vadd.f32 %v1685_v57, %v6183_v10  ;;  %v755_v10 = vld [vmem:[#allocation2 + $0xfc8] sm:$0xff] }
 0x257   :  { %2658 = vmatpush2.msra.mxu1 %v1029_v51  ;;  %2183 = vmatprep.mubr.f32.mxu0 %v734_v52  ;;  %v1687_v7 = vpop.f32.mrf.mxu0  ;;  %v1892_v53 = vpop.f32.mrf.mxu1  ;;  %v771_v51 = vld [vmem:[#allocation2 + $0x1048] sm:$0xff]  ;;  %v773_v52 = vld [vmem:[#allocation2 + $0x1058] sm:$0xff] }
 0x258   :  { %2659 = vmatprep.subr.mxu1 %v7352_v0  ;;  %2388 = vmatprep.mubr.f32.mxu1 %v736_v56  ;;  %v6328_v8 = vadd.f32 %v1890_v62, %v1686_v4  ;;  %v1023_v62 = vld [vmem:[#allocation7 + $0x788] sm:$0xff]  ;;  %v1022_v7 = vld [vmem:[#allocation7 + $0x780] sm:$0xff] }
 0x259   :  { %2461 = vmatpush2.msra.mxu0 %v993_v61  ;;  %2660 = vmatpush2.msra.mxu1 %v1028_v2  ;;  %v1690_v15 = vpop.f32.mrf.mxu0  ;;  %v1895_v19 = vpop.f32.mrf.mxu1  ;;  %v990_v61 = vld [vmem:[#allocation7 + $0x680] sm:$0xff] }
 0x25a   :  { %2184 = vmatmul.mubr.f32.gmra.mxu0 %v733_v6  ;;  %2389 = vmatmul.mubr.f32.gmra.mxu1 %v735_v24  ;;  %v1691_v20 = vadd.f32 %v1690_v15, %v6188_v25  ;;  %v1025_v25 = vld [vmem:[#allocation7 + $0x798] sm:$0xff]  ;;  %v263_v6 = vld [vmem:[#allocation2 + $0x68] sm:$0xff]  ;;  %v265_v53 = vld [vmem:[#allocation2 + $0x78] sm:$0xff] }
 0x25b   :  { %2661 = vmatprep.subr.mxu1 %v7352_v0  ;;  %2462 = vmatprep.subr.mxu0 %v7352_v0  ;;  %v1692_v26 = vpop.f32.mrf.mxu0  ;;  %v1897_v27 = vpop.f32.mrf.mxu1  ;;  %v264_v15 = vld [vmem:[#allocation2 + $0x70] sm:$0xff] }
 0x25c   :  { %2662 = vmatpush2.msra.mxu1 %v1027_v9  ;;  %2188 = vmatprep.mubr.f32.mxu0 %v753_v11  ;;  %v6333_v31 = vadd.f32 %v1895_v19, %v1691_v20  ;;  %v284_v26 = vld [vmem:[#allocation2 + $0x110] sm:$0xff] }
 0x25d   :  { %2663 = vmatprep.subr.mxu1 %v7352_v0  ;;  %2393 = vmatprep.mubr.f32.mxu1 %v755_v10  ;;  %v1695_v32 = vpop.f32.mrf.mxu0  ;;  %v1900_v38 = vpop.f32.mrf.mxu1  ;;  %v282_v10 = vld [vmem:[#allocation2 + $0x100] sm:$0xff] }
 0x25e   :  { %2463 = vmatpush2.msra.mxu0 %v992_v23  ;;  %2664 = vmatpush2.msra.mxu1 %v1026_v36  ;;  %v1696_v40 = vadd.f32 %v1695_v32, %v6194_v37  ;;  %v1053_v36 = vld [vmem:[#allocation7 + $0x878] sm:$0xff] }
 0x25f   :  { %2189 = vmatmul.mubr.f32.gmra.mxu0 %v752_v28  ;;  %2394 = vmatmul.mubr.f32.gmra.mxu1 %v754_v1  ;;  %v1697_v48 = vpop.f32.mrf.mxu0  ;;  %v1902_v44 = vpop.f32.mrf.mxu1  ;;  %v1081_v32 = vld [vmem:[#allocation7 + $0x958] sm:$0xff] }
 0x260   :  { %2665 = vmatprep.subr.mxu1 %v7352_v0  ;;  %2464 = vmatprep.subr.mxu0 %v7352_v0  ;;  %v6339_v49 = vadd.f32 %v1900_v38, %v1696_v40  ;;  %v283_v38 = vld [vmem:[#allocation2 + $0x108] sm:$0xff]  ;;  %v301_v40 = vld [vmem:[#allocation2 + $0x198] sm:$0xff] }
 0x261   :  { %2666 = vmatpush2.msra.mxu1 %v1025_v25  ;;  %2465 = vmatpush2.msra.mxu0 %v991_v39  ;;  %v1700_v56 = vpop.f32.mrf.mxu0  ;;  %v1905_v57 = vpop.f32.mrf.mxu1  ;;  %v1052_v39 = vld [vmem:[#allocation7 + $0x870] sm:$0xff] }
 0x262   :  { %2667 = vmatprep.subr.mxu1 %v7352_v0  ;;  %2193 = vmatprep.mubr.f32.mxu0 %v772_v43  ;;  %v1701_v37 = vadd.f32 %v1700_v56, %v6198_v50  ;;  %v262_v50 = vld [vmem:[#allocation2 + $0x60] sm:$0xff]  ;;  %v303_v44 = vld [vmem:[#allocation2 + $0x1a8] sm:$0xff] }
 0x263   :  { %2398 = vmatprep.mubr.f32.mxu1 %v774_v47  ;;  %2668 = vmatpush2.msra.mxu1 %v1024_v13  ;;  %v1702_v2 = vpop.f32.mrf.mxu0  ;;  %v1907_v4 = vpop.f32.mrf.mxu1  ;;  %v1051_v13 = vld [vmem:[#allocation7 + $0x868] sm:$0xff] }
 0x264   :  { %2194 = vmatmul.mubr.f32.gmra.mxu0 %v771_v51  ;;  %2399 = vmatmul.mubr.f32.gmra.mxu1 %v773_v52  ;;  %v6343_v24 = vadd.f32 %v1905_v57, %v1701_v37  ;;  %v302_v56 = vld [vmem:[#allocation2 + $0x1a0] sm:$0xff]  ;;  %v320_v37 = vld [vmem:[#allocation2 + $0x230] sm:$0xff] }
 0x265   :  { %2669 = vmatprep.subr.mxu1 %v7352_v0  ;;  %2466 = vmatprep.subr.mxu0 %v7352_v0  ;;  %v1705_v9 = vpop.f32.mrf.mxu0  ;;  %v1910_v11 = vpop.f32.mrf.mxu1 }
 0x266   :  { %2670 = vmatpush2.msra.mxu1 %v1023_v62  ;;  %2467 = vmatpush2.msra.mxu0 %v990_v61  ;;  %v1706_v19 = vadd.f32 %v1705_v9, %v6204_v3  ;;  %v281_v3 = vld [vmem:[#allocation2 + $0xf8] sm:$0xff]  ;;  %v322_v62 = vld [vmem:[#allocation2 + $0x240] sm:$0xff] }
 0x267   :  { %2671 = vmatprep.subr.mxu1 %v7352_v0  ;;  %2468 = vmatprep.mubr.f32.mxu0 %v263_v6  ;;  %v1707_v20 = vpop.f32.mrf.mxu0  ;;  %v1912_v23 = vpop.f32.mrf.mxu1  ;;  %v1080_v6 = vld [vmem:[#allocation7 + $0x950] sm:$0xff] }
 0x268   :  { %2672 = vmatpush2.msra.mxu1 %v1022_v7  ;;  %2673 = vmatprep.mubr.f32.mxu1 %v265_v53  ;;  %v6349_v27 = vadd.f32 %v1910_v11, %v1706_v19  ;;  %v1050_v7 = vld [vmem:[#allocation7 + $0x860] sm:$0xff]  ;;  %v1049_v23 = vld [vmem:[#allocation7 + $0x858] sm:$0xff] }
 0x269   :  { %2469 = vmatmul.mubr.f32.vlgmr.msra.gmra.mxu0 %v262_v50  ;;  %2674 = vmatmul.mubr.f32.vlgmr.msra.gmra.mxu1 %v264_v15  ;;  %v1710_v28 = vpop.f32.mrf.mxu0  ;;  %v1915_v1 = vpop.f32.mrf.mxu1  ;;  %v321_v11 = vld [vmem:[#allocation2 + $0x238] sm:$0xff]  ;;  %v339_v15 = vld [vmem:[#allocation2 + $0x2c8] sm:$0xff] }
 0x26a   :  { %2814 = vmatprep.subr.mxu0 %v7352_v0  ;;  %2473 = vmatprep.mubr.f32.mxu0 %v282_v10  ;;  %v1711_v25 = vadd.f32 %v1710_v28, %v6209_v16  ;;  %v300_v16 = vld [vmem:[#allocation2 + $0x190] sm:$0xff]  ;;  %v341_v20 = vld [vmem:[#allocation2 + $0x2d8] sm:$0xff] }
 0x26b   :  { %2815 = vmatpush1.msra.mxu0 %v1053_v36  ;;  %2678 = vmatprep.mubr.f32.mxu1 %v284_v26  ;;  %v1712_v43 = vpop.f32.mrf.mxu0  ;;  %v1917_v48 = vpop.f32.mrf.mxu1 }
 0x26c   :  { %2816 = vmatprep.subr.mxu0 %v7352_v0  ;;  %v6354_v47 = vadd.f32 %v1915_v1, %v1711_v25  ;;  %5100 = vmatprep.subr.mxu1 %v1081_v32  ;;  %v1079_v1 = vld [vmem:[#allocation7 + $0x948] sm:$0xff]  ;;  %v360_v25 = vld [vmem:[#allocation2 + $0x370] sm:$0xff]  ;;  %v1048_v43 = vld [vmem:[#allocation7 + $0x850] sm:$0xff] }
 0x26d   :  { %2474 = vmatmul.mubr.f32.gmra.mxu0 %v281_v3  ;;  %2679 = vmatmul.mubr.f32.gmra.mxu1 %v283_v38  ;;  %v1715_v51 = vpop.f32.mrf.mxu0  ;;  %v1920_v52 = vpop.f32.mrf.mxu1  ;;  %v358_v38 = vld [vmem:[#allocation2 + $0x360] sm:$0xff] }
 0x26e   :  { %2817 = vmatpush1.msra.mxu0 %v1052_v39  ;;  %2478 = vmatprep.mubr.f32.mxu0 %v301_v40  ;;  %v1716_v57 = vadd.f32 %v1715_v51, %v6214_v30  ;;  %v319_v30 = vld [vmem:[#allocation2 + $0x228] sm:$0xff]  ;;  %v1078_v51 = vld [vmem:[#allocation7 + $0x940] sm:$0xff] }
 0x26f   :  { %2683 = vmatprep.mubr.f32.mxu1 %v303_v44  ;;  %2818 = vmatprep.subr.mxu0 %v7352_v0  ;;  %v1717_v61 = vpop.f32.mrf.mxu0  ;;  %v1922_v2 = vpop.f32.mrf.mxu1 }
 0x270   :  { %2819 = vmatpush1.msra.mxu0 %v1051_v13  ;;  %v6358_v4 = vadd.f32 %v1920_v52, %v1716_v57  ;;  %5101 = vmatpush3.msra.mxu1 %v1081_v32  ;;  %v340_v32 = vld [vmem:[#allocation2 + $0x2d0] sm:$0xff]  ;;  %v359_v52 = vld [vmem:[#allocation2 + $0x368] sm:$0xff]  ;;  %v377_v57 = vld [vmem:[#allocation2 + $0x3f8] sm:$0xff] }
 0x271   :  { %2479 = vmatmul.mubr.f32.gmra.mxu0 %v300_v16  ;;  %2684 = vmatmul.mubr.f32.gmra.mxu1 %v302_v56  ;;  %v1720_v53 = vpop.f32.mrf.mxu0  ;;  %v1925_v9 = vpop.f32.mrf.mxu1  ;;  %v1047_v56 = vld [vmem:[#allocation7 + $0x848] sm:$0xff]  ;;  %v379_v61 = vld [vmem:[#allocation2 + $0x408] sm:$0xff] }
 0x272   :  { %2483 = vmatprep.mubr.f32.mxu0 %v320_v37  ;;  %2688 = vmatprep.mubr.f32.mxu1 %v322_v62  ;;  %v1721_v50 = vadd.f32 %v1720_v53, %v6219_v46  ;;  %v338_v46 = vld [vmem:[#allocation2 + $0x2c0] sm:$0xff] }
 0x273   :  { %2820 = vmatprep.subr.mxu0 %v7352_v0  ;;  %v1722_v19 = vpop.f32.mrf.mxu0  ;;  %v1927_v10 = vpop.f32.mrf.mxu1  ;;  %5102 = vmatprep.subr.mxu1 %v1080_v6 }
 0x274   :  { %2821 = vmatpush1.msra.mxu0 %v1050_v7  ;;  %v6362_v36 = vadd.f32 %v1925_v9, %v1721_v50  ;;  %5103 = vmatpush3.msra.mxu1 %v1080_v6  ;;  %v1046_v6 = vld [vmem:[#allocation7 + $0x840] sm:$0xff]  ;;  %v378_v9 = vld [vmem:[#allocation2 + $0x400] sm:$0xff] }
 0x275   :  { %2484 = vmatmul.mubr.f32.gmra.mxu0 %v319_v30  ;;  %2689 = vmatmul.mubr.f32.gmra.mxu1 %v321_v11  ;;  %v1725_v26 = vpop.f32.mrf.mxu0  ;;  %v1930_v28 = vpop.f32.mrf.mxu1  ;;  %v396_v11 = vld [vmem:[#allocation2 + $0x490] sm:$0xff]  ;;  %v398_v50 = vld [vmem:[#allocation2 + $0x4a0] sm:$0xff] }
 0x276   :  { %2822 = vmatprep.subr.mxu0 %v7352_v0  ;;  %2488 = vmatprep.mubr.f32.mxu0 %v339_v15  ;;  %v1726_v3 = vadd.f32 %v1725_v26, %v6224_v60  ;;  %v357_v60 = vld [vmem:[#allocation2 + $0x358] sm:$0xff] }
 0x277   :  { %2693 = vmatprep.mubr.f32.mxu1 %v341_v20  ;;  %2823 = vmatpush1.msra.mxu0 %v1049_v23  ;;  %v1727_v39 = vpop.f32.mrf.mxu0  ;;  %v1932_v40 = vpop.f32.mrf.mxu1  ;;  %v1077_v20 = vld [vmem:[#allocation7 + $0x938] sm:$0xff] }
 0x278   :  { %2824 = vmatprep.subr.mxu0 %v7352_v0  ;;  %v6367_v48 = vadd.f32 %v1930_v28, %v1726_v3  ;;  %5104 = vmatprep.subr.mxu1 %v1079_v1  ;;  %v1045_v23 = vld [vmem:[#allocation7 + $0x838] sm:$0xff]  ;;  %v417_v3 = vld [vmem:[#allocation2 + $0x538] sm:$0xff]  ;;  %v1076_v40 = vld [vmem:[#allocation7 + $0x930] sm:$0xff] }
 0x279   :  { %2489 = vmatmul.mubr.f32.gmra.mxu0 %v338_v46  ;;  %2694 = vmatmul.mubr.f32.gmra.mxu1 %v340_v32  ;;  %v1730_v44 = vpop.f32.mrf.mxu0  ;;  %v1935_v13 = vpop.f32.mrf.mxu1  ;;  %v415_v32 = vld [vmem:[#allocation2 + $0x528] sm:$0xff] }
 0x27a   :  { %2493 = vmatprep.mubr.f32.mxu0 %v358_v38  ;;  %2698 = vmatprep.mubr.f32.mxu1 %v360_v25  ;;  %v1731_v16 = vadd.f32 %v1730_v44, %v6229_v14  ;;  %v376_v14 = vld [vmem:[#allocation2 + $0x3f0] sm:$0xff] }
 0x27b   :  { %2825 = vmatpush1.msra.mxu0 %v1048_v43  ;;  %v1732_v37 = vpop.f32.mrf.mxu0  ;;  %v1937_v62 = vpop.f32.mrf.mxu1  ;;  %5105 = vmatpush3.msra.mxu1 %v1079_v1  ;;  %v397_v1 = vld [vmem:[#allocation2 + $0x498] sm:$0xff]  ;;  %v1044_v43 = vld [vmem:[#allocation7 + $0x830] sm:$0xff] }
 0x27c   :  { %2826 = vmatprep.subr.mxu0 %v7352_v0  ;;  %v6371_v2 = vadd.f32 %v1935_v13, %v1731_v16  ;;  %5106 = vmatprep.subr.mxu1 %v1078_v51  ;;  %v436_v16 = vld [vmem:[#allocation2 + $0x5d0] sm:$0xff]  ;;  %v1075_v62 = vld [vmem:[#allocation7 + $0x928] sm:$0xff] }
 0x27d   :  { %2494 = vmatmul.mubr.f32.gmra.mxu0 %v357_v60  ;;  %2699 = vmatmul.mubr.f32.gmra.mxu1 %v359_v52  ;;  %v1735_v7 = vpop.f32.mrf.mxu0  ;;  %v1940_v53 = vpop.f32.mrf.mxu1  ;;  %v434_v52 = vld [vmem:[#allocation2 + $0x5c0] sm:$0xff] }
 0x27e   :  { %2827 = vmatpush1.msra.mxu0 %v1047_v56  ;;  %2498 = vmatprep.mubr.f32.mxu0 %v377_v57  ;;  %v1736_v30 = vadd.f32 %v1735_v7, %v6234_v29  ;;  %v395_v29 = vld [vmem:[#allocation2 + $0x488] sm:$0xff] }
 0x27f   :  { %2703 = vmatprep.mubr.f32.mxu1 %v379_v61  ;;  %2828 = vmatprep.subr.mxu0 %v7352_v0  ;;  %v1737_v15 = vpop.f32.mrf.mxu0  ;;  %v1942_v19 = vpop.f32.mrf.mxu1  ;;  %v1043_v61 = vld [vmem:[#allocation7 + $0x828] sm:$0xff] }
 0x280   :  { %2829 = vmatpush1.msra.mxu0 %v1046_v6  ;;  %v6375_v10 = vadd.f32 %v1940_v53, %v1736_v30  ;;  %5107 = vmatpush3.msra.mxu1 %v1078_v51  ;;  %v416_v51 = vld [vmem:[#allocation2 + $0x530] sm:$0xff]  ;;  %v435_v53 = vld [vmem:[#allocation2 + $0x5c8] sm:$0xff]  ;;  %v1074_v19 = vld [vmem:[#allocation7 + $0x920] sm:$0xff] }
 0x281   :  { %2499 = vmatmul.mubr.f32.gmra.mxu0 %v376_v14  ;;  %2704 = vmatmul.mubr.f32.gmra.mxu1 %v378_v9  ;;  %v1740_v26 = vpop.f32.mrf.mxu0  ;;  %v1945_v28 = vpop.f32.mrf.mxu1  ;;  %v453_v9 = vld [vmem:[#allocation2 + $0x658] sm:$0xff]  ;;  %v455_v30 = vld [vmem:[#allocation2 + $0x668] sm:$0xff] }
 0x282   :  { %2503 = vmatprep.mubr.f32.mxu0 %v396_v11  ;;  %2708 = vmatprep.mubr.f32.mxu1 %v398_v50  ;;  %v1741_v46 = vadd.f32 %v1740_v26, %v6239_v45  ;;  %v414_v45 = vld [vmem:[#allocation2 + $0x520] sm:$0xff] }
 0x283   :  { %2830 = vmatprep.subr.mxu0 %v7352_v0  ;;  %v1742_v38 = vpop.f32.mrf.mxu0  ;;  %v1947_v25 = vpop.f32.mrf.mxu1  ;;  %5108 = vmatprep.subr.mxu1 %v1077_v20 }
 0x284   :  { %2831 = vmatpush1.msra.mxu0 %v1045_v23  ;;  %v6379_v39 = vadd.f32 %v1945_v28, %v1741_v46  ;;  %5109 = vmatpush3.msra.mxu1 %v1077_v20  ;;  %v1042_v20 = vld [vmem:[#allocation7 + $0x820] sm:$0xff]  ;;  %v454_v28 = vld [vmem:[#allocation2 + $0x660] sm:$0xff]  ;;  %v1041_v38 = vld [vmem:[#allocation7 + $0x818] sm:$0xff] }
 0x285   :  { %2504 = vmatmul.mubr.f32.gmra.mxu0 %v395_v29  ;;  %2709 = vmatmul.mubr.f32.gmra.mxu1 %v397_v1  ;;  %v1745_v44 = vpop.f32.mrf.mxu0  ;;  %v1950_v13 = vpop.f32.mrf.mxu1  ;;  %v472_v1 = vld [vmem:[#allocation2 + $0x6f0] sm:$0xff] }
 0x286   :  { %2508 = vmatprep.mubr.f32.mxu0 %v415_v32  ;;  %2713 = vmatprep.mubr.f32.mxu1 %v417_v3  ;;  %v1746_v60 = vadd.f32 %v1745_v44, %v6244_v63  ;;  %v433_v63 = vld [vmem:[#allocation2 + $0x5b8] sm:$0xff]  ;;  %v474_v3 = vld [vmem:[#allocation2 + $0x700] sm:$0xff] }
 0x287   :  { %2832 = vmatprep.subr.mxu0 %v7352_v0  ;;  %v1747_v56 = vpop.f32.mrf.mxu0  ;;  %v1952_v57 = vpop.f32.mrf.mxu1  ;;  %5110 = vmatprep.subr.mxu1 %v1076_v40 }
 0x288   :  { %2833 = vmatpush1.msra.mxu0 %v1044_v43  ;;  %v6383_v37 = vadd.f32 %v1950_v13, %v1746_v60  ;;  %5111 = vmatpush3.msra.mxu1 %v1076_v40  ;;  %v1073_v40 = vld [vmem:[#allocation7 + $0x918] sm:$0xff]  ;;  %v471_v43 = vld [vmem:[#allocation2 + $0x6e8] sm:$0xff] }
 0x289   :  { %2509 = vmatmul.mubr.f32.gmra.mxu0 %v414_v45  ;;  %2714 = vmatmul.mubr.f32.gmra.mxu1 %v416_v51  ;;  %v1750_v6 = vpop.f32.mrf.mxu0  ;;  %v1955_v7 = vpop.f32.mrf.mxu1  ;;  %v491_v45 = vld [vmem:[#allocation2 + $0x788] sm:$0xff]  ;;  %v493_v51 = vld [vmem:[#allocation2 + $0x798] sm:$0xff] }
 0x28a   :  { %2513 = vmatprep.mubr.f32.mxu0 %v434_v52  ;;  %2718 = vmatprep.mubr.f32.mxu1 %v436_v16  ;;  %v1751_v14 = vadd.f32 %v1750_v6, %v6249_v18  ;;  %v452_v18 = vld [vmem:[#allocation2 + $0x650] sm:$0xff]  ;;  %v1040_v52 = vld [vmem:[#allocation7 + $0x810] sm:$0xff] }
 0x28b   :  { %2834 = vmatprep.subr.mxu0 %v7352_v0  ;;  %v1752_v11 = vpop.f32.mrf.mxu0  ;;  %v1957_v50 = vpop.f32.mrf.mxu1  ;;  %5112 = vmatprep.subr.mxu1 %v1075_v62  ;;  %v492_v6 = vld [vmem:[#allocation2 + $0x790] sm:$0xff] }
 0x28c   :  { %2835 = vmatpush1.msra.mxu0 %v1043_v61  ;;  %v6387_v15 = vadd.f32 %v1955_v7, %v1751_v14  ;;  %5113 = vmatpush3.msra.mxu1 %v1075_v62  ;;  %v1072_v62 = vld [vmem:[#allocation7 + $0x910] sm:$0xff]  ;;  %v490_v61 = vld [vmem:[#allocation2 + $0x780] sm:$0xff]  ;;  %v509_v50 = vld [vmem:[#allocation2 + $0x818] sm:$0xff] }
 0x28d   :  { %2514 = vmatmul.mubr.f32.gmra.mxu0 %v433_v63  ;;  %2719 = vmatmul.mubr.f32.gmra.mxu1 %v435_v53  ;;  %v1755_v23 = vpop.f32.mrf.mxu0  ;;  %v1960_v26 = vpop.f32.mrf.mxu1  ;;  %v1039_v7 = vld [vmem:[#allocation7 + $0x808] sm:$0xff] }
 0x28e   :  { %2518 = vmatprep.mubr.f32.mxu0 %v453_v9  ;;  %2723 = vmatprep.mubr.f32.mxu1 %v455_v30  ;;  %v1756_v29 = vadd.f32 %v1755_v23, %v6254_v35  ;;  %v473_v35 = vld [vmem:[#allocation2 + $0x6f8] sm:$0xff]  ;;  %v510_v63 = vld [vmem:[#allocation2 + $0x820] sm:$0xff] }
 0x28f   :  { %2836 = vmatprep.subr.mxu0 %v7352_v0  ;;  %v1757_v46 = vpop.f32.mrf.mxu0  ;;  %v1962_v32 = vpop.f32.mrf.mxu1  ;;  %5114 = vmatprep.subr.mxu1 %v1074_v19  ;;  %v1038_v30 = vld [vmem:[#allocation7 + $0x800] sm:$0xff] }
 0x290   :  { %2837 = vmatpush1.msra.mxu0 %v1042_v20  ;;  %v6391_v25 = vadd.f32 %v1960_v26, %v1756_v29  ;;  %5115 = vmatpush3.msra.mxu1 %v1074_v19  ;;  %v511_v19 = vld [vmem:[#allocation2 + $0x828] sm:$0xff]  ;;  %v529_v26 = vld [vmem:[#allocation2 + $0x8b8] sm:$0xff]  ;;  %v1069_v29 = vld [vmem:[#allocation7 + $0x8f8] sm:$0xff] }
 0x291   :  { %2519 = vmatmul.mubr.f32.gmra.mxu0 %v452_v18  ;;  %2724 = vmatmul.mubr.f32.gmra.mxu1 %v454_v28  ;;  %v531_v18 = vld [vmem:[#allocation2 + $0x8c8] sm:$0xff]  ;;  %v1071_v28 = vld [vmem:[#allocation7 + $0x908] sm:$0xff]  ;;  %v528_v32 = vld [vmem:[#allocation2 + $0x8b0] sm:$0xff] }
 0x292   :  { %2838 = vmatprep.subr.mxu0 %v7352_v0  ;;  %2523 = vmatprep.mubr.f32.mxu0 %v472_v1  ;;  %v1760_v44 = vpop.f32.mrf.mxu0  ;;  %v1965_v13 = vpop.f32.mrf.mxu1 }
 0x293   :  { %2728 = vmatprep.mubr.f32.mxu1 %v474_v3  ;;  %2839 = vmatpush1.msra.mxu0 %v1041_v38  ;;  %v1761_v60 = vadd.f32 %v1760_v44, %v6260_v55  ;;  %v512_v55 = vld [vmem:[#allocation2 + $0x830] sm:$0xff]  ;;  %v530_v3 = vld [vmem:[#allocation2 + $0x8c0] sm:$0xff] }
 0x294   :  { %2840 = vmatprep.subr.mxu0 %v7352_v0  ;;  %v1762_v16 = vpop.f32.mrf.mxu0  ;;  %v1967_v56 = vpop.f32.mrf.mxu1  ;;  %5116 = vmatprep.subr.mxu1 %v1073_v40 }
 0x295   :  { %2524 = vmatmul.mubr.f32.gmra.mxu0 %v471_v43  ;;  %2729 = vmatmul.mubr.f32.gmra.mxu1 %v473_v35  ;;  %v6396_v57 = vadd.f32 %v1965_v13, %v1761_v60  ;;  %v550_v43 = vld [vmem:[#allocation2 + $0x960] sm:$0xff]  ;;  %v1070_v13 = vld [vmem:[#allocation7 + $0x900] sm:$0xff]  ;;  %v567_v16 = vld [vmem:[#allocation2 + $0x9e8] sm:$0xff] }
 0x296   :  { %2528 = vmatprep.mubr.f32.mxu0 %v491_v45  ;;  %2733 = vmatprep.mubr.f32.mxu1 %v493_v51  ;;  %v547_v45 = vld [vmem:[#allocation2 + $0x948] sm:$0xff]  ;;  %v549_v51 = vld [vmem:[#allocation2 + $0x958] sm:$0xff] }
 0x297   :  { %2841 = vmatpush1.msra.mxu0 %v1040_v52  ;;  %v1765_v53 = vpop.f32.mrf.mxu0  ;;  %5117 = vmatpush3.msra.mxu1 %v1073_v40  ;;  %v548_v40 = vld [vmem:[#allocation2 + $0x950] sm:$0xff]  ;;  %v569_v56 = vld [vmem:[#allocation2 + $0x9f8] sm:$0xff] }
 0x298   :  { %2842 = vmatprep.subr.mxu0 %v7352_v0  ;;  %v1766_v14 = vadd.f32 %v1765_v53, %v6265_v12  ;;  %v1970_v9 = vpop.f32.mrf.mxu1  ;;  %5118 = vmatprep.subr.mxu1 %v1072_v62  ;;  %v566_v53 = vld [vmem:[#allocation2 + $0x9e0] sm:$0xff] }
 0x299   :  { %2529 = vmatmul.mubr.f32.gmra.mxu0 %v490_v61  ;;  %2734 = vmatmul.mubr.f32.gmra.mxu1 %v492_v6  ;;  %v1767_v11 = vpop.f32.mrf.mxu0 }
 0x29a   :  { %2843 = vmatpush1.msra.mxu0 %v1039_v7  ;;  %2533 = vmatprep.mubr.f32.mxu0 %v510_v63  ;;  %v6400_v20 = vadd.f32 %v1970_v9, %v1766_v14  ;;  %v1972_v23 = vpop.f32.mrf.mxu1  ;;  %v1067_v7 = vld [vmem:[#allocation7 + $0x8e8] sm:$0xff]  ;;  %v588_v9 = vld [vmem:[#allocation2 + $0xa90] sm:$0xff] }
 0x29b   :  { %2738 = vmatprep.mubr.f32.mxu1 %v512_v55  ;;  %2844 = vmatprep.subr.mxu0 %v7352_v0  ;;  %v568_v55 = vld [vmem:[#allocation2 + $0x9f0] sm:$0xff]  ;;  %v586_v14 = vld [vmem:[#allocation2 + $0xa80] sm:$0xff] }
 0x29c   :  { %2845 = vmatpush1.msra.mxu0 %v1038_v30  ;;  %v1770_v12 = vpop.f32.mrf.mxu0  ;;  %5119 = vmatpush3.msra.mxu1 %v1072_v62 }
 0x29d   :  { %2534 = vmatmul.mubr.f32.gmra.mxu0 %v509_v50  ;;  %2739 = vmatmul.mubr.f32.gmra.mxu1 %v511_v19  ;;  %v1771_v1 = vadd.f32 %v1770_v12, %v6270_v34  ;;  %v1975_v46 = vpop.f32.mrf.mxu1  ;;  %v1068_v34 = vld [vmem:[#allocation7 + $0x8f0] sm:$0xff]  ;;  %v1066_v50 = vld [vmem:[#allocation7 + $0x8e0] sm:$0xff] }
 0x29e   :  { %2538 = vmatprep.mubr.f32.mxu0 %v529_v26  ;;  %2743 = vmatprep.mubr.f32.mxu1 %v531_v18  ;;  %v1772_v38 = vpop.f32.mrf.mxu0  ;;  %v585_v26 = vld [vmem:[#allocation2 + $0xa78] sm:$0xff]  ;;  %v587_v18 = vld [vmem:[#allocation2 + $0xa88] sm:$0xff] }
 0x29f   :  { %2846 = vmatprep.subr.mxu0 %v7352_v0  ;;  %v6405_v35 = vadd.f32 %v1975_v46, %v1771_v1  ;;  %v1977_v44 = vpop.f32.mrf.mxu1  ;;  %5120 = vmatprep.subr.mxu1 %v1071_v28  ;;  %v1065_v1 = vld [vmem:[#allocation7 + $0x8d8] sm:$0xff]  ;;  %v606_v38 = vld [vmem:[#allocation2 + $0xb20] sm:$0xff] }
 0x2a0   :  { %2847 = vmatpush2.msra.mxu0 %v1069_v29  ;;  %5121 = vmatpush3.msra.mxu1 %v1071_v28  ;;  %v605_v28 = vld [vmem:[#allocation2 + $0xb18] sm:$0xff]  ;;  %v607_v29 = vld [vmem:[#allocation2 + $0xb28] sm:$0xff]  ;;  %v624_v44 = vld [vmem:[#allocation2 + $0xbb0] sm:$0xff] }
 0x2a1   :  { %2539 = vmatmul.mubr.f32.gmra.mxu0 %v528_v32  ;;  %2744 = vmatmul.mubr.f32.gmra.mxu1 %v530_v3  ;;  %v604_v3 = vld [vmem:[#allocation2 + $0xb10] sm:$0xff] }
 0x2a2   :  { %2543 = vmatprep.mubr.f32.mxu0 %v548_v40  ;;  %2748 = vmatprep.mubr.f32.mxu1 %v550_v43  ;;  %v1775_v60 = vpop.f32.mrf.mxu0  ;;  %v1980_v52 = vpop.f32.mrf.mxu1 }
 0x2a3   :  { %2848 = vmatprep.subr.mxu0 %v7352_v0  ;;  %v1776_v62 = vadd.f32 %v1775_v60, %v6275_v58  ;;  %5122 = vmatprep.subr.mxu1 %v1070_v13  ;;  %v623_v60 = vld [vmem:[#allocation2 + $0xba8] sm:$0xff] }
 0x2a4   :  { %2849 = vmatpush2.msra.mxu0 %v1068_v34  ;;  %v1777_v61 = vpop.f32.mrf.mxu0  ;;  %v1982_v6 = vpop.f32.mrf.mxu1  ;;  %5123 = vmatpush3.msra.mxu1 %v1070_v13  ;;  %v626_v13 = vld [vmem:[#allocation2 + $0xbc0] sm:$0xff] }
 0x2a5   :  { %2544 = vmatmul.mubr.f32.gmra.mxu0 %v547_v45  ;;  %2749 = vmatmul.mubr.f32.gmra.mxu1 %v549_v51  ;;  %v6409_v63 = vadd.f32 %v1980_v52, %v1776_v62  ;;  %v1064_v45 = vld [vmem:[#allocation7 + $0x8d0] sm:$0xff]  ;;  %v625_v52 = vld [vmem:[#allocation2 + $0xbb8] sm:$0xff] }
 0x2a6   :  { %2548 = vmatprep.mubr.f32.mxu0 %v567_v16  ;;  %2753 = vmatprep.mubr.f32.mxu1 %v569_v56  ;;  %v1063_v56 = vld [vmem:[#allocation7 + $0x8c8] sm:$0xff]  ;;  %v643_v62 = vld [vmem:[#allocation2 + $0xc48] sm:$0xff] }
 0x2a7   :  { %2850 = vmatprep.subr.mxu0 %v7352_v0  ;;  %v1780_v30 = vpop.f32.mrf.mxu0  ;;  %v1985_v58 = vpop.f32.mrf.mxu1  ;;  %3655 = vmatprep.subr.mxu1 %v7352_v0 }
 0x2a8   :  { %2851 = vmatpush2.msra.mxu0 %v1067_v7  ;;  %v1781_v11 = vadd.f32 %v1780_v30, %v6279_v21  ;;  %v645_v7 = vld [vmem:[#allocation2 + $0xc58] sm:$0xff]  ;;  %v642_v30 = vld [vmem:[#allocation2 + $0xc40] sm:$0xff] }
 0x2a9   :  { %2549 = vmatmul.mubr.f32.gmra.mxu0 %v566_v53  ;;  %2754 = vmatmul.mubr.f32.gmra.mxu1 %v568_v55  ;;  %v1782_v19 = vpop.f32.mrf.mxu0  ;;  %v1987_v23 = vpop.f32.mrf.mxu1  ;;  %v1062_v55 = vld [vmem:[#allocation7 + $0x8c0] sm:$0xff] }
 0x2aa   :  { %2553 = vmatprep.mubr.f32.mxu0 %v586_v14  ;;  %2758 = vmatprep.mubr.f32.mxu1 %v588_v9  ;;  %v6414_v12 = vadd.f32 %v1985_v58, %v1781_v11  ;;  %v644_v58 = vld [vmem:[#allocation2 + $0xc50] sm:$0xff]  ;;  %v662_v11 = vld [vmem:[#allocation2 + $0xce0] sm:$0xff] }
 0x2ab   :  { %2852 = vmatprep.subr.mxu0 %v7352_v0 }
 0x2ac   :  { %2853 = vmatpush2.msra.mxu0 %v1066_v50  ;;  %v1785_v46 = vpop.f32.mrf.mxu0  ;;  %v1990_v32 = vpop.f32.mrf.mxu1  ;;  %v664_v50 = vld [vmem:[#allocation2 + $0xcf0] sm:$0xff] }
 0x2ad   :  { %2554 = vmatmul.mubr.f32.gmra.mxu0 %v585_v26  ;;  %2759 = vmatmul.mubr.f32.gmra.mxu1 %v587_v18  ;;  %v1786_v21 = vadd.f32 %v1785_v46, %v6284_v42  ;;  %v1061_v18 = vld [vmem:[#allocation7 + $0x8b8] sm:$0xff]  ;;  %v663_v46 = vld [vmem:[#allocation2 + $0xce8] sm:$0xff] }
 0x2ae   :  { %2854 = vmatprep.subr.mxu0 %v7352_v0  ;;  %2558 = vmatprep.mubr.f32.mxu0 %v605_v28  ;;  %v1787_v40 = vpop.f32.mrf.mxu0  ;;  %v1992_v43 = vpop.f32.mrf.mxu1 }
 0x2af   :  { %2763 = vmatprep.mubr.f32.mxu1 %v607_v29  ;;  %2855 = vmatpush2.msra.mxu0 %v1065_v1  ;;  %v6419_v34 = vadd.f32 %v1990_v32, %v1786_v21  ;;  %v661_v1 = vld [vmem:[#allocation2 + $0xcd8] sm:$0xff]  ;;  %v683_v21 = vld [vmem:[#allocation2 + $0xd88] sm:$0xff] }
 0x2b0   :  { %2856 = vmatprep.subr.mxu0 %v7352_v0  ;;  %v681_v32 = vld [vmem:[#allocation2 + $0xd78] sm:$0xff]  ;;  %v1060_v43 = vld [vmem:[#allocation7 + $0x8b0] sm:$0xff] }
 0x2b1   :  { %2559 = vmatmul.mubr.f32.gmra.mxu0 %v604_v3  ;;  %2764 = vmatmul.mubr.f32.gmra.mxu1 %v606_v38  ;;  %v2060_v51 = vpop.f32.mrf.mxu0  ;;  %v2265_v42 = vpop.f32.mrf.mxu1 }
 0x2b2   :  { %2563 = vmatprep.mubr.f32.mxu0 %v624_v44  ;;  %2768 = vmatprep.mubr.f32.mxu1 %v626_v13  ;;  %v2061_v16 = vadd.f32 %v2060_v51, %v6291_v5  ;;  %v682_v51 = vld [vmem:[#allocation2 + $0xd80] sm:$0xff] }
 0x2b3   :  { %2857 = vmatpush2.msra.mxu0 %v1064_v45  ;;  %v2062_v61 = vpop.f32.mrf.mxu0  ;;  %v2267_v6 = vpop.f32.mrf.mxu1  ;;  %v680_v45 = vld [vmem:[#allocation2 + $0xd70] sm:$0xff] }
 0x2b4   :  { %2858 = vmatprep.subr.mxu0 %v7352_v0  ;;  %v6424_v53 = vadd.f32 %v2265_v42, %v2061_v16  ;;  %v700_v42 = vld [vmem:[#allocation2 + $0xe10] sm:$0xff] }
 0x2b5   :  { %2564 = vmatmul.mubr.f32.gmra.mxu0 %v623_v60  ;;  %2769 = vmatmul.mubr.f32.gmra.mxu1 %v625_v52  ;;  %v2065_v14 = vpop.f32.mrf.mxu0  ;;  %v2270_v9 = vpop.f32.mrf.mxu1  ;;  %v702_v60 = vld [vmem:[#allocation2 + $0xe20] sm:$0xff] }
 0x2b6   :  { %2859 = vmatpush2.msra.mxu0 %v1063_v56  ;;  %2568 = vmatprep.mubr.f32.mxu0 %v643_v62  ;;  %v2066_v5 = vadd.f32 %v2065_v14, %v6296_v22  ;;  %v1059_v62 = vld [vmem:[#allocation7 + $0x8a8] sm:$0xff]  ;;  %v719_v14 = vld [vmem:[#allocation2 + $0xea8] sm:$0xff] }
 0x2b7   :  { %2773 = vmatprep.mubr.f32.mxu1 %v645_v7  ;;  %2860 = vmatprep.subr.mxu0 %v7352_v0  ;;  %v2067_v19 = vpop.f32.mrf.mxu0  ;;  %v2272_v23 = vpop.f32.mrf.mxu1  ;;  %v699_v7 = vld [vmem:[#allocation2 + $0xe08] sm:$0xff] }
 0x2b8   :  { %2861 = vmatpush2.msra.mxu0 %v1062_v55  ;;  %v6428_v26 = vadd.f32 %v2270_v9, %v2066_v5  ;;  %v701_v55 = vld [vmem:[#allocation2 + $0xe18] sm:$0xff]  ;;  %v718_v23 = vld [vmem:[#allocation2 + $0xea0] sm:$0xff] }
 0x2b9   :  { %2569 = vmatmul.mubr.f32.gmra.mxu0 %v642_v30  ;;  %2774 = vmatmul.mubr.f32.gmra.mxu1 %v644_v58  ;;  %v2070_v28 = vpop.f32.mrf.mxu0  ;;  %v2275_v29 = vpop.f32.mrf.mxu1  ;;  %v721_v9 = vld [vmem:[#allocation2 + $0xeb8] sm:$0xff] }
 0x2ba   :  { %2573 = vmatprep.mubr.f32.mxu0 %v662_v11  ;;  %2778 = vmatprep.mubr.f32.mxu1 %v664_v50  ;;  %v2071_v22 = vadd.f32 %v2070_v28, %v6300_v41  ;;  %v1058_v11 = vld [vmem:[#allocation7 + $0x8a0] sm:$0xff]  ;;  %v738_v28 = vld [vmem:[#allocation2 + $0xf40] sm:$0xff] }
 0x2bb   :  { %2862 = vmatprep.subr.mxu0 %v7352_v0  ;;  %v2072_v3 = vpop.f32.mrf.mxu0  ;;  %v2277_v38 = vpop.f32.mrf.mxu1 }
 0x2bc   :  { %2863 = vmatpush2.msra.mxu0 %v1061_v18  ;;  %v6432_v40 = vadd.f32 %v2275_v29, %v2071_v22  ;;  %v720_v18 = vld [vmem:[#allocation2 + $0xeb0] sm:$0xff]  ;;  %v737_v38 = vld [vmem:[#allocation2 + $0xf38] sm:$0xff] }
 0x2bd   :  { %2574 = vmatmul.mubr.f32.gmra.mxu0 %v661_v1  ;;  %2779 = vmatmul.mubr.f32.gmra.mxu1 %v663_v46  ;;  %v2075_v44 = vpop.f32.mrf.mxu0  ;;  %v2280_v13 = vpop.f32.mrf.mxu1  ;;  %v740_v46 = vld [vmem:[#allocation2 + $0xf50] sm:$0xff] }
 0x2be   :  { %2578 = vmatprep.mubr.f32.mxu0 %v681_v32  ;;  %2783 = vmatprep.mubr.f32.mxu1 %v683_v21  ;;  %v2076_v41 = vadd.f32 %v2075_v44, %v6306_v59  ;;  %v1057_v22 = vld [vmem:[#allocation7 + $0x898] sm:$0xff]  ;;  %v757_v44 = vld [vmem:[#allocation2 + $0xfd8] sm:$0xff] }
 0x2bf   :  { %2864 = vmatprep.subr.mxu0 %v7352_v0  ;;  %v2077_v52 = vpop.f32.mrf.mxu0  ;;  %v2282_v16 = vpop.f32.mrf.mxu1 }
 0x2c0   :  { %2865 = vmatpush2.msra.mxu0 %v1060_v43  ;;  %v6436_v56 = vadd.f32 %v2280_v13, %v2076_v41  ;;  %v739_v43 = vld [vmem:[#allocation2 + $0xf48] sm:$0xff]  ;;  %v756_v16 = vld [vmem:[#allocation2 + $0xfd0] sm:$0xff] }
 0x2c1   :  { %2579 = vmatmul.mubr.f32.gmra.mxu0 %v680_v45  ;;  %2784 = vmatmul.mubr.f32.gmra.mxu1 %v682_v51  ;;  %v2080_v61 = vpop.f32.mrf.mxu0  ;;  %v2285_v6 = vpop.f32.mrf.mxu1  ;;  %v759_v13 = vld [vmem:[#allocation2 + $0xfe8] sm:$0xff] }
 0x2c2   :  { %2583 = vmatprep.mubr.f32.mxu0 %v700_v42  ;;  %2788 = vmatprep.mubr.f32.mxu1 %v702_v60  ;;  %v2081_v59 = vadd.f32 %v2080_v61, %v6311_v17  ;;  %v1056_v41 = vld [vmem:[#allocation7 + $0x890] sm:$0xff]  ;;  %v1055_v61 = vld [vmem:[#allocation7 + $0x888] sm:$0xff] }
 0x2c3   :  { %2866 = vmatprep.subr.mxu0 %v7352_v0  ;;  %v2082_v30 = vpop.f32.mrf.mxu0  ;;  %v2287_v58 = vpop.f32.mrf.mxu1 }
 0x2c4   :  { %2867 = vmatpush2.msra.mxu0 %v1059_v62  ;;  %v6440_v5 = vadd.f32 %v2285_v6, %v2081_v59  ;;  %v758_v62 = vld [vmem:[#allocation2 + $0xfe0] sm:$0xff]  ;;  %v776_v6 = vld [vmem:[#allocation2 + $0x1070] sm:$0xff] }
 0x2c5   :  { %2584 = vmatmul.mubr.f32.gmra.mxu0 %v699_v7  ;;  %2789 = vmatmul.mubr.f32.gmra.mxu1 %v701_v55  ;;  %v2085_v50 = vpop.f32.mrf.mxu0  ;;  %v2290_v19 = vpop.f32.mrf.mxu1  ;;  %v778_v59 = vld [vmem:[#allocation2 + $0x1080] sm:$0xff] }
 0x2c6   :  { %2588 = vmatprep.mubr.f32.mxu0 %v719_v14  ;;  %2793 = vmatprep.mubr.f32.mxu1 %v721_v9  ;;  %v2086_v17 = vadd.f32 %v2085_v50, %v6316_v33  ;;  %v1054_v9 = vld [vmem:[#allocation7 + $0x880] sm:$0xff] }
 0x2c7   :  { %2868 = vmatprep.subr.mxu0 %v7352_v0  ;;  %v2087_v29 = vpop.f32.mrf.mxu0  ;;  %v2292_v1 = vpop.f32.mrf.mxu1  ;;  %v777_v50 = vld [vmem:[#allocation2 + $0x1078] sm:$0xff] }
 0x2c8   :  { %2869 = vmatpush2.msra.mxu0 %v1058_v11  ;;  %v6444_v32 = vadd.f32 %v2290_v19, %v2086_v17  ;;  %v775_v11 = vld [vmem:[#allocation2 + $0x1068] sm:$0xff] }
 0x2c9   :  { %2589 = vmatmul.mubr.f32.gmra.mxu0 %v718_v23  ;;  %2794 = vmatmul.mubr.f32.gmra.mxu1 %v720_v18  ;;  %v2090_v21 = vpop.f32.mrf.mxu0  ;;  %v2295_v3 = vpop.f32.mrf.mxu1  ;;  %v267_v19 = vld [vmem:[#allocation2 + $0x88] sm:$0xff]  ;;  %v268_v23 = vld [vmem:[#allocation2 + $0x90] sm:$0xff] }
 0x2ca   :  { %2870 = vmatprep.subr.mxu0 %v7352_v0  ;;  %2593 = vmatprep.mubr.f32.mxu0 %v738_v28  ;;  %v2091_v33 = vadd.f32 %v2090_v21, %v6322_v54  ;;  %v286_v21 = vld [vmem:[#allocation2 + $0x120] sm:$0xff] }
 0x2cb   :  { %2798 = vmatprep.mubr.f32.mxu1 %v740_v46  ;;  %2871 = vmatpush2.msra.mxu0 %v1057_v22  ;;  %v2092_v45 = vpop.f32.mrf.mxu0  ;;  %v2297_v51 = vpop.f32.mrf.mxu1  ;;  %v266_v46 = vld [vmem:[#allocation2 + $0x80] sm:$0xff] }
 0x2cc   :  { %2872 = vmatprep.subr.mxu0 %v7352_v0  ;;  %v6449_v42 = vadd.f32 %v2295_v3, %v2091_v33  ;;  %v285_v45 = vld [vmem:[#allocation2 + $0x118] sm:$0xff] }
 0x2cd   :  { %2594 = vmatmul.mubr.f32.gmra.mxu0 %v737_v38  ;;  %2799 = vmatmul.mubr.f32.gmra.mxu1 %v739_v43  ;;  %v2095_v60 = vpop.f32.mrf.mxu0  ;;  %v2300_v52 = vpop.f32.mrf.mxu1  ;;  %v306_v43 = vld [vmem:[#allocation2 + $0x1c0] sm:$0xff] }
 0x2ce   :  { %2598 = vmatprep.mubr.f32.mxu0 %v757_v44  ;;  %2803 = vmatprep.mubr.f32.mxu1 %v759_v13  ;;  %v2096_v54 = vadd.f32 %v2095_v60, %v6328_v8  ;;  %v305_v60 = vld [vmem:[#allocation2 + $0x1b8] sm:$0xff] }
 0x2cf   :  { %2873 = vmatpush2.msra.mxu0 %v1056_v41  ;;  %v2097_v7 = vpop.f32.mrf.mxu0  ;;  %v2302_v55 = vpop.f32.mrf.mxu1  ;;  %v325_v41 = vld [vmem:[#allocation2 + $0x258] sm:$0xff] }
 0x2d0   :  { %2874 = vmatprep.subr.mxu0 %v7352_v0  ;;  %v6453_v14 = vadd.f32 %v2300_v52, %v2096_v54  ;;  %v363_v55 = vld [vmem:[#allocation2 + $0x388] sm:$0xff] }
 0x2d1   :  { %2599 = vmatmul.mubr.f32.gmra.mxu0 %v756_v16  ;;  %2804 = vmatmul.mubr.f32.gmra.mxu1 %v758_v62  ;;  %v2100_v30 = vpop.f32.mrf.mxu0  ;;  %v2305_v58 = vpop.f32.mrf.mxu1  ;;  %v344_v16 = vld [vmem:[#allocation2 + $0x2f0] sm:$0xff] }
 0x2d2   :  { %2875 = vmatpush2.msra.mxu0 %v1055_v61  ;;  %2603 = vmatprep.mubr.f32.mxu0 %v776_v6  ;;  %v2101_v8 = vadd.f32 %v2100_v30, %v6333_v31  ;;  %v287_v31 = vld [vmem:[#allocation2 + $0x128] sm:$0xff]  ;;  %v304_v6 = vld [vmem:[#allocation2 + $0x1b0] sm:$0xff]  ;;  %v382_v30 = vld [vmem:[#allocation2 + $0x420] sm:$0xff] }
 0x2d3   :  { %2808 = vmatprep.mubr.f32.mxu1 %v778_v59  ;;  %2876 = vmatprep.subr.mxu0 %v7352_v0  ;;  %v2102_v18 = vpop.f32.mrf.mxu0  ;;  %v2307_v17 = vpop.f32.mrf.mxu1 }
 0x2d4   :  { %2877 = vmatpush2.msra.mxu0 %v1054_v9  ;;  %v6457_v28 = vadd.f32 %v2305_v58, %v2101_v8  ;;  %v323_v8 = vld [vmem:[#allocation2 + $0x248] sm:$0xff] }
 0x2d5   :  { %2604 = vmatmul.mubr.f32.gmra.mxu0 %v775_v11  ;;  %2809 = vmatmul.mubr.f32.gmra.mxu1 %v777_v50  ;;  %v2105_v29 = vpop.f32.mrf.mxu0  ;;  %v2310_v1 = vpop.f32.mrf.mxu1 }
 0x2d6   :  { %2878 = vmatprep.mubr.f32.mxu0 %v267_v19  ;;  %5124 = vmatprep.mubr.msk.f32.mxu1 %vm1089_vm0, %v268_v23  ;;  %v2106_v22 = vadd.f32 %v2105_v29, %v6339_v49  ;;  %v343_v23 = vld [vmem:[#allocation2 + $0x2e8] sm:$0xff]  ;;  %v420_v29 = vld [vmem:[#allocation2 + $0x550] sm:$0xff] }
 0x2d7   :  { %v2107_v3 = vpop.f32.mrf.mxu0  ;;  %v2312_v38 = vpop.f32.mrf.mxu1 }
 0x2d8   :  { %v6461_v33 = vadd.f32 %v2310_v1, %v2106_v22  ;;  %v342_v22 = vld [vmem:[#allocation2 + $0x2e0] sm:$0xff] }
 0x2d9   :  { %2879 = vmatmul.mubr.f32.vlgmr.msra.gmra.mxu0 %v266_v46  ;;  %5125 = vmatmul.mubr.msk.f32.vlgmr.msra.gmra.mxu1 %vm1089_vm0, %v287_v31  ;;  %v2110_v44 = vpop.f32.mrf.mxu0  ;;  %v2315_v13 = vpop.f32.mrf.mxu1  ;;  %v362_v3 = vld [vmem:[#allocation2 + $0x380] sm:$0xff] }
 0x2da   :  { %2883 = vmatprep.mubr.f32.mxu0 %v286_v21  ;;  %5127 = vmatprep.mubr.msk.f32.mxu1 %vm1089_vm0, %v306_v43  ;;  %v2111_v51 = vadd.f32 %v2110_v44, %v6343_v24  ;;  %v324_v24 = vld [vmem:[#allocation2 + $0x250] sm:$0xff]  ;;  %v458_v44 = vld [vmem:[#allocation2 + $0x680] sm:$0xff] }
 0x2db   :  { %v2112_v49 = vpop.f32.mrf.mxu0  ;;  %v2317_v52 = vpop.f32.mrf.mxu1 }
 0x2dc   :  { %v6466_v62 = vadd.f32 %v2315_v13, %v2111_v51  ;;  %v381_v49 = vld [vmem:[#allocation2 + $0x418] sm:$0xff] }
 0x2dd   :  { %2884 = vmatmul.mubr.f32.gmra.mxu0 %v285_v45  ;;  %5128 = vmatmul.mubr.msk.f32.gmra.mxu1 %vm1089_vm0, %v325_v41  ;;  %v2115_v54 = vpop.f32.mrf.mxu0  ;;  %v2320_v61 = vpop.f32.mrf.mxu1  ;;  %v361_v41 = vld [vmem:[#allocation2 + $0x378] sm:$0xff] }
 0x2de   :  { %2888 = vmatprep.mubr.f32.mxu0 %v305_v60  ;;  %v2116_v7 = vadd.f32 %v2115_v54, %v6349_v27  ;;  %5130 = vmatprep.mubr.msk.f32.mxu1 %vm1089_vm0, %v344_v16  ;;  %v401_v27 = vld [vmem:[#allocation2 + $0x4b8] sm:$0xff]  ;;  %v496_v54 = vld [vmem:[#allocation2 + $0x7b0] sm:$0xff] }
 0x2df   :  { %v2117_v59 = vpop.f32.mrf.mxu0  ;;  %v2322_v9 = vpop.f32.mrf.mxu1 }
 0x2e0   :  { %v6471_v58 = vadd.f32 %v2320_v61, %v2116_v7  ;;  %v400_v59 = vld [vmem:[#allocation2 + $0x4b0] sm:$0xff] }
 0x2e1   :  { %2889 = vmatmul.mubr.f32.gmra.mxu0 %v304_v6  ;;  %v2120_v11 = vpop.f32.mrf.mxu0  ;;  %v2325_v50 = vpop.f32.mrf.mxu1  ;;  %5131 = vmatmul.mubr.msk.f32.gmra.mxu1 %vm1089_vm0, %v363_v55  ;;  %v380_v55 = vld [vmem:[#allocation2 + $0x410] sm:$0xff] }
 0x2e2   :  { %2893 = vmatprep.mubr.f32.mxu0 %v324_v24  ;;  %v2121_v19 = vadd.f32 %v2120_v11, %v6354_v47  ;;  %5133 = vmatprep.mubr.msk.f32.mxu1 %vm1089_vm0, %v382_v30  ;;  %v439_v47 = vld [vmem:[#allocation2 + $0x5e8] sm:$0xff]  ;;  %v534_v11 = vld [vmem:[#allocation2 + $0x8e0] sm:$0xff] }
 0x2e3   :  { %v2122_v18 = vpop.f32.mrf.mxu0  ;;  %v2327_v17 = vpop.f32.mrf.mxu1 }
 0x2e4   :  { %v6476_v1 = vadd.f32 %v2325_v50, %v2121_v19  ;;  %v419_v18 = vld [vmem:[#allocation2 + $0x548] sm:$0xff] }
 0x2e5   :  { %2894 = vmatmul.mubr.f32.gmra.mxu0 %v323_v8  ;;  %v2125_v46 = vpop.f32.mrf.mxu0  ;;  %v2330_v31 = vpop.f32.mrf.mxu1  ;;  %5134 = vmatmul.mubr.msk.f32.gmra.mxu1 %vm1089_vm0, %v401_v27  ;;  %v399_v27 = vld [vmem:[#allocation2 + $0x4a8] sm:$0xff] }
 0x2e6   :  { %2898 = vmatprep.mubr.f32.mxu0 %v343_v23  ;;  %v2126_v21 = vadd.f32 %v2125_v46, %v6358_v4  ;;  %5136 = vmatprep.mubr.msk.f32.mxu1 %vm1089_vm0, %v420_v29  ;;  %v477_v4 = vld [vmem:[#allocation2 + $0x718] sm:$0xff]  ;;  %v572_v46 = vld [vmem:[#allocation2 + $0xa10] sm:$0xff] }
 0x2e7   :  { %v2127_v38 = vpop.f32.mrf.mxu0  ;;  %v2332_v43 = vpop.f32.mrf.mxu1 }
 0x2e8   :  { %v6481_v13 = vadd.f32 %v2330_v31, %v2126_v21  ;;  %v438_v38 = vld [vmem:[#allocation2 + $0x5e0] sm:$0xff] }
 0x2e9   :  { %2899 = vmatmul.mubr.f32.gmra.mxu0 %v342_v22  ;;  %v2130_v45 = vpop.f32.mrf.mxu0  ;;  %v2335_v51 = vpop.f32.mrf.mxu1  ;;  %5137 = vmatmul.mubr.msk.f32.gmra.mxu1 %vm1089_vm0, %v439_v47  ;;  %v418_v47 = vld [vmem:[#allocation2 + $0x540] sm:$0xff] }
 0x2ea   :  { %2903 = vmatprep.mubr.f32.mxu0 %v362_v3  ;;  %v2131_v60 = vadd.f32 %v2130_v45, %v6362_v36  ;;  %5139 = vmatprep.mubr.msk.f32.mxu1 %vm1089_vm0, %v458_v44  ;;  %v515_v36 = vld [vmem:[#allocation2 + $0x848] sm:$0xff]  ;;  %v610_v45 = vld [vmem:[#allocation2 + $0xb40] sm:$0xff] }
 0x2eb   :  { %v2132_v52 = vpop.f32.mrf.mxu0  ;;  %v2337_v16 = vpop.f32.mrf.mxu1 }
 0x2ec   :  { %v6486_v61 = vadd.f32 %v2335_v51, %v2131_v60  ;;  %v457_v52 = vld [vmem:[#allocation2 + $0x678] sm:$0xff] }
 0x2ed   :  { %2904 = vmatmul.mubr.f32.gmra.mxu0 %v361_v41  ;;  %v2135_v6 = vpop.f32.mrf.mxu0  ;;  %v2340_v7 = vpop.f32.mrf.mxu1  ;;  %5140 = vmatmul.mubr.msk.f32.gmra.mxu1 %vm1089_vm0, %v477_v4  ;;  %v437_v4 = vld [vmem:[#allocation2 + $0x5d8] sm:$0xff] }
 0x2ee   :  { %2908 = vmatprep.mubr.f32.mxu0 %v381_v49  ;;  %v2136_v24 = vadd.f32 %v2135_v6, %v6367_v48  ;;  %5142 = vmatprep.mubr.msk.f32.mxu1 %vm1089_vm0, %v496_v54  ;;  %v553_v48 = vld [vmem:[#allocation2 + $0x978] sm:$0xff]  ;;  %v648_v6 = vld [vmem:[#allocation2 + $0xc70] sm:$0xff] }
 0x2ef   :  { %v2137_v9 = vpop.f32.mrf.mxu0  ;;  %v2342_v30 = vpop.f32.mrf.mxu1 }
 0x2f0   :  { %v6491_v50 = vadd.f32 %v2340_v7, %v2136_v24  ;;  %v476_v9 = vld [vmem:[#allocation2 + $0x710] sm:$0xff] }
 0x2f1   :  { %2909 = vmatmul.mubr.f32.gmra.mxu0 %v380_v55  ;;  %v2140_v8 = vpop.f32.mrf.mxu0  ;;  %v2345_v19 = vpop.f32.mrf.mxu1  ;;  %5143 = vmatmul.mubr.msk.f32.gmra.mxu1 %vm1089_vm0, %v515_v36  ;;  %v456_v36 = vld [vmem:[#allocation2 + $0x670] sm:$0xff] }
 0x2f2   :  { %2913 = vmatprep.mubr.f32.mxu0 %v400_v59  ;;  %v2141_v23 = vadd.f32 %v2140_v8, %v6371_v2  ;;  %5145 = vmatprep.mubr.msk.f32.mxu1 %vm1089_vm0, %v534_v11  ;;  %v591_v2 = vld [vmem:[#allocation2 + $0xaa8] sm:$0xff]  ;;  %v686_v8 = vld [vmem:[#allocation2 + $0xda0] sm:$0xff] }
 0x2f3   :  { %v2142_v17 = vpop.f32.mrf.mxu0  ;;  %v2347_v29 = vpop.f32.mrf.mxu1 }
 0x2f4   :  { %v6496_v31 = vadd.f32 %v2345_v19, %v2141_v23  ;;  %v495_v17 = vld [vmem:[#allocation2 + $0x7a8] sm:$0xff] }
 0x2f5   :  { %2914 = vmatmul.mubr.f32.gmra.mxu0 %v399_v27  ;;  %v2145_v22 = vpop.f32.mrf.mxu0  ;;  %v2350_v21 = vpop.f32.mrf.mxu1  ;;  %5146 = vmatmul.mubr.msk.f32.gmra.mxu1 %vm1089_vm0, %v553_v48  ;;  %v475_v48 = vld [vmem:[#allocation2 + $0x708] sm:$0xff] }
 0x2f6   :  { %2918 = vmatprep.mubr.f32.mxu0 %v419_v18  ;;  %v2146_v3 = vadd.f32 %v2145_v22, %v6375_v10  ;;  %5148 = vmatprep.mubr.msk.f32.mxu1 %vm1089_vm0, %v572_v46  ;;  %v629_v10 = vld [vmem:[#allocation2 + $0xbd8] sm:$0xff]  ;;  %v724_v22 = vld [vmem:[#allocation2 + $0xed0] sm:$0xff] }
 0x2f7   :  { %v2147_v43 = vpop.f32.mrf.mxu0  ;;  %v2352_v44 = vpop.f32.mrf.mxu1 }
 0x2f8   :  { %v6501_v51 = vadd.f32 %v2350_v21, %v2146_v3  ;;  %v514_v43 = vld [vmem:[#allocation2 + $0x840] sm:$0xff] }
 0x2f9   :  { %2919 = vmatmul.mubr.f32.gmra.mxu0 %v418_v47  ;;  %v2150_v41 = vpop.f32.mrf.mxu0  ;;  %v2355_v60 = vpop.f32.mrf.mxu1  ;;  %5149 = vmatmul.mubr.msk.f32.gmra.mxu1 %vm1089_vm0, %v591_v2  ;;  %v494_v2 = vld [vmem:[#allocation2 + $0x7a0] sm:$0xff] }
 0x2fa   :  { %2923 = vmatprep.mubr.f32.mxu0 %v438_v38  ;;  %v2151_v49 = vadd.f32 %v2150_v41, %v6379_v39  ;;  %5151 = vmatprep.mubr.msk.f32.mxu1 %vm1089_vm0, %v610_v45  ;;  %v667_v39 = vld [vmem:[#allocation2 + $0xd08] sm:$0xff]  ;;  %v762_v41 = vld [vmem:[#allocation2 + $0x1000] sm:$0xff] }
 0x2fb   :  { %v2152_v16 = vpop.f32.mrf.mxu0  ;;  %v2357_v54 = vpop.f32.mrf.mxu1 }
 0x2fc   :  { %v6506_v7 = vadd.f32 %v2355_v60, %v2151_v49 }
 0x2fd   :  { %2924 = vmatmul.mubr.f32.gmra.mxu0 %v437_v4  ;;  %v2155_v55 = vpop.f32.mrf.mxu0  ;;  %v2360_v24 = vpop.f32.mrf.mxu1  ;;  %5152 = vmatmul.mubr.msk.f32.gmra.mxu1 %vm1089_vm0, %v629_v10  ;;  %v513_v4 = vld [vmem:[#allocation2 + $0x838] sm:$0xff] }
 0x2fe   :  { %2928 = vmatprep.mubr.f32.mxu0 %v457_v52  ;;  %v2156_v59 = vadd.f32 %v2155_v55, %v6383_v37  ;;  %5154 = vmatprep.mubr.msk.f32.mxu1 %vm1089_vm0, %v648_v6  ;;  %v705_v37 = vld [vmem:[#allocation2 + $0xe38] sm:$0xff] }
 0x2ff   :  { %v2157_v30 = vpop.f32.mrf.mxu0  ;;  %v2362_v11 = vpop.f32.mrf.mxu1  ;;  %v781_v52 = vld [vmem:[#allocation2 + $0x1098] sm:$0xff] }
 0x300   :  { %v6511_v19 = vadd.f32 %v2360_v24, %v2156_v59  ;;  %v532_v24 = vld [vmem:[#allocation2 + $0x8d0] sm:$0xff] }
 0x301   :  { %2929 = vmatmul.mubr.f32.gmra.mxu0 %v456_v36  ;;  %v2160_v27 = vpop.f32.mrf.mxu0  ;;  %v2365_v23 = vpop.f32.mrf.mxu1  ;;  %5155 = vmatmul.mubr.msk.f32.gmra.mxu1 %vm1089_vm0, %v667_v39  ;;  %v552_v36 = vld [vmem:[#allocation2 + $0x970] sm:$0xff] }
 0x302   :  { %2933 = vmatprep.mubr.f32.mxu0 %v476_v9  ;;  %v2161_v18 = vadd.f32 %v2160_v27, %v6387_v15  ;;  %5157 = vmatprep.mubr.msk.f32.mxu1 %vm1089_vm0, %v686_v8  ;;  %v743_v15 = vld [vmem:[#allocation2 + $0xf68] sm:$0xff] }
 0x303   :  { %v2162_v29 = vpop.f32.mrf.mxu0  ;;  %v2367_v46 = vpop.f32.mrf.mxu1  ;;  %v571_v27 = vld [vmem:[#allocation2 + $0xa08] sm:$0xff] }
 0x304   :  { %v6516_v21 = vadd.f32 %v2365_v23, %v2161_v18  ;;  %v590_v46 = vld [vmem:[#allocation2 + $0xaa0] sm:$0xff] }
 0x305   :  { %2934 = vmatmul.mubr.f32.gmra.mxu0 %v475_v48  ;;  %v2165_v47 = vpop.f32.mrf.mxu0  ;;  %v2370_v3 = vpop.f32.mrf.mxu1  ;;  %5158 = vmatmul.mubr.msk.f32.gmra.mxu1 %vm1089_vm0, %v705_v37  ;;  %v570_v37 = vld [vmem:[#allocation2 + $0xa00] sm:$0xff] }
 0x306   :  { %2938 = vmatprep.mubr.f32.mxu0 %v495_v17  ;;  %v2166_v38 = vadd.f32 %v2165_v47, %v6391_v25  ;;  %5160 = vmatprep.mubr.msk.f32.mxu1 %vm1089_vm0, %v724_v22  ;;  %v533_v25 = vld [vmem:[#allocation2 + $0x8d8] sm:$0xff] }
 0x307   :  { %v2167_v44 = vpop.f32.mrf.mxu0  ;;  %v2372_v45 = vpop.f32.mrf.mxu1 }
 0x308   :  { %v6521_v60 = vadd.f32 %v2370_v3, %v2166_v38  ;;  %v589_v3 = vld [vmem:[#allocation2 + $0xa98] sm:$0xff] }
 0x309   :  { %2939 = vmatmul.mubr.f32.gmra.mxu0 %v494_v2  ;;  %5161 = vmatmul.mubr.msk.f32.gmra.mxu1 %vm1089_vm0, %v743_v15  ;;  %v609_v38 = vld [vmem:[#allocation2 + $0xb38] sm:$0xff] }
 0x30a   :  { %2943 = vmatprep.mubr.f32.mxu0 %v514_v43  ;;  %v2170_v49 = vpop.f32.mrf.mxu0  ;;  %v2375_v10 = vpop.f32.mrf.mxu1  ;;  %5163 = vmatprep.mubr.msk.f32.mxu1 %vm1089_vm0, %v762_v41 }
 0x30b   :  { %v2171_v16 = vadd.f32 %v2170_v49, %v6396_v57  ;;  %v551_v57 = vld [vmem:[#allocation2 + $0x968] sm:$0xff] }
 0x30c   :  { %v2172_v54 = vpop.f32.mrf.mxu0  ;;  %v2377_v6 = vpop.f32.mrf.mxu1 }
 0x30d   :  { %2944 = vmatmul.mubr.f32.gmra.mxu0 %v513_v4  ;;  %v6526_v55 = vadd.f32 %v2375_v10, %v2171_v16  ;;  %5164 = vmatmul.mubr.msk.f32.gmra.mxu1 %vm1089_vm0, %v781_v52  ;;  %v628_v4 = vld [vmem:[#allocation2 + $0xbd0] sm:$0xff]  ;;  %v647_v16 = vld [vmem:[#allocation2 + $0xc68] sm:$0xff] }
 0x30e   :  { %2948 = vmatprep.mubr.f32.mxu0 %v533_v25 }
 0x30f   :  { %v2175_v59 = vpop.f32.mrf.mxu0 }
 0x310   :  { %v2176_v39 = vadd.f32 %v2175_v59, %v6400_v20  ;;  %v2380_v9 = vpop.f32.mrf.mxu1 }
 0x311   :  { %2949 = vmatmul.mubr.f32.gmra.mxu0 %v532_v24  ;;  %v2177_v30 = vpop.f32.mrf.mxu0 }
 0x312   :  { %2953 = vmatprep.mubr.f32.mxu0 %v552_v36  ;;  %v6530_v11 = vadd.f32 %v2380_v9, %v2176_v39  ;;  %v2382_v8 = vpop.f32.mrf.mxu1  ;;  %v646_v39 = vld [vmem:[#allocation2 + $0xc60] sm:$0xff] }
 0x314   :  { %v2180_v23 = vpop.f32.mrf.mxu0 }
 0x315   :  { %2954 = vmatmul.mubr.f32.gmra.mxu0 %v551_v57  ;;  %v2181_v48 = vadd.f32 %v2180_v23, %v6405_v35  ;;  %v2385_v18 = vpop.f32.mrf.mxu1  ;;  %v608_v35 = vld [vmem:[#allocation2 + $0xb30] sm:$0xff] }
 0x316   :  { %2958 = vmatprep.mubr.f32.mxu0 %v571_v27  ;;  %v2182_v17 = vpop.f32.mrf.mxu0  ;;  %v665_v27 = vld [vmem:[#allocation2 + $0xcf8] sm:$0xff] }
 0x317   :  { %v6533_v29 = vadd.f32 %v2385_v18, %v2181_v48  ;;  %v2387_v20 = vpop.f32.mrf.mxu1  ;;  %v685_v18 = vld [vmem:[#allocation2 + $0xd98] sm:$0xff] }
 0x319   :  { %2959 = vmatmul.mubr.f32.gmra.mxu0 %v570_v37 }
 0x31a   :  { %2963 = vmatprep.mubr.f32.mxu0 %v590_v46  ;;  %v2185_v22 = vpop.f32.mrf.mxu0  ;;  %v2390_v47 = vpop.f32.mrf.mxu1  ;;  %v684_v46 = vld [vmem:[#allocation2 + $0xd90] sm:$0xff] }
 0x31b   :  { %v2186_v2 = vadd.f32 %v2185_v22, %v6409_v63  ;;  %v627_v63 = vld [vmem:[#allocation2 + $0xbc8] sm:$0xff] }
 0x31c   :  { %v2187_v15 = vpop.f32.mrf.mxu0  ;;  %v2392_v43 = vpop.f32.mrf.mxu1 }
 0x31d   :  { %v6536_v44 = vadd.f32 %v2390_v47, %v2186_v2  ;;  %2964 = vmatmul.mubr.f32.gmra.mxu0 %v589_v3  ;;  %v704_v3 = vld [vmem:[#allocation2 + $0xe30] sm:$0xff]  ;;  %v703_v43 = vld [vmem:[#allocation2 + $0xe28] sm:$0xff] }
 0x31e   :  { %2968 = vmatprep.mubr.f32.mxu0 %v609_v38 }
 0x31f   :  { %v2190_v45 = vpop.f32.mrf.mxu0  ;;  %v2395_v41 = vpop.f32.mrf.mxu1 }
 0x320   :  { %v2191_v49 = vadd.f32 %v2190_v45, %v6414_v12  ;;  %v666_v12 = vld [vmem:[#allocation2 + $0xd00] sm:$0xff] }
 0x321   :  { %2969 = vmatmul.mubr.f32.gmra.mxu0 %v608_v35  ;;  %v2192_v10 = vpop.f32.mrf.mxu0  ;;  %v2397_v52 = vpop.f32.mrf.mxu1 }
 0x322   :  { %v6539_v25 = vadd.f32 %v2395_v41, %v2191_v49  ;;  %2973 = vmatprep.mubr.f32.mxu0 %v628_v4  ;;  %v723_v41 = vld [vmem:[#allocation2 + $0xec8] sm:$0xff]  ;;  %v722_v52 = vld [vmem:[#allocation2 + $0xec0] sm:$0xff] }
 0x324   :  { %v2195_v54 = vpop.f32.mrf.mxu0  ;;  %v2400_v6 = vpop.f32.mrf.mxu1 }
 0x325   :  { %v2196_v24 = vadd.f32 %v2195_v54, %v6419_v34  ;;  %2974 = vmatmul.mubr.f32.gmra.mxu0 %v627_v63  ;;  %v742_v54 = vld [vmem:[#allocation2 + $0xf60] sm:$0xff] }
 0x326   :  { %v2197_v36 = vpop.f32.mrf.mxu0  ;;  %v2402_v59 = vpop.f32.mrf.mxu1  ;;  %2978 = vmatprep.mubr.f32.mxu0 %v647_v16 }
 0x327   :  { %v6542_v9 = vadd.f32 %v2400_v6, %v2196_v24  ;;  %v741_v59 = vld [vmem:[#allocation2 + $0xf58] sm:$0xff] }
 0x329   :  { %v2470_v30 = vpop.f32.mrf.mxu0  ;;  %v2675_v57 = vpop.f32.mrf.mxu1  ;;  %2979 = vmatmul.mubr.f32.gmra.mxu0 %v646_v39 }
 0x32a   :  { %v2471_v8 = vadd.f32 %v2470_v30, %v6424_v53  ;;  %2983 = vmatprep.mubr.f32.mxu0 %v666_v12  ;;  %v761_v30 = vld [vmem:[#allocation2 + $0xff8] sm:$0xff] }
 0x32b   :  { %v2472_v23 = vpop.f32.mrf.mxu0  ;;  %v2677_v48 = vpop.f32.mrf.mxu1 }
 0x32c   :  { %v6545_v37 = vadd.f32 %v2675_v57, %v2471_v8  ;;  %v760_v23 = vld [vmem:[#allocation2 + $0xff0] sm:$0xff] }
 0x32d   :  { %v2475_v34 = vpop.f32.mrf.mxu0  ;;  %v2680_v17 = vpop.f32.mrf.mxu1  ;;  %2984 = vmatmul.mubr.f32.gmra.mxu0 %v665_v27 }
 0x32e   :  { %v2476_v20 = vadd.f32 %v2475_v34, %v6428_v26  ;;  %2988 = vmatprep.mubr.f32.mxu0 %v685_v18  ;;  %v780_v34 = vld [vmem:[#allocation2 + $0x1090] sm:$0xff] }
 0x32f   :  { %v2477_v22 = vpop.f32.mrf.mxu0  ;;  %v2682_v47 = vpop.f32.mrf.mxu1 }
 0x330   :  { %v6548_v2 = vadd.f32 %v2680_v17, %v2476_v20  ;;  %v779_v22 = vld [vmem:[#allocation2 + $0x1088] sm:$0xff] }
 0x331   :  { %v2480_v53 = vpop.f32.mrf.mxu0  ;;  %v2685_v38 = vpop.f32.mrf.mxu1  ;;  %2989 = vmatmul.mubr.f32.gmra.mxu0 %v684_v46 }
 0x332   :  { %v2481_v15 = vadd.f32 %v2480_v53, %v6432_v40  ;;  %2993 = vmatprep.mubr.f32.mxu0 %v704_v3 }
 0x333   :  { %v2482_v35 = vpop.f32.mrf.mxu0  ;;  %v2687_v45 = vpop.f32.mrf.mxu1 }
 0x334   :  { %v6551_v4 = vadd.f32 %v2685_v38, %v2481_v15 }
 0x335   :  { %v2485_v26 = vpop.f32.mrf.mxu0  ;;  %v2690_v49 = vpop.f32.mrf.mxu1  ;;  %2994 = vmatmul.mubr.f32.gmra.mxu0 %v703_v43 }
 0x336   :  { %v2486_v10 = vadd.f32 %v2485_v26, %v6436_v56  ;;  %2998 = vmatprep.mubr.f32.mxu0 %v723_v41 }
 0x337   :  { %v2487_v63 = vpop.f32.mrf.mxu0  ;;  %v2692_v16 = vpop.f32.mrf.mxu1 }
 0x338   :  { %v6554_v6 = vadd.f32 %v2690_v49, %v2486_v10 }
 0x339   :  { %v2490_v40 = vpop.f32.mrf.mxu0  ;;  %v2695_v24 = vpop.f32.mrf.mxu1  ;;  %2999 = vmatmul.mubr.f32.gmra.mxu0 %v722_v52 }
 0x33a   :  { %v2491_v36 = vadd.f32 %v2490_v40, %v6440_v5  ;;  %3003 = vmatprep.mubr.f32.mxu0 %v742_v54 }
 0x33b   :  { %v2492_v39 = vpop.f32.mrf.mxu0  ;;  %v2697_v12 = vpop.f32.mrf.mxu1 }
 0x33c   :  { %v6557_v57 = vadd.f32 %v2695_v24, %v2491_v36 }
 0x33d   :  { %v2495_v56 = vpop.f32.mrf.mxu0  ;;  %v2700_v8 = vpop.f32.mrf.mxu1  ;;  %3004 = vmatmul.mubr.f32.gmra.mxu0 %v741_v59 }
 0x33e   :  { %v2496_v27 = vadd.f32 %v2495_v56, %v6444_v32  ;;  %3008 = vmatprep.mubr.f32.mxu0 %v761_v30 }
 0x33f   :  { %v2497_v48 = vpop.f32.mrf.mxu0  ;;  %v2702_v18 = vpop.f32.mrf.mxu1 }
 0x340   :  { %v6560_v17 = vadd.f32 %v2700_v8, %v2496_v27 }
 0x341   :  { %v2500_v5 = vpop.f32.mrf.mxu0  ;;  %v2705_v20 = vpop.f32.mrf.mxu1  ;;  %3009 = vmatmul.mubr.f32.gmra.mxu0 %v760_v23 }
 0x342   :  { %v2501_v46 = vadd.f32 %v2500_v5, %v6449_v42  ;;  %3013 = vmatprep.mubr.f32.mxu0 %v780_v34 }
 0x343   :  { %v2502_v47 = vpop.f32.mrf.mxu0  ;;  %v2707_v3 = vpop.f32.mrf.mxu1 }
 0x344   :  { %v6563_v53 = vadd.f32 %v2705_v20, %v2501_v46 }
 0x345   :  { %v2505_v38 = vpop.f32.mrf.mxu0  ;;  %v2710_v32 = vpop.f32.mrf.mxu1  ;;  %3014 = vmatmul.mubr.f32.gmra.mxu0 %v779_v22 }
 0x346   :  { %v2506_v15 = vadd.f32 %v2505_v38, %v6453_v14 }
 0x347   :  { %v2507_v43 = vpop.f32.mrf.mxu0  ;;  %v2712_v35 = vpop.f32.mrf.mxu1 }
 0x348   :  { %v6566_v45 = vadd.f32 %v2710_v32, %v2506_v15 }
 0x349   :  { %v2510_v41 = vpop.f32.mrf.mxu0  ;;  %v2715_v26 = vpop.f32.mrf.mxu1 }
 0x34a   :  { %v2511_v49 = vadd.f32 %v2510_v41, %v6457_v28 }
 0x34b   :  { %v2512_v42 = vpop.f32.mrf.mxu0  ;;  %v2717_v10 = vpop.f32.mrf.mxu1 }
 0x34c   :  { %v6569_v52 = vadd.f32 %v2715_v26, %v2511_v49 }
 0x34d   :  { %v2515_v63 = vpop.f32.mrf.mxu0  ;;  %v2720_v16 = vpop.f32.mrf.mxu1 }
 0x34e   :  { %v2516_v54 = vadd.f32 %v2515_v63, %v6461_v33 }
 0x34f   :  { %v2517_v40 = vpop.f32.mrf.mxu0  ;;  %v2722_v24 = vpop.f32.mrf.mxu1 }
 0x350   :  { %v6572_v36 = vadd.f32 %v2720_v16, %v2516_v54 }
 0x351   :  { %v2520_v14 = vpop.f32.mrf.mxu0  ;;  %v2725_v59 = vpop.f32.mrf.mxu1 }
 0x352   :  { %v2521_v39 = vadd.f32 %v2520_v14, %v6466_v62 }
 0x353   :  { %v2522_v12 = vpop.f32.mrf.mxu0  ;;  %v2727_v30 = vpop.f32.mrf.mxu1 }
 0x354   :  { %v6575_v56 = vadd.f32 %v2725_v59, %v2521_v39 }
 0x355   :  { %v2525_v28 = vpop.f32.mrf.mxu0  ;;  %v2730_v8 = vpop.f32.mrf.mxu1 }
 0x356   :  { %v2526_v27 = vadd.f32 %v2525_v28, %v6471_v58 }
 0x357   :  { %v2527_v23 = vpop.f32.mrf.mxu0  ;;  %v2732_v48 = vpop.f32.mrf.mxu1 }
 0x358   :  { %v6578_v18 = vadd.f32 %v2730_v8, %v2526_v27 }
 0x359   :  { %v2530_v33 = vpop.f32.mrf.mxu0  ;;  %v2735_v34 = vpop.f32.mrf.mxu1 }
 0x35a   :  { %v2531_v5 = vadd.f32 %v2530_v33, %v6476_v1 }
 0x35b   :  { %v2532_v20 = vpop.f32.mrf.mxu0  ;;  %v2737_v46 = vpop.f32.mrf.mxu1 }
 0x35c   :  { %v6581_v22 = vadd.f32 %v2735_v34, %v2531_v5 }
 0x35d   :  { %v2535_v62 = vpop.f32.mrf.mxu0  ;;  %v2740_v47 = vpop.f32.mrf.mxu1 }
 0x35e   :  { %v2536_v3 = vadd.f32 %v2535_v62, %v6481_v13 }
 0x35f   :  { %v2537_v38 = vpop.f32.mrf.mxu0  ;;  %v2742_v32 = vpop.f32.mrf.mxu1 }
 0x360   :  { %v6584_v15 = vadd.f32 %v2740_v47, %v2536_v3 }
 0x361   :  { %v2540_v58 = vpop.f32.mrf.mxu0  ;;  %v2745_v43 = vpop.f32.mrf.mxu1 }
 0x362   :  { %v2541_v35 = vadd.f32 %v2540_v58, %v6486_v61 }
 0x363   :  { %v2542_v41 = vpop.f32.mrf.mxu0  ;;  %v2747_v26 = vpop.f32.mrf.mxu1 }
 0x364   :  { %v6587_v49 = vadd.f32 %v2745_v43, %v2541_v35 }
 0x365   :  { %v2545_v1 = vpop.f32.mrf.mxu0  ;;  %v2750_v42 = vpop.f32.mrf.mxu1 }
 0x366   :  { %v2546_v10 = vadd.f32 %v2545_v1, %v6491_v50 }
 0x367   :  { %v2547_v63 = vpop.f32.mrf.mxu0  ;;  %v2752_v16 = vpop.f32.mrf.mxu1 }
 0x368   :  { %v6590_v54 = vadd.f32 %v2750_v42, %v2546_v10 }
 0x369   :  { %v2550_v13 = vpop.f32.mrf.mxu0  ;;  %v2755_v40 = vpop.f32.mrf.mxu1 }
 0x36a   :  { %v2551_v24 = vadd.f32 %v2550_v13, %v6496_v31 }
 0x36b   :  { %v2552_v14 = vpop.f32.mrf.mxu0  ;;  %v2757_v59 = vpop.f32.mrf.mxu1 }
 0x36c   :  { %v6593_v39 = vadd.f32 %v2755_v40, %v2551_v24 }
 0x36d   :  { %v2555_v61 = vpop.f32.mrf.mxu0  ;;  %v2760_v12 = vpop.f32.mrf.mxu1 }
 0x36e   :  { %v2556_v30 = vadd.f32 %v2555_v61, %v6501_v51 }
 0x36f   :  { %v2557_v28 = vpop.f32.mrf.mxu0  ;;  %v2762_v8 = vpop.f32.mrf.mxu1 }
 0x370   :  { %v6596_v27 = vadd.f32 %v2760_v12, %v2556_v30 }
 0x371   :  { %v2560_v50 = vpop.f32.mrf.mxu0  ;;  %v2765_v23 = vpop.f32.mrf.mxu1 }
 0x372   :  { %v2561_v48 = vadd.f32 %v2560_v50, %v6506_v7 }
 0x373   :  { %v2562_v33 = vpop.f32.mrf.mxu0  ;;  %v2767_v34 = vpop.f32.mrf.mxu1 }
 0x374   :  { %v6599_v5 = vadd.f32 %v2765_v23, %v2561_v48 }
 0x375   :  { %v2565_v31 = vpop.f32.mrf.mxu0  ;;  %v2770_v20 = vpop.f32.mrf.mxu1 }
 0x376   :  { %v2566_v46 = vadd.f32 %v2565_v31, %v6511_v19 }
 0x377   :  { %v2567_v62 = vpop.f32.mrf.mxu0  ;;  %v2772_v47 = vpop.f32.mrf.mxu1 }
 0x378   :  { %v6602_v3 = vadd.f32 %v2770_v20, %v2566_v46 }
 0x379   :  { %v2570_v51 = vpop.f32.mrf.mxu0  ;;  %v2775_v38 = vpop.f32.mrf.mxu1 }
 0x37a   :  { %v2571_v32 = vadd.f32 %v2570_v51, %v6516_v21 }
 0x37b   :  { %v2572_v58 = vpop.f32.mrf.mxu0  ;;  %v2777_v43 = vpop.f32.mrf.mxu1 }
 0x37c   :  { %v6605_v35 = vadd.f32 %v2775_v38, %v2571_v32 }
 0x37d   :  { %v2575_v7 = vpop.f32.mrf.mxu0  ;;  %v2780_v41 = vpop.f32.mrf.mxu1 }
 0x37e   :  { %v2576_v26 = vadd.f32 %v2575_v7, %v6521_v60 }
 0x37f   :  { %v2577_v1 = vpop.f32.mrf.mxu0  ;;  %v2782_v42 = vpop.f32.mrf.mxu1 }
 0x380   :  { %v6608_v10 = vadd.f32 %v2780_v41, %v2576_v26 }
 0x381   :  { %v2580_v19 = vpop.f32.mrf.mxu0  ;;  %v2785_v63 = vpop.f32.mrf.mxu1 }
 0x382   :  { %v2581_v16 = vadd.f32 %v2580_v19, %v6526_v55 }
 0x383   :  { %v2582_v13 = vpop.f32.mrf.mxu0  ;;  %v2787_v40 = vpop.f32.mrf.mxu1 }
 0x384   :  { %v6611_v24 = vadd.f32 %v2785_v63, %v2581_v16 }
 0x385   :  { %v2585_v21 = vpop.f32.mrf.mxu0  ;;  %v2790_v14 = vpop.f32.mrf.mxu1 }
 0x386   :  { %v2586_v59 = vadd.f32 %v2585_v21, %v6530_v11 }
 0x387   :  { %v2587_v61 = vpop.f32.mrf.mxu0  ;;  %v2792_v12 = vpop.f32.mrf.mxu1 }
 0x388   :  { %v6614_v30 = vadd.f32 %v2790_v14, %v2586_v59 }
 0x389   :  { %v2590_v60 = vpop.f32.mrf.mxu0  ;;  %v2795_v28 = vpop.f32.mrf.mxu1 }
 0x38a   :  { %v2591_v8 = vadd.f32 %v2590_v60, %v6533_v29 }
 0x38b   :  { %v2592_v50 = vpop.f32.mrf.mxu0  ;;  %v2797_v23 = vpop.f32.mrf.mxu1 }
 0x38c   :  { %v6617_v48 = vadd.f32 %v2795_v28, %v2591_v8 }
 0x38d   :  { %v2595_v55 = vpop.f32.mrf.mxu0  ;;  %v2800_v33 = vpop.f32.mrf.mxu1 }
 0x38e   :  { %v2596_v34 = vadd.f32 %v2595_v55, %v6536_v44 }
 0x38f   :  { %v2597_v31 = vpop.f32.mrf.mxu0  ;;  %v2802_v20 = vpop.f32.mrf.mxu1 }
 0x390   :  { %v6620_v46 = vadd.f32 %v2800_v33, %v2596_v34 }
 0x391   :  { %v2600_v11 = vpop.f32.mrf.mxu0  ;;  %v2805_v62 = vpop.f32.mrf.mxu1 }
 0x392   :  { %v2601_v47 = vadd.f32 %v2600_v11, %v6539_v25 }
 0x393   :  { %v2602_v51 = vpop.f32.mrf.mxu0  ;;  %v2807_v38 = vpop.f32.mrf.mxu1 }
 0x394   :  { %v6623_v32 = vadd.f32 %v2805_v62, %v2601_v47 }
 0x395   :  { %v2605_v29 = vpop.f32.mrf.mxu0  ;;  %v2810_v58 = vpop.f32.mrf.mxu1 }
 0x396   :  { %v2606_v43 = vadd.f32 %v2605_v29, %v6542_v9 }
 0x397   :  { %v2607_v7 = vpop.f32.mrf.mxu0  ;;  %v2812_v41 = vpop.f32.mrf.mxu1 }
 0x398   :  { %v6626_v26 = vadd.f32 %v2810_v58, %v2606_v43 }
 0x399   :  { %v2880_v44 = vpop.f32.mrf.mxu0  ;;  %v5126_v1 = vpop.f32.mrf.mxu1 }
 0x39a   :  { %7367 = vst [vmem:[#allocation33_spill] sm:$0xff] %v6626_v26  ;;  %v2881_v42 = vadd.f32 %v2880_v44, %v6545_v37 }
 0x39b   :  { %v2882_v19 = vpop.f32.mrf.mxu0  ;;  %v3085_v63 = vpop.f32.mrf.mxu1 }
 0x39c   :  { %v3086_v16 = vadd.f32 %v3085_v63, %v2881_v42 }
 0x39d   :  { %v2885_v25 = vpop.f32.mrf.mxu0  ;;  %v5129_v13 = vpop.f32.mrf.mxu1 }
 0x39e   :  { %v2886_v40 = vadd.f32 %v2885_v25, %v6548_v2  ;;  %v3224_v21 = vmax.f32 %v3086_v16, 0.0  ;;  %v3617_v16 = vld [vmem:[#allocation6 + $0x8] sm:$0xff] }
 0x39f   :  { %v2887_v14 = vpop.f32.mrf.mxu0  ;;  %v3095_v9 = vpop.f32.mrf.mxu1  ;;  %4849 = vmatprep.mubr.msk.f32.mxu1 %vm3630_vm4, %v3617_v16 }
 0x3a0   :  { %v3091_v59 = vadd.f32 %v5126_v1, %v2886_v40  ;;  %v3281_v28 = vrot.slane %v3224_v21, 1  ;;  %v3393_v8 = vrot.slane %v3224_v21, 2  ;;  %v3505_v34 = vrot.slane %v3224_v21, 3 }
 0x3a1   :  { %v2890_v61 = vpop.f32.mrf.mxu0  ;;  %v5132_v31 = vpop.f32.mrf.mxu1 }
 0x3a2   :  { %v3225_v12 = vmax.f32 %v3091_v59, 0.0  ;;  %v2891_v60 = vadd.f32 %v2890_v61, %v6551_v4 }
 0x3a3   :  { %v2892_v50 = vpop.f32.mrf.mxu0  ;;  %v3105_v44 = vpop.f32.mrf.mxu1 }
 0x3a4   :  { %v3282_v37 = vrot.slane %v3225_v12, 1  ;;  %v3394_v23 = vrot.slane %v3225_v12, 2  ;;  %v3506_v55 = vrot.slane %v3225_v12, 3  ;;  %v3096_v33 = vadd.f32 %v3095_v9, %v2891_v60 }
 0x3a5   :  { %v2895_v2 = vpop.f32.mrf.mxu0  ;;  %v5135_v60 = vpop.f32.mrf.mxu1 }
 0x3a6   :  { %v3226_v20 = vmax.f32 %v3096_v33, 0.0  ;;  %v2896_v11 = vadd.f32 %v2895_v2, %v6554_v6  ;;  %v3283_v62 = vsel %vm3280_vm1, %v3281_v28, %v3282_v37  ;;  %v3395_v4 = vsel %vm3392_vm2, %v3393_v8, %v3394_v23 }
 0x3a7   :  { %v2897_v47 = vpop.f32.mrf.mxu0  ;;  %v3364_v51 = vmax.f32 %v3224_v21, %v3283_v62  ;;  %v6635_v38 = vsel %vm3504_vm3, %v3505_v34, %v3506_v55 }
 0x3a8   :  { %7368 = vst [vmem:[#allocation34_spill] sm:$0xff] %v6635_v38  ;;  %v3284_v29 = vrot.slane %v3226_v20, 1  ;;  %v3396_v58 = vrot.slane %v3226_v20, 2  ;;  %v3508_v43 = vrot.slane %v3226_v20, 3  ;;  %v3101_v7 = vadd.f32 %v5129_v13, %v2896_v11 }
 0x3a9   :  { %v2900_v41 = vpop.f32.mrf.mxu0  ;;  %v6637_v1 = vmax.f32 %v3364_v51, %v3395_v4  ;;  %v3115_v51 = vpop.f32.mrf.mxu1 }
 0x3aa   :  { %v3227_v42 = vmax.f32 %v3101_v7, 0.0  ;;  %v2901_v6 = vadd.f32 %v2900_v41, %v6557_v57  ;;  %v3285_v19 = vsel %vm3280_vm1, %v3282_v37, %v3284_v29  ;;  %v3397_v63 = vsel %vm3392_vm2, %v3394_v23, %v3396_v58 }
 0x3ab   :  { %7369 = vst [vmem:[#allocation35_spill] sm:$0xff] %v6637_v1  ;;  %v2902_v25 = vpop.f32.mrf.mxu0  ;;  %v3365_v40 = vmax.f32 %v3225_v12, %v3285_v19  ;;  %v6643_v21 = vsel %vm3504_vm3, %v3506_v55, %v3508_v43 }
 0x3ac   :  { %7370 = vst [vmem:[#allocation36_spill] sm:$0xff] %v6643_v21  ;;  %v3286_v14 = vrot.slane %v3227_v42, 1  ;;  %v3398_v59 = vrot.slane %v3227_v42, 2  ;;  %v3510_v61 = vrot.slane %v3227_v42, 3  ;;  %v3106_v9 = vadd.f32 %v3105_v44, %v2901_v6 }
 0x3ad   :  { %v2905_v57 = vpop.f32.mrf.mxu0  ;;  %v6648_v28 = vmax.f32 %v3365_v40, %v3397_v63  ;;  %v5138_v40 = vpop.f32.mrf.mxu1 }
 0x3ae   :  { %v3228_v8 = vmax.f32 %v3106_v9, 0.0  ;;  %v2906_v12 = vadd.f32 %v2905_v57, %v6560_v17  ;;  %v3287_v50 = vsel %vm3280_vm1, %v3284_v29, %v3286_v14  ;;  %v3399_v37 = vsel %vm3392_vm2, %v3396_v58, %v3398_v59 }
 0x3af   :  { %v2907_v23 = vpop.f32.mrf.mxu0  ;;  %v3366_v55 = vmax.f32 %v3226_v20, %v3287_v50  ;;  %v6654_v33 = vsel %vm3504_vm3, %v3508_v43, %v3510_v61 }
 0x3b0   :  { %v3288_v2 = vrot.slane %v3228_v8, 1  ;;  %v3400_v11 = vrot.slane %v3228_v8, 2  ;;  %v3512_v62 = vrot.slane %v3228_v8, 3  ;;  %v3111_v4 = vadd.f32 %v5132_v31, %v2906_v12 }
 0x3b1   :  { %v2910_v47 = vpop.f32.mrf.mxu0  ;;  %v6658_v7 = vmax.f32 %v3366_v55, %v3399_v37 }
 0x3b2   :  { %v3229_v17 = vmax.f32 %v3111_v4, 0.0  ;;  %v2911_v29 = vadd.f32 %v2910_v47, %v6563_v53  ;;  %v3289_v58 = vsel %vm3280_vm1, %v3286_v14, %v3288_v2  ;;  %v3401_v20 = vsel %vm3392_vm2, %v3398_v59, %v3400_v11 }
 0x3b3   :  { %v2912_v43 = vpop.f32.mrf.mxu0  ;;  %v3367_v41 = vmax.f32 %v3227_v42, %v3289_v58  ;;  %v6664_v44 = vsel %vm3504_vm3, %v3510_v61, %v3512_v62 }
 0x3b4   :  { %v3290_v31 = vrot.slane %v3229_v17, 1  ;;  %v3402_v19 = vrot.slane %v3229_v17, 2  ;;  %v3514_v63 = vrot.slane %v3229_v17, 3  ;;  %v3116_v16 = vadd.f32 %v3115_v51, %v2911_v29  ;;  %v3125_v51 = vpop.f32.mrf.mxu1 }
 0x3b5   :  { %v2915_v25 = vpop.f32.mrf.mxu0  ;;  %v6668_v9 = vmax.f32 %v3367_v41, %v3401_v20 }
 0x3b6   :  { %v3230_v53 = vmax.f32 %v3116_v16, 0.0  ;;  %v2916_v14 = vadd.f32 %v2915_v25, %v6566_v45  ;;  %v3291_v59 = vsel %vm3280_vm1, %v3288_v2, %v3290_v31  ;;  %v3403_v42 = vsel %vm3392_vm2, %v3400_v11, %v3402_v19 }
 0x3b7   :  { %v2917_v61 = vpop.f32.mrf.mxu0  ;;  %v3368_v57 = vmax.f32 %v3228_v8, %v3291_v59  ;;  %v6674_v12 = vsel %vm3504_vm3, %v3512_v62, %v3514_v63  ;;  %v5141_v59 = vpop.f32.mrf.mxu1 }
 0x3b8   :  { %v3292_v37 = vrot.slane %v3230_v53, 1  ;;  %v3404_v23 = vrot.slane %v3230_v53, 2  ;;  %v3516_v55 = vrot.slane %v3230_v53, 3  ;;  %v3121_v4 = vadd.f32 %v5135_v60, %v2916_v14 }
 0x3b9   :  { %v2920_v47 = vpop.f32.mrf.mxu0  ;;  %v6678_v29 = vmax.f32 %v3368_v57, %v3403_v42 }
 0x3ba   :  { %v3231_v45 = vmax.f32 %v3121_v4, 0.0  ;;  %v2921_v2 = vadd.f32 %v2920_v47, %v6569_v52  ;;  %v3293_v11 = vsel %vm3280_vm1, %v3290_v31, %v3292_v37  ;;  %v3405_v8 = vsel %vm3392_vm2, %v3402_v19, %v3404_v23 }
 0x3bb   :  { %v2922_v62 = vpop.f32.mrf.mxu0  ;;  %v3369_v58 = vmax.f32 %v3229_v17, %v3293_v11  ;;  %v6684_v20 = vsel %vm3504_vm3, %v3514_v63, %v3516_v55 }
 0x3bc   :  { %v3294_v60 = vrot.slane %v3231_v45, 1  ;;  %v3406_v41 = vrot.slane %v3231_v45, 2  ;;  %v3518_v16 = vrot.slane %v3231_v45, 3  ;;  %v3126_v25 = vadd.f32 %v3125_v51, %v2921_v2  ;;  %v3135_v62 = vpop.f32.mrf.mxu1 }
 0x3bd   :  { %v2925_v14 = vpop.f32.mrf.mxu0  ;;  %v6688_v42 = vmax.f32 %v3369_v58, %v3405_v8 }
 0x3be   :  { %v3232_v52 = vmax.f32 %v3126_v25, 0.0  ;;  %v2926_v31 = vadd.f32 %v2925_v14, %v6572_v36  ;;  %v3295_v19 = vsel %vm3280_vm1, %v3292_v37, %v3294_v60  ;;  %v3407_v17 = vsel %vm3392_vm2, %v3404_v23, %v3406_v41 }
 0x3bf   :  { %v2927_v63 = vpop.f32.mrf.mxu0  ;;  %v3370_v61 = vmax.f32 %v3230_v53, %v3295_v19  ;;  %v6694_v57 = vsel %vm3504_vm3, %v3516_v55, %v3518_v16 }
 0x3c0   :  { %v3296_v47 = vrot.slane %v3232_v52, 1  ;;  %v3408_v51 = vrot.slane %v3232_v52, 2  ;;  %v3520_v2 = vrot.slane %v3232_v52, 3  ;;  %v3131_v11 = vadd.f32 %v5138_v40, %v2926_v31  ;;  %v4872_v40 = vld [vmem:[%s7336_s5 + $0xf8] sm:$0xff]  ;;  %v5144_v63 = vpop.f32.mrf.mxu1 }
 0x3c1   :  { %v2930_v8 = vpop.f32.mrf.mxu0  ;;  %v6698_v58 = vmax.f32 %v3370_v61, %v3407_v17  ;;  %5204 = vmatprep.subr.mxu0 %v4872_v40  ;;  %v4870_v61 = vld [vmem:[%s7336_s5 + $0xe8] sm:$0xff] }
 0x3c2   :  { %v3233_v36 = vmax.f32 %v3131_v11, 0.0  ;;  %v2931_v37 = vadd.f32 %v2930_v8, %v6575_v56  ;;  %v3297_v23 = vsel %vm3280_vm1, %v3294_v60, %v3296_v47  ;;  %v3409_v53 = vsel %vm3392_vm2, %v3406_v41, %v3408_v51  ;;  %v4871_v56 = vld [vmem:[%s7336_s5 + $0xf0] sm:$0xff]  ;;  %5205 = vmatpush3.msra.mxu0 %v4872_v40 }
 0x3c3   :  { %v2932_v55 = vpop.f32.mrf.mxu0  ;;  %v3371_v25 = vmax.f32 %v3231_v45, %v3297_v23  ;;  %v6704_v14 = vsel %vm3504_vm3, %v3518_v16, %v3520_v2  ;;  %5206 = vmatprep.subr.mxu0 %v4871_v56 }
 0x3c4   :  { %v3298_v31 = vrot.slane %v3233_v36, 1  ;;  %v3410_v60 = vrot.slane %v3233_v36, 2  ;;  %v3522_v17 = vrot.slane %v3233_v36, 3  ;;  %v3136_v41 = vadd.f32 %v3135_v62, %v2931_v37  ;;  %5207 = vmatpush3.msra.mxu0 %v4871_v56 }
 0x3c5   :  { %v2935_v45 = vpop.f32.mrf.mxu0  ;;  %v6714_v16 = vmax.f32 %v3371_v25, %v3409_v53  ;;  %v4869_v25 = vld [vmem:[%s7336_s5 + $0xe0] sm:$0xff]  ;;  %5208 = vmatprep.subr.mxu0 %v4870_v61 }
 0x3c6   :  { %v3234_v11 = vmax.f32 %v3136_v41, 0.0  ;;  %v2936_v8 = vadd.f32 %v2935_v45, %v6578_v18  ;;  %v3299_v23 = vsel %vm3280_vm1, %v3296_v47, %v3298_v31  ;;  %v3411_v55 = vsel %vm3392_vm2, %v3408_v51, %v3410_v60  ;;  %v3145_v45 = vpop.f32.mrf.mxu1  ;;  %5209 = vmatpush3.msra.mxu0 %v4870_v61 }
 0x3c7   :  { %v2937_v13 = vpop.f32.mrf.mxu0  ;;  %v3372_v62 = vmax.f32 %v3232_v52, %v3299_v23  ;;  %v6723_v37 = vsel %vm3504_vm3, %v3520_v2, %v3522_v17  ;;  %v4868_v52 = vld [vmem:[%s7336_s5 + $0xd8] sm:$0xff]  ;;  %5210 = vmatprep.subr.mxu0 %v4869_v25 }
 0x3c8   :  { %v3300_v40 = vrot.slane %v3234_v11, 1  ;;  %v3412_v18 = vrot.slane %v3234_v11, 2  ;;  %v3524_v41 = vrot.slane %v3234_v11, 3  ;;  %v3141_v47 = vadd.f32 %v5141_v59, %v2936_v8  ;;  %5211 = vmatpush3.msra.mxu0 %v4869_v25 }
 0x3c9   :  { %v2940_v51 = vpop.f32.mrf.mxu0  ;;  %v6730_v13 = vmax.f32 %v3372_v62, %v3411_v55  ;;  %v4867_v55 = vld [vmem:[%s7336_s5 + $0xd0] sm:$0xff]  ;;  %5212 = vmatprep.subr.mxu0 %v4868_v52 }
 0x3ca   :  { %v3235_v2 = vmax.f32 %v3141_v47, 0.0  ;;  %v2941_v56 = vadd.f32 %v2940_v51, %v6581_v22  ;;  %v3301_v23 = vsel %vm3280_vm1, %v3298_v31, %v3300_v40  ;;  %v3413_v34 = vsel %vm3392_vm2, %v3410_v60, %v3412_v18  ;;  %v5147_v51 = vpop.f32.mrf.mxu1  ;;  %5213 = vmatpush3.msra.mxu0 %v4868_v52  ;;  %v4865_v52 = vld [vmem:[%s7336_s5 + $0xc0] sm:$0xff] }
 0x3cb   :  { %v2942_v6 = vpop.f32.mrf.mxu0  ;;  %v3373_v59 = vmax.f32 %v3233_v36, %v3301_v23  ;;  %v6739_v8 = vsel %vm3504_vm3, %v3522_v17, %v3524_v41  ;;  %v4866_v36 = vld [vmem:[%s7336_s5 + $0xc8] sm:$0xff]  ;;  %5214 = vmatprep.subr.mxu0 %v4867_v55 }
 0x3cc   :  { %v3302_v62 = vrot.slane %v3235_v2, 1  ;;  %v3414_v22 = vrot.slane %v3235_v2, 2  ;;  %v3526_v47 = vrot.slane %v3235_v2, 3  ;;  %v3146_v31 = vadd.f32 %v3145_v45, %v2941_v56  ;;  %5215 = vmatpush3.msra.mxu0 %v4867_v55 }
 0x3cd   :  { %v2945_v60 = vpop.f32.mrf.mxu0  ;;  %v6746_v6 = vmax.f32 %v3373_v59, %v3413_v34  ;;  %5216 = vmatprep.subr.mxu0 %v4866_v36 }
 0x3ce   :  { %v3236_v17 = vmax.f32 %v3146_v31, 0.0  ;;  %v2946_v25 = vadd.f32 %v2945_v60, %v6584_v15  ;;  %v3303_v23 = vsel %vm3280_vm1, %v3300_v40, %v3302_v62  ;;  %v3415_v50 = vsel %vm3392_vm2, %v3412_v18, %v3414_v22  ;;  %v3155_v60 = vpop.f32.mrf.mxu1  ;;  %5217 = vmatpush3.msra.mxu0 %v4866_v36  ;;  %v4863_v36 = vld [vmem:[%s7336_s5 + $0xb0] sm:$0xff] }
 0x3cf   :  { %v2947_v43 = vpop.f32.mrf.mxu0  ;;  %v3374_v45 = vmax.f32 %v3234_v11, %v3303_v23  ;;  %v6755_v56 = vsel %vm3504_vm3, %v3524_v41, %v3526_v47  ;;  %v4864_v11 = vld [vmem:[%s7336_s5 + $0xb8] sm:$0xff]  ;;  %5218 = vmatprep.subr.mxu0 %v4865_v52 }
 0x3d0   :  { %v3304_v59 = vrot.slane %v3236_v17, 1  ;;  %v3416_v15 = vrot.slane %v3236_v17, 2  ;;  %v3528_v31 = vrot.slane %v3236_v17, 3  ;;  %v3151_v40 = vadd.f32 %v5144_v63, %v2946_v25  ;;  %5219 = vmatpush3.msra.mxu0 %v4865_v52 }
 0x3d1   :  { %v2950_v18 = vpop.f32.mrf.mxu0  ;;  %v6762_v43 = vmax.f32 %v3374_v45, %v3415_v50  ;;  %5220 = vmatprep.subr.mxu0 %v4864_v11 }
 0x3d2   :  { %v3237_v41 = vmax.f32 %v3151_v40, 0.0  ;;  %v2951_v55 = vadd.f32 %v2950_v18, %v6587_v49  ;;  %v3305_v23 = vsel %vm3280_vm1, %v3302_v62, %v3304_v59  ;;  %v3417_v4 = vsel %vm3392_vm2, %v3414_v22, %v3416_v15  ;;  %v5150_v18 = vpop.f32.mrf.mxu1  ;;  %5221 = vmatpush3.msra.mxu0 %v4864_v11  ;;  %v4861_v11 = vld [vmem:[%s7336_s5 + $0xa0] sm:$0xff] }
 0x3d3   :  { %v2952_v19 = vpop.f32.mrf.mxu0  ;;  %v3375_v63 = vmax.f32 %v3235_v2, %v3305_v23  ;;  %v6771_v25 = vsel %vm3504_vm3, %v3526_v47, %v3528_v31  ;;  %v4862_v2 = vld [vmem:[%s7336_s5 + $0xa8] sm:$0xff]  ;;  %5222 = vmatprep.subr.mxu0 %v4863_v36 }
 0x3d4   :  { %v3306_v45 = vrot.slane %v3237_v41, 1  ;;  %v3418_v49 = vrot.slane %v3237_v41, 2  ;;  %v3530_v40 = vrot.slane %v3237_v41, 3  ;;  %v3156_v62 = vadd.f32 %v3155_v60, %v2951_v55  ;;  %5223 = vmatpush3.msra.mxu0 %v4863_v36 }
 0x3d5   :  { %v2955_v22 = vpop.f32.mrf.mxu0  ;;  %v6778_v19 = vmax.f32 %v3375_v63, %v3417_v4  ;;  %5224 = vmatprep.subr.mxu0 %v4862_v2 }
 0x3d6   :  { %v3238_v47 = vmax.f32 %v3156_v62, 0.0  ;;  %v2956_v52 = vadd.f32 %v2955_v22, %v6590_v54  ;;  %v3307_v23 = vsel %vm3280_vm1, %v3304_v59, %v3306_v45  ;;  %v3419_v53 = vsel %vm3392_vm2, %v3416_v15, %v3418_v49  ;;  %v3165_v22 = vpop.f32.mrf.mxu1  ;;  %5225 = vmatpush3.msra.mxu0 %v4862_v2  ;;  %v4859_v2 = vld [vmem:[%s7336_s5 + $0x90] sm:$0xff] }
 0x3d7   :  { %v2957_v61 = vpop.f32.mrf.mxu0  ;;  %v3376_v60 = vmax.f32 %v3236_v17, %v3307_v23  ;;  %v6787_v55 = vsel %vm3504_vm3, %v3528_v31, %v3530_v40  ;;  %v4860_v17 = vld [vmem:[%s7336_s5 + $0x98] sm:$0xff]  ;;  %5226 = vmatprep.subr.mxu0 %v4861_v11 }
 0x3d8   :  { %v3308_v63 = vrot.slane %v3238_v47, 1  ;;  %v3420_v54 = vrot.slane %v3238_v47, 2  ;;  %v3532_v62 = vrot.slane %v3238_v47, 3  ;;  %v3161_v59 = vadd.f32 %v5147_v51, %v2956_v52  ;;  %5227 = vmatpush3.msra.mxu0 %v4861_v11 }
 0x3d9   :  { %v2960_v15 = vpop.f32.mrf.mxu0  ;;  %v6794_v61 = vmax.f32 %v3376_v60, %v3419_v53  ;;  %5228 = vmatprep.subr.mxu0 %v4860_v17 }
 0x3da   :  { %v3239_v31 = vmax.f32 %v3161_v59, 0.0  ;;  %v2961_v36 = vadd.f32 %v2960_v15, %v6593_v39  ;;  %v3309_v23 = vsel %vm3280_vm1, %v3306_v45, %v3308_v63  ;;  %v3421_v34 = vsel %vm3392_vm2, %v3418_v49, %v3420_v54  ;;  %v5153_v15 = vpop.f32.mrf.mxu1  ;;  %5229 = vmatpush3.msra.mxu0 %v4860_v17 }
 0x3db   :  { %v2962_v50 = vpop.f32.mrf.mxu0  ;;  %v3377_v51 = vmax.f32 %v3237_v41, %v3309_v23  ;;  %v6803_v52 = vsel %vm3504_vm3, %v3530_v40, %v3532_v62  ;;  %v4858_v41 = vld [vmem:[%s7336_s5 + $0x88] sm:$0xff]  ;;  %5230 = vmatprep.subr.mxu0 %v4859_v2 }
 0x3dc   :  { %v3310_v60 = vrot.slane %v3239_v31, 1  ;;  %v3422_v39 = vrot.slane %v3239_v31, 2  ;;  %v3534_v59 = vrot.slane %v3239_v31, 3  ;;  %v3166_v45 = vadd.f32 %v3165_v22, %v2961_v36  ;;  %5231 = vmatpush3.msra.mxu0 %v4859_v2 }
 0x3dd   :  { %v2965_v49 = vpop.f32.mrf.mxu0  ;;  %v6810_v50 = vmax.f32 %v3377_v51, %v3421_v34  ;;  %5232 = vmatprep.subr.mxu0 %v4858_v41 }
 0x3de   :  { %v3240_v40 = vmax.f32 %v3166_v45, 0.0  ;;  %v2966_v11 = vadd.f32 %v2965_v49, %v6596_v27  ;;  %v3311_v23 = vsel %vm3280_vm1, %v3308_v63, %v3310_v60  ;;  %v3423_v4 = vsel %vm3392_vm2, %v3420_v54, %v3422_v39  ;;  %v3175_v27 = vpop.f32.mrf.mxu1  ;;  %5233 = vmatpush3.msra.mxu0 %v4858_v41 }
 0x3df   :  { %v2967_v53 = vpop.f32.mrf.mxu0  ;;  %v3378_v22 = vmax.f32 %v3238_v47, %v3311_v23  ;;  %v3535_v36 = vsel %vm3504_vm3, %v3532_v62, %v3534_v59  ;;  %v3601_v34 = vmax.f32 %v6810_v50, %v6803_v52 }
 0x3e0   :  { %v3312_v17 = vrot.slane %v3240_v40, 1  ;;  %v3424_v51 = vrot.slane %v3240_v40, 2  ;;  %v3536_v0 = vrot.slane %v3240_v40, 3  ;;  %v3171_v38 = vadd.f32 %v5150_v18, %v2966_v11  ;;  %v5156_v21 = vpop.f32.mrf.mxu1 }
 0x3e1   :  { %v2970_v45 = vpop.f32.mrf.mxu0  ;;  %v3490_v49 = vmax.f32 %v3378_v22, %v3423_v4 }
 0x3e2   :  { %v3241_v63 = vmax.f32 %v3171_v38, 0.0  ;;  %v2971_v54 = vadd.f32 %v2970_v45, %v6599_v5  ;;  %v3313_v47 = vsel %vm3280_vm1, %v3310_v60, %v3312_v17  ;;  %v3425_v62 = vsel %vm3392_vm2, %v3422_v39, %v3424_v51 }
 0x3e3   :  { %v2972_v53 = vpop.f32.mrf.mxu0  ;;  %v3379_v23 = vmax.f32 %v3239_v31, %v3313_v47  ;;  %v3537_v52 = vsel %vm3504_vm3, %v3534_v59, %v3536_v0  ;;  %v3602_v2 = vmax.f32 %v3490_v49, %v3535_v36  ;;  %v3185_v47 = vpop.f32.mrf.mxu1 }
 0x3e4   :  { %v3314_v50 = vrot.slane %v3241_v63, 1  ;;  %v3426_v1 = vrot.slane %v3241_v63, 2  ;;  %v3538_v18 = vrot.slane %v3241_v63, 3  ;;  %v3176_v11 = vadd.f32 %v3175_v27, %v2971_v54 }
 0x3e5   :  { %v2975_v26 = vpop.f32.mrf.mxu0  ;;  %v3491_v4 = vmax.f32 %v3379_v23, %v3425_v62 }
 0x3e6   :  { %v3242_v41 = vmax.f32 %v3176_v11, 0.0  ;;  %v2976_v38 = vadd.f32 %v2975_v26, %v6602_v3  ;;  %v3315_v5 = vsel %vm3280_vm1, %v3312_v17, %v3314_v50  ;;  %v3427_v60 = vsel %vm3392_vm2, %v3424_v51, %v3426_v1 }
 0x3e7   :  { %v2977_v39 = vpop.f32.mrf.mxu0  ;;  %v3603_v22 = vmax.f32 %v3491_v4, %v3537_v52  ;;  %v3380_v31 = vmax.f32 %v3240_v40, %v3315_v5  ;;  %v6829_v59 = vsel %vm3504_vm3, %v3536_v0, %v3538_v18  ;;  %v7371_v17 = vmov 0.0  }
 0x3e8   :  { %v3316_v36 = vrot.slane %v3242_v41, 1  ;;  %v3428_v45 = vrot.slane %v3242_v41, 2  ;;  %v3540_v49 = vrot.slane %v3242_v41, 3  ;;  %v3181_v27 = vadd.f32 %v5153_v15, %v2976_v38 }
 0x3e9   :  { %v2980_v54 = vpop.f32.mrf.mxu0  ;;  %3656 = vmatpush1.msra.mxu1 %v3603_v22  ;;  %v6831_v62 = vmax.f32 %v3380_v31, %v3427_v60  ;;  %v7372_v39 = vmax.f32 %v6794_v61, %v6787_v55 }
 0x3ea   :  { %v3243_v3 = vmax.f32 %v3181_v27, 0.0  ;;  %v2981_v26 = vadd.f32 %v2980_v54, %v6605_v35  ;;  %3657 = vmatprep.subr.mxu1 %v7371_v17  ;;  %v3317_v51 = vsel %vm3280_vm1, %v3314_v50, %v3316_v36  ;;  %v3429_v40 = vsel %vm3392_vm2, %v3426_v1, %v3428_v45  ;;  %v5159_v50 = vpop.f32.mrf.mxu1 }
 0x3eb   :  { %v2982_v0 = vpop.f32.mrf.mxu0  ;;  %3658 = vmatpush1.msra.mxu1 %v3602_v2  ;;  %v3381_v53 = vmax.f32 %v3241_v63, %v3317_v51  ;;  %v6838_v23 = vsel %vm3504_vm3, %v3538_v18, %v3540_v49  ;;  %v3604_v15 = vmax.f32 %v6831_v62, %v6829_v59  ;;  %v3767_v59 = vld [vmem:[%s7336_s5 + $0x60] sm:$0xff]  ;;  %v3620_v62 = vld [vmem:[#allocation6 + $0x20] sm:$0xff] }
 0x3ec   :  { %v3318_v52 = vrot.slane %v3243_v3, 1  ;;  %v3430_v11 = vrot.slane %v3243_v3, 2  ;;  %v3542_v4 = vrot.slane %v3243_v3, 3  ;;  %v3186_v38 = vadd.f32 %v3185_v47, %v2981_v26  ;;  %3659 = vmatprep.subr.mxu1 %v7371_v17  ;;  %v3195_v55 = vpop.f32.mrf.mxu1 }
 0x3ed   :  { %v2985_v35 = vpop.f32.mrf.mxu0  ;;  %3660 = vmatpush1.msra.mxu1 %v3601_v34  ;;  %v6843_v5 = vmax.f32 %v3381_v53, %v3429_v40  ;;  %v7374_v40 = vmax.f32 %v6762_v43, %v6755_v56 }
 0x3ee   :  { %v3244_v1 = vmax.f32 %v3186_v38, 0.0  ;;  %v2986_v63 = vadd.f32 %v2985_v35, %v6608_v10  ;;  %3661 = vmatprep.subr.mxu1 %v7371_v17  ;;  %v3319_v2 = vsel %vm3280_vm1, %v3316_v36, %v3318_v52  ;;  %v3431_v18 = vsel %vm3392_vm2, %v3428_v45, %v3430_v11  ;;  %v5162_v56 = vpop.f32.mrf.mxu1 }
 0x3ef   :  { %v2987_v60 = vpop.f32.mrf.mxu0  ;;  %3662 = vmatpush1.msra.mxu1 %v7372_v39  ;;  %v3382_v22 = vmax.f32 %v3242_v41, %v3319_v2  ;;  %v6853_v34 = vsel %vm3504_vm3, %v3540_v49, %v3542_v4  ;;  %v3605_v31 = vmax.f32 %v6843_v5, %v6838_v23  ;;  %v7373_v45 = vmax.f32 %v6778_v19, %v6771_v25  ;;  %v3618_v23 = vld [vmem:[#allocation6 + $0x10] sm:$0xff]  ;;  %v3768_v5 = vld [vmem:[%s7336_s5 + $0x68] sm:$0xff] }
 0x3f0   :  { %v3320_v27 = vrot.slane %v3244_v1, 1  ;;  %v3432_v10 = vrot.slane %v3244_v1, 2  ;;  %v3544_v54 = vrot.slane %v3244_v1, 3  ;;  %v3191_v47 = vadd.f32 %v5156_v21, %v2986_v63  ;;  %3663 = vmatprep.subr.mxu1 %v7371_v17 }
 0x3f1   :  { %v2990_v36 = vpop.f32.mrf.mxu0  ;;  %3664 = vmatpush1.msra.mxu1 %v7373_v45  ;;  %v6861_v61 = vmax.f32 %v3382_v22, %v3431_v18  ;;  %v7376_v60 = vmax.f32 %v6730_v13, %v6723_v37  ;;  %v3205_v37 = vpop.f32.mrf.mxu1 }
 0x3f2   :  { %v3245_v41 = vmax.f32 %v3191_v47, 0.0  ;;  %v2991_v49 = vadd.f32 %v2990_v36, %v6611_v24  ;;  %3665 = vmatprep.subr.mxu1 %v7371_v17  ;;  %v3321_v26 = vsel %vm3280_vm1, %v3318_v52, %v3320_v27  ;;  %v3433_v51 = vsel %vm3392_vm2, %v3430_v11, %v3432_v10 }
 0x3f3   :  { %v2992_v21 = vpop.f32.mrf.mxu0  ;;  %3666 = vmatpush1.msra.mxu1 %v7374_v40  ;;  %v3383_v0 = vmax.f32 %v3243_v3, %v3321_v26  ;;  %v6871_v25 = vsel %vm3504_vm3, %v3542_v4, %v3544_v54  ;;  %v3606_v19 = vmax.f32 %v6861_v61, %v6853_v34  ;;  %v7375_v11 = vmax.f32 %v6746_v6, %v6739_v8  ;;  %v3769_v34 = vld [vmem:[%s7336_s5 + $0x70] sm:$0xff]  ;;  %v3623_v61 = vld [vmem:[#allocation6 + $0x38] sm:$0xff] }
 0x3f4   :  { %v3322_v53 = vrot.slane %v3245_v41, 1  ;;  %v3434_v24 = vrot.slane %v3245_v41, 2  ;;  %v3546_v38 = vrot.slane %v3245_v41, 3  ;;  %v3196_v35 = vadd.f32 %v3195_v55, %v2991_v49  ;;  %3667 = vmatprep.subr.mxu1 %v7371_v17 }
 0x3f5   :  { %v2995_v52 = vpop.f32.mrf.mxu0  ;;  %3668 = vmatpush1.msra.mxu1 %v7375_v11  ;;  %v6879_v43 = vmax.f32 %v3383_v0, %v3433_v51  ;;  %v7378_v49 = vmax.f32 %v6698_v58, %v6694_v57  ;;  %v5165_v57 = vpop.f32.mrf.mxu1  ;;  %v7380_v11 = vmax.f32 %v6678_v29, %v6674_v12 }
 0x3f6   :  { %v3246_v3 = vmax.f32 %v3196_v35, 0.0  ;;  %v2996_v4 = vadd.f32 %v2995_v52, %v6614_v30  ;;  %3669 = vmatprep.subr.mxu1 %v7371_v17  ;;  %v3323_v63 = vsel %vm3280_vm1, %v3320_v27, %v3322_v53  ;;  %v3435_v2 = vsel %vm3392_vm2, %v3432_v10, %v3434_v24 }
 0x3f7   :  { %v2997_v18 = vpop.f32.mrf.mxu0  ;;  %3670 = vmatpush1.msra.mxu1 %v7376_v60  ;;  %v3384_v39 = vmax.f32 %v3244_v1, %v3323_v63  ;;  %v6889_v8 = vsel %vm3504_vm3, %v3544_v54, %v3546_v38  ;;  %v3607_v6 = vmax.f32 %v6879_v43, %v6871_v25  ;;  %v7377_v10 = vmax.f32 %v6714_v16, %v6704_v14  ;;  %v3215_v12 = vpop.f32.mrf.mxu1  ;;  %v3619_v25 = vld [vmem:[#allocation6 + $0x18] sm:$0xff]  ;;  %v3622_v43 = vld [vmem:[#allocation6 + $0x30] sm:$0xff] }
 0x3f8   :  { %v3324_v22 = vrot.slane %v3246_v3, 1  ;;  %v3436_v30 = vrot.slane %v3246_v3, 2  ;;  %v3548_v47 = vrot.slane %v3246_v3, 3  ;;  %v3201_v36 = vadd.f32 %v5159_v50, %v2996_v4  ;;  %3671 = vmatprep.subr.mxu1 %v7371_v17 }
 0x3f9   :  { %v3000_v27 = vpop.f32.mrf.mxu0  ;;  %3672 = vmatpush1.msra.mxu1 %v7377_v10  ;;  %v6897_v13 = vmax.f32 %v3384_v39, %v3435_v2  ;;  %v7381_v39 = vmax.f32 %v6668_v9, %v6664_v44 }
 0x3fa   :  { %v3247_v1 = vmax.f32 %v3201_v36, 0.0  ;;  %v3001_v54 = vadd.f32 %v3000_v27, %v6617_v48  ;;  %3673 = vmatprep.subr.mxu1 %v7371_v17  ;;  %v3325_v45 = vsel %vm3280_vm1, %v3322_v53, %v3324_v22  ;;  %v3437_v55 = vsel %vm3392_vm2, %v3434_v24, %v3436_v30 }
 0x3fb   :  { %v3002_v50 = vpop.f32.mrf.mxu0  ;;  %3674 = vmatpush1.msra.mxu1 %v7378_v49  ;;  %v3385_v26 = vmax.f32 %v3245_v41, %v3325_v45  ;;  %v6907_v14 = vsel %vm3504_vm3, %v3546_v38, %v3548_v47  ;;  %v3608_v16 = vmax.f32 %v6897_v13, %v6889_v8  ;;  %v7379_v53 = vmax.f32 %v6688_v42, %v6684_v20  ;;  %v3616_v8 = vld [vmem:[#allocation6] sm:$0xff]  ;;  %v3770_v13 = vld [vmem:[%s7336_s5 + $0x78] sm:$0xff] }
 0x3fc   :  { %v3326_v51 = vrot.slane %v3247_v1, 1  ;;  %v3438_v48 = vrot.slane %v3247_v1, 2  ;;  %v3550_v21 = vrot.slane %v3247_v1, 3  ;;  %v3206_v40 = vadd.f32 %v3205_v37, %v3001_v54  ;;  %3675 = vmatprep.subr.mxu1 %v7371_v17 }
 0x3fd   :  { %v3005_v0 = vpop.f32.mrf.mxu0  ;;  %3676 = vmatpush1.msra.mxu1 %v7379_v53  ;;  %v6915_v58 = vmax.f32 %v3385_v26, %v3437_v55  ;;  %v7382_v36 = vmax.f32 %v6658_v7, %v6654_v33  ;;  %v7383_v55 = vld [vmem:[#allocation36_spill] sm:$0xff]  ;;  %v7385_v7 = vld [vmem:[#allocation33_spill] sm:$0xff] }
 0x3fe   :  { %v3248_v41 = vmax.f32 %v3206_v40, 0.0  ;;  %v3006_v24 = vadd.f32 %v3005_v0, %v6620_v46  ;;  %3677 = vmatprep.subr.mxu1 %v7371_v17  ;;  %v3327_v38 = vsel %vm3280_vm1, %v3324_v22, %v3326_v51  ;;  %v3439_v35 = vsel %vm3392_vm2, %v3436_v30, %v3438_v48  ;;  %v7387_v40 = vld [vmem:[#allocation34_spill] sm:$0xff] }
 0x3ff   :  { %v3007_v52 = vpop.f32.mrf.mxu0  ;;  %3678 = vmatpush1.msra.mxu1 %v7380_v11  ;;  %v3386_v4 = vmax.f32 %v3246_v3, %v3327_v38  ;;  %v6925_v20 = vsel %vm3504_vm3, %v3548_v47, %v3550_v21  ;;  %v3609_v42 = vmax.f32 %v6915_v58, %v6907_v14  ;;  %v7384_v50 = vmax.f32 %v6648_v28, %v7383_v55  ;;  %v3625_v14 = vld [vmem:[#allocation6 + $0x48] sm:$0xff]  ;;  %v3624_v58 = vld [vmem:[#allocation6 + $0x40] sm:$0xff]  ;;  %v3759_v55 = vld [vmem:[%s7336_s5 + $0x20] sm:$0xff] }
 0x400   :  { %v3328_v63 = vrot.slane %v3248_v41, 1  ;;  %v3440_v46 = vrot.slane %v3248_v41, 2  ;;  %v3552_v2 = vrot.slane %v3248_v41, 3  ;;  %v3211_v18 = vadd.f32 %v5162_v56, %v3006_v24  ;;  %3679 = vmatprep.subr.mxu1 %v7371_v17 }
 0x401   :  { %v3010_v60 = vpop.f32.mrf.mxu0  ;;  %3680 = vmatpush1.msra.mxu1 %v7381_v39  ;;  %v6933_v29 = vmax.f32 %v3386_v4, %v3439_v35 }
 0x402   :  { %v3249_v3 = vmax.f32 %v3211_v18, 0.0  ;;  %v3011_v22 = vadd.f32 %v3010_v60, %v6623_v32  ;;  %3681 = vmatprep.subr.mxu1 %v7371_v17  ;;  %v3329_v30 = vsel %vm3280_vm1, %v3326_v51, %v3328_v63  ;;  %v3441_v47 = vsel %vm3392_vm2, %v3438_v48, %v3440_v46 }
 0x403   :  { %v3012_v56 = vpop.f32.mrf.mxu0  ;;  %3682 = vmatpush1.msra.mxu1 %v7382_v36  ;;  %v3387_v27 = vmax.f32 %v3247_v1, %v3329_v30  ;;  %v3553_v44 = vsel %vm3504_vm3, %v3550_v21, %v3552_v2  ;;  %v3610_v9 = vmax.f32 %v6933_v29, %v6925_v20  ;;  %v7386_v21 = vld [vmem:[#allocation35_spill] sm:$0xff] }
 0x404   :  { %v3330_v10 = vrot.slane %v3249_v3, 1  ;;  %v3442_v37 = vrot.slane %v3249_v3, 2  ;;  %v3554_v32 = vrot.slane %v3249_v3, 3  ;;  %v3216_v54 = vadd.f32 %v3215_v12, %v3011_v22  ;;  %3683 = vmatprep.subr.mxu1 %v7371_v17 }
 0x405   :  { %v3015_v45 = vpop.f32.mrf.mxu0  ;;  %3684 = vmatpush1.msra.mxu1 %v7384_v50  ;;  %v3499_v49 = vmax.f32 %v3387_v27, %v3441_v47  ;;  %v7388_v0 = vmax.f32 %v7386_v21, %v7387_v40  ;;  %v3628_v50 = vld [vmem:[#allocation6 + $0x60] sm:$0xff] }
 0x406   :  { %v3250_v33 = vmax.f32 %v3216_v54, 0.0  ;;  %v3016_v1 = vadd.f32 %v3015_v45, %v7385_v7  ;;  %3685 = vmatprep.subr.mxu1 %v7371_v17  ;;  %v3331_v26 = vsel %vm3280_vm1, %v3328_v63, %v3330_v10  ;;  %v3443_v51 = vsel %vm3392_vm2, %v3440_v46, %v3442_v37  ;;  %v3760_v54 = vld [vmem:[%s7336_s5 + $0x28] sm:$0xff]  ;;  %v3629_v45 = vld [vmem:[#allocation6 + $0x68] sm:$0xff] }
 0x407   :  { %v3017_v48 = vpop.f32.mrf.mxu0  ;;  %3686 = vmatpush1.msra.mxu1 %v7388_v0  ;;  %v3388_v53 = vmax.f32 %v3248_v41, %v3331_v26  ;;  %v3555_v24 = vsel %vm3504_vm3, %v3552_v2, %v3554_v32  ;;  %v3611_v28 = vmax.f32 %v3499_v49, %v3553_v44  ;;  %v3758_v49 = vld [vmem:[%s7336_s5 + $0x18] sm:$0xff]  ;;  %v3756_v7 = vld [vmem:[%s7336_s5 + $0x8] sm:$0xff]  ;;  %v4857_v26 = vld [vmem:[%s7336_s5 + $0x80] sm:$0xff] }
 0x408   :  { %v3332_v38 = vrot.slane %v3250_v33, 1  ;;  %v3444_v35 = vrot.slane %v3250_v33, 2  ;;  %v3556_v52 = vrot.slane %v3250_v33, 3  ;;  %v3221_v11 = vadd.f32 %v5165_v57, %v3016_v1  ;;  %3695 = vmatprep.subr.mxu1 %v7371_v17  ;;  %v3755_v1 = vld [vmem:[%s7336_s5] sm:$0xff]  ;;  %5234 = vmatprep.subr.mxu0 %v4857_v26  ;;  %v4904_v48 = vld [vmem:[%s7336_s5 + $0x1f8] sm:$0xff] }
 0x409   :  { %v3500_v4 = vmax.f32 %v3388_v53, %v3443_v51  ;;  %5235 = vmatpush3.msra.mxu0 %v4857_v26  ;;  %v4888_v51 = vld [vmem:[%s7336_s5 + $0x178] sm:$0xff]  ;;  %v4887_v53 = vld [vmem:[%s7336_s5 + $0x170] sm:$0xff] }
 0x40a   :  { %v3251_v20 = vmax.f32 %v3221_v11, 0.0  ;;  %v3333_v63 = vsel %vm3280_vm1, %v3330_v10, %v3332_v38  ;;  %v3445_v46 = vsel %vm3392_vm2, %v3442_v37, %v3444_v35  ;;  %v3557_v18 = vsel %vm3504_vm3, %v3554_v32, %v3556_v52  ;;  %v3626_v32 = vld [vmem:[#allocation6 + $0x50] sm:$0xff]  ;;  %5280 = vmatprep.subr.mxu0 %v4904_v48 }
 0x40b   :  { %v3389_v60 = vmax.f32 %v3249_v3, %v3333_v63  ;;  %v3612_v39 = vmax.f32 %v3500_v4, %v3555_v24  ;;  %v3627_v3 = vld [vmem:[#allocation6 + $0x58] sm:$0xff]  ;;  %v4884_v4 = vld [vmem:[%s7336_s5 + $0x158] sm:$0xff] }
 0x40c   :  { %v3334_v41 = vrot.slane %v3251_v20, 1  ;;  %v3446_v12 = vrot.slane %v3251_v20, 2  ;;  %v3558_v2 = vrot.slane %v3251_v20, 3  ;;  %v4281_v26 = vld [vmem:[#allocation15 + $0x28] sm:$0xff] }
 0x40d   :  { %v3501_v29 = vmax.f32 %v3389_v60, %v3445_v46  ;;  %v4883_v46 = vld [vmem:[%s7336_s5 + $0x150] sm:$0xff] }
 0x40e   :  { %v3391_v22 = vmax.f32 %v3251_v20, %v3334_v41  ;;  %v3335_v30 = vsel %vm3280_vm1, %v3332_v38, %v3334_v41  ;;  %v3447_v57 = vsel %vm3392_vm2, %v3444_v35, %v3446_v12  ;;  %v3559_v47 = vsel %vm3504_vm3, %v3556_v52, %v3558_v2  ;;  %v4885_v35 = vld [vmem:[%s7336_s5 + $0x160] sm:$0xff]  ;;  %v4903_v52 = vld [vmem:[%s7336_s5 + $0x1f0] sm:$0xff]  ;;  %v4902_v20 = vld [vmem:[%s7336_s5 + $0x1e8] sm:$0xff] }
 0x40f   :  { %v3390_v56 = vmax.f32 %v3250_v33, %v3335_v30  ;;  %v3613_v36 = vmax.f32 %v3501_v29, %v3557_v18  ;;  %v3757_v33 = vld [vmem:[%s7336_s5 + $0x10] sm:$0xff]  ;;  %v4901_v18 = vld [vmem:[%s7336_s5 + $0x1e0] sm:$0xff]  ;;  %v4900_v41 = vld [vmem:[%s7336_s5 + $0x1d8] sm:$0xff] }
 0x410   :  { %v3503_v27 = vmax.f32 %v3391_v22, %v3446_v12  ;;  %v4899_v29 = vld [vmem:[%s7336_s5 + $0x1d0] sm:$0xff]  ;;  %v4880_v30 = vld [vmem:[%s7336_s5 + $0x138] sm:$0xff] }
 0x411   :  { %v3502_v44 = vmax.f32 %v3390_v56, %v3447_v57  ;;  %v4898_v57 = vld [vmem:[%s7336_s5 + $0x1c8] sm:$0xff]  ;;  %v4879_v56 = vld [vmem:[%s7336_s5 + $0x130] sm:$0xff] }
 0x412   :  { %v3615_v10 = vmax.f32 %v3503_v27, %v3558_v2  ;;  %v4881_v2 = vld [vmem:[%s7336_s5 + $0x140] sm:$0xff] }
 0x413   :  { %v3614_v37 = vmax.f32 %v3502_v44, %v3559_v47  ;;  %v4878_v44 = vld [vmem:[%s7336_s5 + $0x128] sm:$0xff] }
 0x414   :  { %4848 = vmatpush2.msk.msra.mxu1 %vm3504_vm3, %v3615_v10  ;;  %v4896_v10 = vld [vmem:[%s7336_s5 + $0x1b8] sm:$0xff] }
 0x415   :  { %3697 = vmatprep.subr.mxu1 %v7371_v17 }
 0x416   :  { %3698 = vmatpush2.msra.mxu1 %v3614_v37 }
 0x417   :  { %3699 = vmatprep.subr.mxu1 %v7371_v17 }
 0x418   :  { %3700 = vmatpush2.msra.mxu1 %v3613_v36  ;;  %v4897_v36 = vld [vmem:[%s7336_s5 + $0x1c0] sm:$0xff] }
 0x419   :  { %3701 = vmatprep.subr.mxu1 %v7371_v17 }
 0x41a   :  { %3702 = vmatpush2.msra.mxu1 %v3612_v39  ;;  %v4882_v39 = vld [vmem:[%s7336_s5 + $0x148] sm:$0xff] }
 0x41b   :  { %3703 = vmatprep.subr.mxu1 %v7371_v17 }
 0x41c   :  { %3704 = vmatpush2.msra.mxu1 %v3611_v28  ;;  %v4886_v28 = vld [vmem:[%s7336_s5 + $0x168] sm:$0xff] }
 0x41d   :  { %3705 = vmatprep.subr.mxu1 %v7371_v17 }
 0x41e   :  { %3706 = vmatpush2.msra.mxu1 %v3610_v9  ;;  %v3761_v9 = vld [vmem:[%s7336_s5 + $0x30] sm:$0xff] }
 0x41f   :  { %3707 = vmatprep.subr.mxu1 %v7371_v17 }
 0x420   :  { %3708 = vmatpush2.msra.mxu1 %v3609_v42  ;;  %v3762_v42 = vld [vmem:[%s7336_s5 + $0x38] sm:$0xff] }
 0x421   :  { %3709 = vmatprep.subr.mxu1 %v7371_v17 }
 0x422   :  { %3710 = vmatpush2.msra.mxu1 %v3608_v16  ;;  %v3763_v16 = vld [vmem:[%s7336_s5 + $0x40] sm:$0xff] }
 0x423   :  { %3711 = vmatprep.subr.mxu1 %v7371_v17 }
 0x424   :  { %3712 = vmatpush2.msra.mxu1 %v3607_v6  ;;  %v3764_v6 = vld [vmem:[%s7336_s5 + $0x48] sm:$0xff] }
 0x425   :  { %3713 = vmatprep.subr.mxu1 %v7371_v17 }
 0x426   :  { %3714 = vmatpush2.msra.mxu1 %v3606_v19  ;;  %v3765_v19 = vld [vmem:[%s7336_s5 + $0x50] sm:$0xff] }
 0x427   :  { %3715 = vmatprep.subr.mxu1 %v7371_v17 }
 0x428   :  { %3716 = vmatpush2.msra.mxu1 %v3605_v31  ;;  %v3621_v31 = vld [vmem:[#allocation6 + $0x28] sm:$0xff] }
 0x429   :  { %3717 = vmatprep.subr.mxu1 %v7371_v17 }
 0x42a   :  { %3718 = vmatpush2.msra.mxu1 %v3604_v15  ;;  %v3766_v15 = vld [vmem:[%s7336_s5 + $0x58] sm:$0xff] }
 0x42b   :  { %3720 = vmatmul.mubr.f32.vlgmr.msra.gmra.mxu1 %v3616_v8  ;;  %5166 = vmatprep.subr.mxu1 %v3770_v13  ;;  %v4877_v8 = vld [vmem:[%s7336_s5 + $0x120] sm:$0xff] }
 0x42c   :  { %4850 = vmatprep.mubr.msk.f32.mxu1 %vm3630_vm4, %v3619_v25  ;;  %5167 = vmatpush3.msra.mxu1 %v3770_v13  ;;  %v4895_v13 = vld [vmem:[%s7336_s5 + $0x1b0] sm:$0xff] }
 0x42d   :  { %5168 = vmatprep.subr.mxu1 %v3769_v34 }
 0x42e   :  { %5169 = vmatpush3.msra.mxu1 %v3769_v34  ;;  %v4876_v34 = vld [vmem:[%s7336_s5 + $0x118] sm:$0xff] }
 0x42f   :  { %3725 = vmatmul.mubr.f32.gmra.mxu1 %v3618_v23  ;;  %5170 = vmatprep.subr.mxu1 %v3768_v5  ;;  %v4894_v23 = vld [vmem:[%s7336_s5 + $0x1a8] sm:$0xff] }
 0x430   :  { %4851 = vmatprep.mubr.msk.f32.mxu1 %vm3630_vm4, %v3621_v31  ;;  %5171 = vmatpush3.msra.mxu1 %v3768_v5  ;;  %v4875_v5 = vld [vmem:[%s7336_s5 + $0x110] sm:$0xff]  ;;  %v4893_v31 = vld [vmem:[%s7336_s5 + $0x1a0] sm:$0xff] }
 0x431   :  { %5172 = vmatprep.subr.mxu1 %v3767_v59 }
 0x432   :  { %5173 = vmatpush3.msra.mxu1 %v3767_v59  ;;  %v4874_v59 = vld [vmem:[%s7336_s5 + $0x108] sm:$0xff] }
 0x433   :  { %3730 = vmatmul.mubr.f32.gmra.mxu1 %v3620_v62  ;;  %5174 = vmatprep.subr.mxu1 %v3766_v15  ;;  %v4892_v62 = vld [vmem:[%s7336_s5 + $0x198] sm:$0xff] }
 0x434   :  { %4852 = vmatprep.mubr.msk.f32.mxu1 %vm3630_vm4, %v3623_v61  ;;  %5175 = vmatpush3.msra.mxu1 %v3766_v15  ;;  %v4873_v15 = vld [vmem:[%s7336_s5 + $0x100] sm:$0xff]  ;;  %v4891_v61 = vld [vmem:[%s7336_s5 + $0x190] sm:$0xff] }
 0x435   :  { %5176 = vmatprep.subr.mxu1 %v3765_v19 }
 0x436   :  { %5177 = vmatpush3.msra.mxu1 %v3765_v19  ;;  %v4890_v19 = vld [vmem:[%s7336_s5 + $0x188] sm:$0xff] }
 0x437   :  { %3735 = vmatmul.mubr.f32.gmra.mxu1 %v3622_v43  ;;  %5178 = vmatprep.subr.mxu1 %v3764_v6  ;;  %v4889_v43 = vld [vmem:[%s7336_s5 + $0x180] sm:$0xff] }
 0x438   :  { %4853 = vmatprep.mubr.msk.f32.mxu1 %vm3630_vm4, %v3625_v14  ;;  %5179 = vmatpush3.msra.mxu1 %v3764_v6  ;;  %v4190_v6 = vld [vmem:[#allocation12 + $0x8] sm:$0x1f]  ;;  %v4189_v14 = vld [vmem:[#allocation12] sm:$0xff] }
 0x439   :  { %5180 = vmatprep.subr.mxu1 %v3763_v16 }
 0x43a   :  { %5181 = vmatpush3.msra.mxu1 %v3763_v16  ;;  %v4188_v16 = vld [vmem:[#allocation4] sm:$0xff] }
 0x43b   :  { %3740 = vmatmul.mubr.f32.gmra.mxu1 %v3624_v58  ;;  %5182 = vmatprep.subr.mxu1 %v3762_v42  ;;  %v4299_v58 = vld [vmem:[#allocation16 + $0x78] sm:$0xff] }
 0x43c   :  { %4854 = vmatprep.mubr.msk.f32.mxu1 %vm3630_vm4, %v3627_v3  ;;  %5183 = vmatpush3.msra.mxu1 %v3762_v42  ;;  %v4298_v42 = vld [vmem:[#allocation16 + $0x70] sm:$0xff]  ;;  %v4297_v3 = vld [vmem:[#allocation16 + $0x68] sm:$0xff] }
 0x43d   :  { %5184 = vmatprep.subr.mxu1 %v3761_v9 }
 0x43e   :  { %5185 = vmatpush3.msra.mxu1 %v3761_v9  ;;  %v4296_v9 = vld [vmem:[#allocation16 + $0x60] sm:$0xff] }
 0x43f   :  { %3745 = vmatmul.mubr.f32.gmra.mxu1 %v3626_v32  ;;  %5186 = vmatprep.subr.mxu1 %v3760_v54  ;;  %v4295_v32 = vld [vmem:[#allocation16 + $0x58] sm:$0xff] }
 0x440   :  { %4855 = vmatprep.mubr.msk.f32.mxu1 %vm3630_vm4, %v3629_v45  ;;  %5187 = vmatpush3.msra.mxu1 %v3760_v54  ;;  %v4294_v54 = vld [vmem:[#allocation16 + $0x50] sm:$0xff]  ;;  %v4293_v45 = vld [vmem:[#allocation16 + $0x48] sm:$0xff] }
 0x441   :  { %5188 = vmatprep.subr.mxu1 %v3759_v55 }
 0x442   :  { %5189 = vmatpush3.msra.mxu1 %v3759_v55  ;;  %v4292_v55 = vld [vmem:[#allocation16 + $0x40] sm:$0xff] }
 0x443   :  { %3750 = vmatmul.mubr.f32.gmra.mxu1 %v3628_v50  ;;  %5190 = vmatprep.subr.mxu1 %v3758_v49  ;;  %v4291_v50 = vld [vmem:[#allocation16 + $0x38] sm:$0xff] }
 0x444   :  { %5191 = vmatpush3.msra.mxu1 %v3758_v49  ;;  %v4283_v49 = vld [vmem:[#allocation15 + $0x38] sm:$0xff] }
 0x445   :  { %5192 = vmatprep.subr.mxu1 %v3757_v33 }
 0x446   :  { %5193 = vmatpush3.msra.mxu1 %v3757_v33  ;;  %v4290_v33 = vld [vmem:[#allocation16 + $0x30] sm:$0xff] }
 0x447   :  { %5194 = vmatprep.subr.mxu1 %v3756_v7 }
 0x448   :  { %5195 = vmatpush3.msra.mxu1 %v3756_v7  ;;  %v4282_v7 = vld [vmem:[#allocation15 + $0x30] sm:$0xff] }
 0x449   :  { %5196 = vmatprep.subr.mxu1 %v3755_v1 }
 0x44a   :  { %5197 = vmatpush3.msra.mxu1 %v3755_v1  ;;  %v4289_v1 = vld [vmem:[#allocation16 + $0x28] sm:$0xff] }
 0x44b   :  { %5242 = vmatprep.subr.mxu1 %v4888_v51 }
 0x4eb   :  { %v3721_v21 = vpop.f32.mrf.mxu1 }
 0x4ec   :  { %5198 = vmatprep.mubr.f32.mxu1 %v3721_v21  ;;  %v4287_v21 = vld [vmem:[#allocation16 + $0x18] sm:$0xff] }
 0x4ed   :  { %v3723_v40 = vpop.f32.mrf.mxu1 }
 0x4ee   :  { %v4279_v40 = vld [vmem:[#allocation15 + $0x18] sm:$0xff] }
 0x4ef   :  { %v3726_v0 = vpop.f32.mrf.mxu1 }
 0x4f0   :  { %5199 = vmatmul.mubr.f32.vlgmr.msra.gmra.mxu1 %v3726_v0  ;;  %5236 = vmatprep.mubr.f32.mxu0 %v3726_v0  ;;  %v4286_v0 = vld [vmem:[#allocation16 + $0x10] sm:$0xff] }
 0x4f1   :  { %5243 = vmatpush3.msra.mxu1 %v4888_v51  ;;  %v3728_v24 = vpop.f32.mrf.mxu1  ;;  %v4288_v51 = vld [vmem:[#allocation16 + $0x20] sm:$0xff] }
 0x4f2   :  { %5244 = vmatprep.subr.mxu1 %v4887_v53  ;;  %v4285_v24 = vld [vmem:[#allocation16 + $0x8] sm:$0xff] }
 0x4f3   :  { %5245 = vmatpush3.msra.mxu1 %v4887_v53  ;;  %v3731_v38 = vpop.f32.mrf.mxu1  ;;  %v4278_v53 = vld [vmem:[#allocation15 + $0x10] sm:$0xff] }
 0x4f4   :  { %5246 = vmatprep.subr.mxu1 %v4886_v28  ;;  %5237 = vmatmul.mubr.f32.vlgmr.msra.gmra.mxu0 %v3731_v38 }
 0x4f5   :  { %5247 = vmatpush3.msra.mxu1 %v4886_v28  ;;  %5281 = vmatpush3.msra.mxu0 %v4904_v48  ;;  %v3733_v11 = vpop.f32.mrf.mxu1  ;;  %v4280_v48 = vld [vmem:[#allocation15 + $0x20] sm:$0xff]  ;;  %v4277_v28 = vld [vmem:[#allocation15 + $0x8] sm:$0xff] }
 0x4f6   :  { %5201 = vmatprep.mubr.f32.mxu1 %v3731_v38  ;;  %5248 = vmatprep.subr.mxu1 %v4885_v35 }
 0x4f7   :  { %5282 = vmatprep.subr.mxu0 %v4903_v52  ;;  %5249 = vmatpush3.msra.mxu1 %v4885_v35  ;;  %v7075_v63 = vpop.f32.mrf.mxu1  ;;  %v4276_v35 = vld [vmem:[#allocation15] sm:$0xff] }
 0x4f8   :  { %5283 = vmatpush3.msra.mxu0 %v4903_v52  ;;  %5250 = vmatprep.subr.mxu1 %v4884_v4 }
 0x4f9   :  { %5284 = vmatprep.subr.mxu0 %v4902_v20  ;;  %5202 = vmatmul.mubr.f32.gmra.mxu1 %v7075_v63  ;;  %v3738_v60 = vpop.f32.mrf.mxu1 }
 0x4fa   :  { %5251 = vmatpush3.msra.mxu1 %v4884_v4  ;;  %5285 = vmatpush3.msra.mxu0 %v4902_v20 }
 0x4fb   :  { %5252 = vmatprep.subr.mxu1 %v4883_v46  ;;  %5274 = vmatprep.mubr.f32.mxu1 %v3731_v38  ;;  %v7090_v12 = vpop.f32.mrf.mxu1  ;;  %v4284_v38 = vld [vmem:[#allocation16] sm:$0xff] }
 0x4fc   :  { %5286 = vmatprep.subr.mxu0 %v4901_v18  ;;  %5253 = vmatpush3.msra.mxu1 %v4883_v46  ;;  %v4856_v46 = vld [vmem:[#allocation10] ss:$0 sm:$0xff] }
 0x4fd   :  { %5287 = vmatpush3.msra.mxu0 %v4901_v18  ;;  %5254 = vmatprep.subr.mxu1 %v4882_v39  ;;  %v3743_v22 = vpop.f32.mrf.mxu1 }
 0x4fe   :  { %5288 = vmatprep.subr.mxu0 %v4900_v41  ;;  %5255 = vmatpush3.msra.mxu1 %v4882_v39 }
 0x4ff   :  { %5289 = vmatpush3.msra.mxu0 %v4900_v41  ;;  %5256 = vmatprep.subr.mxu1 %v4881_v2  ;;  %v7104_v47 = vpop.f32.mrf.mxu1 }
 0x500   :  { %5290 = vmatprep.subr.mxu0 %v4899_v29  ;;  %5257 = vmatpush3.msra.mxu1 %v4881_v2 }
 0x501   :  { %5291 = vmatpush3.msra.mxu0 %v4899_v29  ;;  %5258 = vmatprep.subr.mxu1 %v4880_v30  ;;  %v3748_v27 = vpop.f32.mrf.mxu1 }
 0x502   :  { %5292 = vmatprep.subr.mxu0 %v4898_v57  ;;  %5259 = vmatpush3.msra.mxu1 %v4880_v30 }
 0x503   :  { %5293 = vmatpush3.msra.mxu0 %v4898_v57  ;;  %5260 = vmatprep.subr.mxu1 %v4879_v56  ;;  %v7118_v37 = vpop.f32.mrf.mxu1 }
 0x504   :  { %5294 = vmatprep.subr.mxu0 %v4897_v36  ;;  %5261 = vmatpush3.msra.mxu1 %v4879_v56 }
 0x505   :  { %5295 = vmatpush3.msra.mxu0 %v4897_v36  ;;  %5262 = vmatprep.subr.mxu1 %v4878_v44  ;;  %v3753_v25 = vpop.f32.mrf.mxu1 }
 0x506   :  { %5296 = vmatprep.subr.mxu0 %v4896_v10  ;;  %5263 = vmatpush3.msra.mxu1 %v4878_v44 }
 0x507   :  { %5297 = vmatpush3.msra.mxu0 %v4896_v10  ;;  %5264 = vmatprep.subr.mxu1 %v4877_v8 }
 0x508   :  { %5298 = vmatprep.subr.mxu0 %v4895_v13  ;;  %5265 = vmatpush3.msra.mxu1 %v4877_v8  ;;  %v4905_v8 = vld [vmem:[#allocation13] ss:$0 sm:$0xff] }
 0x509   :  { %5299 = vmatpush3.msra.mxu0 %v4895_v13  ;;  %5266 = vmatprep.subr.mxu1 %v4876_v34 }
 0x50a   :  { %5300 = vmatprep.subr.mxu0 %v4894_v23  ;;  %5267 = vmatpush3.msra.mxu1 %v4876_v34 }
 0x50b   :  { %5301 = vmatpush3.msra.mxu0 %v4894_v23  ;;  %5268 = vmatprep.subr.mxu1 %v4875_v5 }
 0x50c   :  { %5302 = vmatprep.subr.mxu0 %v4893_v31  ;;  %5239 = vmatprep.mubr.f32.mxu0 %v7075_v63 }
 0x50d   :  { %5269 = vmatpush3.msra.mxu1 %v4875_v5  ;;  %5303 = vmatpush3.msra.mxu0 %v4893_v31 }
 0x50e   :  { %5240 = vmatmul.mubr.f32.gmra.mxu0 %v7090_v12  ;;  %5270 = vmatprep.subr.mxu1 %v4874_v59 }
 0x50f   :  { %5304 = vmatprep.subr.mxu0 %v4892_v62  ;;  %5271 = vmatpush3.msra.mxu1 %v4874_v59 }
 0x510   :  { %5305 = vmatpush3.msra.mxu0 %v4892_v62  ;;  %5312 = vmatprep.mubr.f32.mxu0 %v7075_v63 }
 0x511   :  { %5272 = vmatprep.subr.mxu1 %v4873_v15  ;;  %5306 = vmatprep.subr.mxu0 %v4891_v61 }
 0x512   :  { %5273 = vmatpush3.msra.mxu1 %v4873_v15  ;;  %5307 = vmatpush3.msra.mxu0 %v4891_v61 }
 0x513   :  { %5275 = vmatmul.mubr.f32.vlgmr.msra.gmra.mxu1 %v7075_v63  ;;  %5308 = vmatprep.subr.mxu0 %v4890_v19 }
 0x514   :  { %5277 = vmatprep.mubr.f32.mxu1 %v7090_v12  ;;  %5309 = vmatpush3.msra.mxu0 %v4890_v19 }
 0x515   :  { %5310 = vmatprep.subr.mxu0 %v4889_v43  ;;  %5318 = vmatprep.subr.mxu1 %v7371_v17 }
 0x516   :  { %5311 = vmatpush3.msra.mxu0 %v4889_v43  ;;  %5319 = vmatpush3.msk.msra.mxu1 %vm3504_vm3, %v4190_v6 }
 0x517   :  { %5278 = vmatmul.mubr.f32.gmra.mxu1 %v7104_v47  ;;  %5313 = vmatmul.mubr.f32.vlgmr.msra.gmra.mxu0 %v7090_v12 }
 0x518   :  { %5315 = vmatprep.mubr.f32.mxu0 %v7104_v47  ;;  %5320 = vmatprep.subr.mxu1 %v7371_v17 }
 0x519   :  { %5321 = vmatpush3.msra.mxu1 %v4189_v14  ;;  %5322 = vmatprep.mubr.msk.f32.mxu1 %vm5813_vm6, %v7371_v17 }
 0x51a   :  { %5325 = vmatprep.subr.mxu1 %v7371_v17  ;;  %5360 = vmatprep.subr.mxu0 %v7371_v17 }
 0x51b   :  { %5316 = vmatmul.mubr.f32.gmra.mxu0 %v7118_v37  ;;  %5323 = vmatmul.mubr.msk.f32.vlgmr.msra.gmra.mxu1 %vm4198_vm5, %v4188_v16 }
 0x51c   :  { %5357 = vmatprep.mubr.msk.f32.mxu1 %vm5813_vm6, %v7371_v17  ;;  %5376 = vmatprep.mubr.msk.f32.mxu0 %vm5813_vm6, %v7371_v17 }
 0x51d   :  { %5326 = vmatpush3.msra.mxu1 %v4299_v58  ;;  %5361 = vmatpush3.msra.mxu0 %v4283_v49  ;;  %v4465_v49 = vld [vmem:[%s7343_s12 + $0x60] sm:$0xff] }
 0x51e   :  { %5327 = vmatprep.subr.mxu1 %v7371_v17  ;;  %5362 = vmatprep.subr.mxu0 %v7371_v17 }
 0x51f   :  { %5328 = vmatpush3.msra.mxu1 %v4298_v42  ;;  %5363 = vmatpush3.msra.mxu0 %v4282_v7  ;;  %v4463_v7 = vld [vmem:[%s7343_s12 + $0x50] sm:$0xff] }
 0x520   :  { %5329 = vmatprep.subr.mxu1 %v7371_v17  ;;  %5364 = vmatprep.subr.mxu0 %v7371_v17 }
 0x521   :  { %5330 = vmatpush3.msra.mxu1 %v4297_v3  ;;  %5365 = vmatpush3.msra.mxu0 %v4281_v26  ;;  %v4461_v26 = vld [vmem:[%s7343_s12 + $0x40] sm:$0xff] }
 0x522   :  { %5331 = vmatprep.subr.mxu1 %v7371_v17  ;;  %5366 = vmatprep.subr.mxu0 %v7371_v17 }
 0x523   :  { %5332 = vmatpush3.msra.mxu1 %v4296_v9  ;;  %5367 = vmatpush3.msra.mxu0 %v4280_v48  ;;  %v4459_v48 = vld [vmem:[%s7343_s12 + $0x30] sm:$0xff] }
 0x524   :  { %5333 = vmatprep.subr.mxu1 %v7371_v17  ;;  %5368 = vmatprep.subr.mxu0 %v7371_v17 }
 0x525   :  { %5334 = vmatpush3.msra.mxu1 %v4295_v32  ;;  %5369 = vmatpush3.msra.mxu0 %v4279_v40  ;;  %v4457_v40 = vld [vmem:[%s7343_s12 + $0x20] sm:$0xff] }
 0x526   :  { %5335 = vmatprep.subr.mxu1 %v7371_v17  ;;  %5370 = vmatprep.subr.mxu0 %v7371_v17 }
 0x527   :  { %5336 = vmatpush3.msra.mxu1 %v4294_v54  ;;  %5371 = vmatpush3.msra.mxu0 %v4278_v53  ;;  %v4455_v53 = vld [vmem:[%s7343_s12 + $0x10] sm:$0xff] }
 0x528   :  { %5337 = vmatprep.subr.mxu1 %v7371_v17  ;;  %5372 = vmatprep.subr.mxu0 %v7371_v17 }
 0x529   :  { %5338 = vmatpush3.msra.mxu1 %v4293_v45  ;;  %5373 = vmatpush3.msra.mxu0 %v4277_v28  ;;  %v4468_v45 = vld [vmem:[%s7343_s12 + $0x78] sm:$0xff]  ;;  %v4453_v28 = vld [vmem:[%s7343_s12] sm:$0xff] }
 0x52a   :  { %5339 = vmatprep.subr.mxu1 %v7371_v17  ;;  %5374 = vmatprep.subr.mxu0 %v7371_v17 }
 0x52b   :  { %5340 = vmatpush3.msra.mxu1 %v4292_v55  ;;  %5375 = vmatpush3.msra.mxu0 %v4276_v35  ;;  %v4467_v55 = vld [vmem:[%s7343_s12 + $0x70] sm:$0xff] }
 0x52c   :  { %5341 = vmatprep.subr.mxu1 %v7371_v17  ;;  %5379 = vmatprep.subr.mxu0 %v7371_v17  ;;  %v4553_v35 = vld [vmem:[%s7345_s14 + $0x30] sm:$0xff] }
 0x52d   :  { %5342 = vmatpush3.msra.mxu1 %v4291_v50  ;;  %v4466_v50 = vld [vmem:[%s7343_s12 + $0x68] sm:$0xff] }
 0x52e   :  { %5343 = vmatprep.subr.mxu1 %v7371_v17 }
 0x52f   :  { %5344 = vmatpush3.msra.mxu1 %v4290_v33  ;;  %v4464_v33 = vld [vmem:[%s7343_s12 + $0x58] sm:$0xff] }
 0x530   :  { %5345 = vmatprep.subr.mxu1 %v7371_v17 }
 0x531   :  { %5346 = vmatpush3.msra.mxu1 %v4289_v1  ;;  %v4462_v1 = vld [vmem:[%s7343_s12 + $0x48] sm:$0xff] }
 0x532   :  { %5347 = vmatprep.subr.mxu1 %v7371_v17 }
 0x533   :  { %5348 = vmatpush3.msra.mxu1 %v4288_v51  ;;  %v4460_v51 = vld [vmem:[%s7343_s12 + $0x38] sm:$0xff] }
 0x534   :  { %5349 = vmatprep.subr.mxu1 %v7371_v17 }
 0x535   :  { %5350 = vmatpush3.msra.mxu1 %v4287_v21  ;;  %v4458_v21 = vld [vmem:[%s7343_s12 + $0x28] sm:$0xff] }
 0x536   :  { %5351 = vmatprep.subr.mxu1 %v7371_v17 }
 0x537   :  { %5352 = vmatpush3.msra.mxu1 %v4286_v0  ;;  %v4456_v0 = vld [vmem:[%s7343_s12 + $0x18] sm:$0xff] }
 0x538   :  { %5353 = vmatprep.subr.mxu1 %v7371_v17 }
 0x539   :  { %5354 = vmatpush3.msra.mxu1 %v4285_v24  ;;  %v4454_v24 = vld [vmem:[%s7343_s12 + $0x8] sm:$0xff] }
 0x53a   :  { %5355 = vmatprep.subr.mxu1 %v7371_v17 }
 0x53b   :  { %5356 = vmatpush3.msra.mxu1 %v4284_v38  ;;  %v4554_v38 = vld [vmem:[%s7345_s14 + $0x38] sm:$0xff] }
 0x53c   :  { %5414 = vmatprep.subr.mxu1 %v7371_v17 }
 0x5b0   :  { %v5200_v52 = vpop.f32.mrf.mxu1 }
 0x5b1   :  { %v3850_v41 = vadd.f32 %v5200_v52, %v4856_v46  ;;  %v4552_v52 = vld [vmem:[%s7345_s14 + $0x28] sm:$0xff] }
 0x5b2   :  { %v3844_v11 = vpop.f32.mrf.mxu1 }
 0x5b3   :  { %v3845_v12 = vadd.f32 %v4856_v46, %v3844_v11  ;;  %v4551_v11 = vld [vmem:[%s7345_s14 + $0x20] sm:$0xff] }
 0x5b4   :  { %v5238_v4 = vpop.f32.mrf.mxu0 }
 0x5b5   :  { %v3966_v22 = vadd.f32 %v5238_v4, %v3850_v41  ;;  %v4550_v4 = vld [vmem:[%s7345_s14 + $0x18] sm:$0xff] }
 0x5b6   :  { %v3946_v63 = vpop.f32.mrf.mxu0 }
 0x5b7   :  { %v3965_v30 = vadd.f32 %v3946_v63, %v3845_v12 }
 0x5b9   :  { %v5203_v20 = vpop.f32.mrf.mxu1 }
 0x5ba   :  { %v3860_v57 = vadd.f32 %v5203_v20, %v4856_v46 }
 0x5bb   :  { %v3854_v18 = vpop.f32.mrf.mxu1 }
 0x5bc   :  { %v3855_v47 = vadd.f32 %v4856_v46, %v3854_v18  ;;  %v4909_v18 = vld [vmem:[#allocation18] ss:$0 sm:$0xff] }
 0x5ce   :  { %v5241_v60 = vpop.f32.mrf.mxu0 }
 0x5cf   :  { %v3968_v13 = vadd.f32 %v5241_v60, %v3860_v57 }
 0x5d0   :  { %v3956_v2 = vpop.f32.mrf.mxu0 }
 0x5d1   :  { %v3967_v25 = vadd.f32 %v3956_v2, %v3855_v47  ;;  %v4549_v2 = vld [vmem:[%s7345_s14 + $0x10] sm:$0xff] }
 0x5d3   :  { %v5276_v39 = vpop.f32.mrf.mxu1 }
 0x5d4   :  { %v4072_v27 = vadd.f32 %v5276_v39, %v3966_v22  ;;  %v4547_v22 = vld [vmem:[%s7345_s14] sm:$0xff] }
 0x5d5   :  { %v4052_v29 = vpop.f32.mrf.mxu1 }
 0x5d6   :  { %v4071_v44 = vadd.f32 %v4052_v29, %v3965_v30  ;;  %v4548_v29 = vld [vmem:[%s7345_s14 + $0x8] sm:$0xff]  ;;  %v4910_v30 = vld [vmem:[#allocation19] ss:$0 sm:$0xff] }
 0x5d7   :  { %v5279_v56 = vpop.f32.mrf.mxu1  ;;  %v5314_v36 = vpop.f32.mrf.mxu0 }
 0x5d8   :  { %v4178_v34 = vadd.f32 %v5314_v36, %v4072_v27  ;;  %v4074_v59 = vadd.f32 %v5279_v56, %v3968_v13  ;;  %v4639_v27 = vld [vmem:[%s7347_s16 + $0x18] sm:$0xff] }
 0x5d9   :  { %v4062_v10 = vpop.f32.mrf.mxu1  ;;  %v4158_v37 = vpop.f32.mrf.mxu0 }
 0x5da   :  { %v4177_v23 = vadd.f32 %v4158_v37, %v4071_v44  ;;  %v4073_v62 = vadd.f32 %v4062_v10, %v3967_v25  ;;  %v4182_v6 = vmax.f32 %v4178_v34, 0.0  ;;  %v4638_v44 = vld [vmem:[%s7347_s16 + $0x10] sm:$0xff]  ;;  %v4637_v10 = vld [vmem:[%s7347_s16 + $0x8] sm:$0xff]  ;;  %v4636_v37 = vld [vmem:[%s7347_s16] sm:$0xff] }
 0x5db   :  { %v5317_v5 = vpop.f32.mrf.mxu0  ;;  %v4271_v31 = vpop.f32.mrf.mxu1 }
 0x5dc   :  { %v4181_v15 = vmax.f32 %v4177_v23, 0.0  ;;  %v4272_v61 = vadd.f32 %v4905_v8, %v4271_v31  ;;  %v4180_v14 = vadd.f32 %v5317_v5, %v4074_v59  ;;  %v4911_v8 = vld [vmem:[#allocation21] ss:$0 sm:$0xff]  ;;  %v4723_v5 = vld [vmem:[%s7349_s18 + $0x8] sm:$0xff]  ;;  %v4722_v31 = vld [vmem:[%s7349_s18] sm:$0xff] }
 0x5dd   :  { %v4168_v19 = vpop.f32.mrf.mxu0  ;;  %v5324_v43 = vpop.f32.mrf.mxu1  ;;  %v4913_v59 = vld [vmem:[#allocation22] ss:$0 sm:$0xff] }
 0x5de   :  { %v4179_v16 = vadd.f32 %v4168_v19, %v4073_v62  ;;  %v4275_v58 = vmax.f32 %v4272_v61, 0.0  ;;  %v4185_v42 = vmax.f32 %v4181_v15, %v4182_v6  ;;  %v4184_v9 = vmax.f32 %v4180_v14, 0.0  ;;  %v4915_v43 = vld [vmem:[#allocation24] ss:$0 sm:$0xff] }
 0x5e0   :  { %v4183_v3 = vmax.f32 %v4179_v16, 0.0  ;;  %5358 = vmatmul.mubr.f32.vlgmr.msra.gmra.mxu1 %v4275_v58 }
 0x5e1   :  { %5430 = vmatprep.mubr.msk.f32.mxu1 %vm5813_vm6, %v7371_v17  ;;  %5415 = vmatpush3.msra.mxu1 %v4554_v38 }
 0x5e2   :  { %v4186_v32 = vmax.f32 %v4185_v42, %v4183_v3  ;;  %5416 = vmatprep.subr.mxu1 %v7371_v17 }
 0x5e3   :  { %5417 = vmatpush3.msra.mxu1 %v4553_v35 }
 0x5e4   :  { %v4187_v54 = vmax.f32 %v4186_v32, %v4184_v9  ;;  %5418 = vmatprep.subr.mxu1 %v7371_v17 }
 0x5e5   :  { %5419 = vmatpush3.msra.mxu1 %v4552_v52 }
 0x5e6   :  { %5377 = vmatmul.mubr.msk.f32.vlgmr.msra.gmra.mxu0 %vm4370_vm7, %v4187_v54  ;;  %5420 = vmatprep.subr.mxu1 %v7371_v17 }
 0x5e7   :  { %5380 = vmatpush3.msra.mxu0 %v4468_v45  ;;  %5411 = vmatprep.mubr.msk.f32.mxu0 %vm5813_vm6, %v7371_v17 }
 0x5e8   :  { %5381 = vmatprep.subr.mxu0 %v7371_v17  ;;  %5421 = vmatpush3.msra.mxu1 %v4551_v11 }
 0x5e9   :  { %5382 = vmatpush3.msra.mxu0 %v4467_v55  ;;  %5422 = vmatprep.subr.mxu1 %v7371_v17 }
 0x5ea   :  { %5383 = vmatprep.subr.mxu0 %v7371_v17  ;;  %5423 = vmatpush3.msra.mxu1 %v4550_v4 }
 0x5eb   :  { %5384 = vmatpush3.msra.mxu0 %v4466_v50  ;;  %5424 = vmatprep.subr.mxu1 %v7371_v17 }
 0x5ec   :  { %5385 = vmatprep.subr.mxu0 %v7371_v17  ;;  %5425 = vmatpush3.msra.mxu1 %v4549_v2 }
 0x5ed   :  { %5386 = vmatpush3.msra.mxu0 %v4465_v49  ;;  %5426 = vmatprep.subr.mxu1 %v7371_v17 }
 0x5ee   :  { %5387 = vmatprep.subr.mxu0 %v7371_v17  ;;  %5427 = vmatpush3.msra.mxu1 %v4548_v29 }
 0x5ef   :  { %5388 = vmatpush3.msra.mxu0 %v4464_v33  ;;  %5428 = vmatprep.subr.mxu1 %v7371_v17 }
 0x5f0   :  { %5389 = vmatprep.subr.mxu0 %v7371_v17  ;;  %5429 = vmatpush3.msra.mxu1 %v4547_v22 }
 0x5f1   :  { %5390 = vmatpush3.msra.mxu0 %v4463_v7  ;;  %5433 = vmatprep.subr.mxu1 %v7371_v17 }
 0x5f2   :  { %5391 = vmatprep.subr.mxu0 %v7371_v17 }
 0x5f3   :  { %5392 = vmatpush3.msra.mxu0 %v4462_v1 }
 0x5f4   :  { %5393 = vmatprep.subr.mxu0 %v7371_v17 }
 0x5f5   :  { %5394 = vmatpush3.msra.mxu0 %v4461_v26 }
 0x5f6   :  { %5395 = vmatprep.subr.mxu0 %v7371_v17 }
 0x5f7   :  { %5396 = vmatpush3.msra.mxu0 %v4460_v51 }
 0x5f8   :  { %5397 = vmatprep.subr.mxu0 %v7371_v17 }
 0x5f9   :  { %5398 = vmatpush3.msra.mxu0 %v4459_v48 }
 0x5fa   :  { %5399 = vmatprep.subr.mxu0 %v7371_v17 }
 0x5fb   :  { %5400 = vmatpush3.msra.mxu0 %v4458_v21 }
 0x5fc   :  { %5401 = vmatprep.subr.mxu0 %v7371_v17 }
 0x5fd   :  { %5402 = vmatpush3.msra.mxu0 %v4457_v40 }
 0x5fe   :  { %5403 = vmatprep.subr.mxu0 %v7371_v17 }
 0x5ff   :  { %5404 = vmatpush3.msra.mxu0 %v4456_v0 }
 0x600   :  { %5405 = vmatprep.subr.mxu0 %v7371_v17 }
 0x601   :  { %5406 = vmatpush3.msra.mxu0 %v4455_v53 }
 0x602   :  { %5407 = vmatprep.subr.mxu0 %v7371_v17 }
 0x603   :  { %5408 = vmatpush3.msra.mxu0 %v4454_v24 }
 0x604   :  { %5409 = vmatprep.subr.mxu0 %v7371_v17 }
 0x605   :  { %5410 = vmatpush3.msra.mxu0 %v4453_v28 }
 0x6a0   :  { %v4366_v20 = vpop.f32.mrf.mxu1 }
 0x6a2   :  { %v5359_v63 = vpop.f32.mrf.mxu1 }
 0x6a6   :  { %v4440_v46 = vpop.f32.mrf.mxu0 }
 0x6a7   :  { %v4441_v60 = vadd.f32 %v4440_v46, %v4366_v20 }
 0x6a8   :  { %v5378_v39 = vpop.f32.mrf.mxu0 }
 0x6a9   :  { %v4451_v41 = vadd.f32 %v4909_v18, %v4441_v60 }
 0x6ab   :  { %v4452_v12 = vmax.f32 %v4451_v41, 0.0 }
 0x6ad   :  { %5412 = vmatmul.mubr.f32.vlgmr.msra.gmra.mxu0 %v4452_v12 }
 0x76d   :  { %v4542_v57 = vpop.f32.mrf.mxu0 }
 0x76e   :  { %v4543_v47 = vadd.f32 %v4910_v30, %v4542_v57 }
 0x76f   :  { %v5413_v56 = vpop.f32.mrf.mxu0 }
 0x770   :  { %v4546_v36 = vmax.f32 %v4543_v47, 0.0 }
 0x772   :  { %5431 = vmatmul.mubr.msk.f32.vlgmr.msra.gmra.mxu1 %vm4370_vm7, %v4546_v36 }
 0x773   :  { %5434 = vmatpush3.msra.mxu1 %v4639_v27  ;;  %5441 = vmatprep.mubr.msk.f32.mxu1 %vm5813_vm6, %v7371_v17 }
 0x774   :  { %5435 = vmatprep.subr.mxu1 %v7371_v17 }
 0x775   :  { %5436 = vmatpush3.msra.mxu1 %v4638_v44 }
 0x776   :  { %5437 = vmatprep.subr.mxu1 %v7371_v17 }
 0x777   :  { %5438 = vmatpush3.msra.mxu1 %v4637_v10 }
 0x778   :  { %5439 = vmatprep.subr.mxu1 %v7371_v17 }
 0x779   :  { %5440 = vmatpush3.msra.mxu1 %v4636_v37 }
 0x77a   :  { %5444 = vmatprep.subr.mxu1 %v7371_v17 }
 0x832   :  { %v4631_v13 = vpop.f32.mrf.mxu1 }
 0x833   :  { %v4632_v25 = vadd.f32 %v4911_v8, %v4631_v13 }
 0x834   :  { %v5432_v34 = vpop.f32.mrf.mxu1 }
 0x835   :  { %v4635_v23 = vmax.f32 %v4632_v25, 0.0 }
 0x837   :  { %5442 = vmatmul.mubr.msk.f32.vlgmr.msra.gmra.mxu1 %vm4647_vm8, %v4635_v23 }
 0x838   :  { %5448 = vmatprep.mubr.msk.f32.mxu1 %vm5813_vm6, %v7371_v17  ;;  %5445 = vmatpush3.msra.mxu1 %v4723_v5 }
 0x839   :  { %5446 = vmatprep.subr.mxu1 %v7371_v17 }
 0x83a   :  { %5447 = vmatpush3.msra.mxu1 %v4722_v31 }
 0x8f7   :  { %v4717_v62 = vpop.f32.mrf.mxu1 }
 0x8f8   :  { %v4718_v15 = vadd.f32 %v4913_v59, %v4717_v62 }
 0x8f9   :  { %v5443_v61 = vpop.f32.mrf.mxu1 }
 0x8fa   :  { %v4721_v19 = vmax.f32 %v4718_v15, 0.0 }
 0x8fc   :  { %5449 = vmatmul.mubr.msk.f32.vlgmr.msra.gmra.mxu1 %vm4731_vm9, %v4721_v19 }
 0x9bc   :  { %v4801_v6 = vpop.f32.mrf.mxu1 }
 0x9bd   :  { %v4802_v14 = vadd.f32 %v4915_v43, %v4801_v6 }
 0x9be   :  { %v5450_v16 = vpop.f32.mrf.mxu1 }
 0x9bf   :  { %4806 = vst.msk [vmem:[%s7351_s20] sm:$0xff] %vm4805_vm10, %v4802_v14 }
 0x9c0   :  { %4811 = vsyncpa [#allocation3], 1 }
 0x9c1   :  { %4812 = vsyncpa [#allocation5], 1 }
 0x9c2   :  { %4813 = vsyncpa [#allocation8], 1 }
 0x9c3   :  { %4814 = vsyncpa [#allocation11], 1 }
 0x9c4   :  { %4815 = vsyncpa [#allocation14], 1 }
 0x9c5   :  { %4816 = vsyncpa [#allocation17], 1 }
 0x9c6   :  { %4817 = vsyncpa [#allocation20], 1 }
 0x9c7   :  { %4818 = vsyncpa [#allocation23], 1 }

</bundles_post_ra>
